<compile_context>
chip_gen: v7x
topology: tpu7x:2x2x1
jax: 0.10.0
libtpu: 0.0.40
codegen_flags: <defaults>
</compile_context>

<pallas_src>
import math

import jax
import jax.numpy as jnp
import numpy as np
from jax import lax
from jax.experimental import pallas as pl
from jax.experimental.pallas import tpu as pltpu

BN_EPS = 1e-5
NB = 8  # batch rows per grid step (one full sublane group)

# Static per-stage geometry: (k, pad, hi, cin, cout) with square spatial dims.
_STAGE_DEFS = [
    (5, 2, 28, 1, 6),
    (5, 2, 14, 6, 16),
    (3, 2, 7, 16, 32),
    (3, 2, 5, 32, 64),
]


def _stage_geom(k, pad, hi, cin, cout):
    ho = hi + 2 * pad - k + 1        # conv output size
    nod = ho // 2                    # number of odd conv rows/cols (pool reads only those)
    pho = (ho + 1) // 2              # pooled output size
    wpad = hi + 2 * pad              # padded input width
    return dict(
        k=k, pad=pad, hi=hi, cin=cin, cout=cout, ho=ho, nod=nod, pho=pho,
        wpad=wpad, lin=wpad * cin, nl=2 * pho * cout,
        halloc=max(hi + 2 * pad, k + 2 * nod),   # rows allocated; spares stay zero
    )


_STAGES = [_stage_geom(*d) for d in _STAGE_DEFS]


# ---------------------------------------------------------------------------
# In-kernel building blocks
# ---------------------------------------------------------------------------
def _conv_pool_stage(read_rows, t_ref, bias_ref, g):
    """Fused conv (odd output rows/cols only, BN scale folded into weights)
    + dilated 2x2 max-pool + folded bias + ReLU, entirely on VMEM values."""
    k, nod, pho, cout = g["k"], g["nod"], g["pho"], g["cout"]
    lin, nl = g["lin"], g["nl"]

    acc = None
    for ki in range(k):                              # one matmul per kernel-row tap
        blk = read_rows(1 + ki, 2 * nod)             # (2*nod, NB, lin) f32
        rows = blk.reshape(nod, 2, NB, lin)[:, 0]    # inputs of odd conv rows only
        lhs = rows.reshape(nod * NB, lin).astype(jnp.bfloat16)
        part = jnp.dot(lhs, t_ref[ki], preferred_element_type=jnp.float32)
        acc = part if acc is None else acc + part

    z = acc.reshape(nod, NB, nl)     # lanes = (col-tap dj, pooled col pj, cout)

    # Max-pool over rows: pooled row pi = max(odd conv row pi-1, odd conv row pi).
    parts = [z[0:1]]                                 # pi=0: only the lower tap exists
    if nod > 1:
        parts.append(jnp.maximum(z[:nod - 1], z[1:]))
    if pho == nod + 1:                               # conv height odd: last row has one tap
        parts.append(z[nod - 1:nod])
    rowmax = jnp.concatenate(parts, axis=0)          # (pho, NB, nl)

    # Max-pool over cols: the two column taps live in the two lane halves.
    half = pho * cout
    colmax = jnp.maximum(rowmax[:, :, :half], rowmax[:, :, half:])

    # Folded conv/BN bias, then ReLU (valid after the max: bias shared per channel).
    return jnp.maximum(colmax + bias_ref[...], 0.0)  # (pho, NB, pho*cout)


def _store_zero_padded(ap_ref, act, pad, pho, cout):
    """Write a stage output into the interior of the next stage's zero-padded
    VMEM activation buffer (zero border == conv padding)."""
    ap_ref[...] = jnp.zeros_like(ap_ref)
    ap_ref[pad:pad + pho, :, pad * cout:(pad + pho) * cout] = act


def _net_kernel(x_ref,
                t1_ref, c1_ref, t2_ref, c2_ref, t3_ref, c3_ref, t4_ref, c4_ref,
                w1_ref, d1_ref, w2_ref, d2_ref, w3_ref, d3_ref,
                o_ref,
                ap2_ref, ap3_ref, ap4_ref):
    g1, g2, g3, g4 = _STAGES

    # ---- stage 1 reads the (pre-padded) input block directly ----
    a1 = _conv_pool_stage(lambda r0, n: x_ref[r0:r0 + n], t1_ref, c1_ref, g1)
    _store_zero_padded(ap2_ref, a1, g2["pad"], g1["pho"], g1["cout"])

    # ---- stages 2..4 read the previous stage's zero-padded VMEM scratch ----
    a2 = _conv_pool_stage(lambda r0, n: ap2_ref[r0:r0 + n], t2_ref, c2_ref, g2)
    _store_zero_padded(ap3_ref, a2, g3["pad"], g2["pho"], g2["cout"])

    a3 = _conv_pool_stage(lambda r0, n: ap3_ref[r0:r0 + n], t3_ref, c3_ref, g3)
    _store_zero_padded(ap4_ref, a3, g4["pad"], g3["pho"], g3["cout"])

    a4 = _conv_pool_stage(lambda r0, n: ap4_ref[r0:r0 + n], t4_ref, c4_ref, g4)
    # a4: (4, NB, 4*64).  fc1 is a sum over the 4 pooled rows; torch's NCHW
    # flatten permutation is folded into w1_ref's block layout (no relayout).

    h = None
    for i in range(g4["pho"]):
        part = jnp.dot(a4[i].astype(jnp.bfloat16), w1_ref[i],
                       preferred_element_type=jnp.float32)
        h = part if h is None else h + part
    h = jnp.maximum(h + d1_ref[...], 0.0)                                   # fc1+bn5+relu
    h = jnp.dot(h.astype(jnp.bfloat16), w2_ref[...],
                preferred_element_type=jnp.float32)
    h = jnp.maximum(h + d2_ref[...], 0.0)                                   # fc2+bn6+relu
    h = jnp.dot(h.astype(jnp.bfloat16), w3_ref[...],
                preferred_element_type=jnp.float32)
    o_ref[...] = h + d3_ref[...]                                            # fc3


# ---------------------------------------------------------------------------
# One-time weight preparation (numpy, outside jit): BN folding + layouts
# ---------------------------------------------------------------------------
def _fold_bn(bn):
    gamma, beta, mean, var = (np.asarray(t, np.float32) for t in bn)
    scale = gamma / np.sqrt(var + BN_EPS)
    return scale, beta - mean * scale


def _build_toeplitz(wt, scale, g):
    """T[ki, wcol*cin + ci, dj*half + pj*cout + co]: one matmul per kernel-row
    tap ki maps a padded input row to every (pooled col, column-tap) pair."""
    k, pad, cin, cout = g["k"], g["pad"], g["cin"], g["cout"]
    wo, pho, lin = g["ho"], g["pho"], g["lin"]
    half = pho * cout
    # w_eff[ki, kj, ci, co] = Wt[co, ci, ki, kj] * bn_scale[co]
    w_eff = np.transpose(wt, (2, 3, 1, 0)).astype(np.float32) * scale[None, None, None, :]
    t = np.zeros((k, lin, 2 * half), np.float32)
    for dj in (0, 1):
        for pj in range(pho):
            c = 2 * (pj + dj) - 1              # conv column read by this pooling tap
            if not 0 <= c < wo:                # out-of-range tap (pool padding):
                c = 2 * (pj + 1 - dj) - 1      #   duplicate the partner tap (max is a no-op)
            lane0 = dj * half + pj * cout
            for kj in range(k):
                wcol = c + kj
                t[:, wcol * cin:(wcol + 1) * cin, lane0:lane0 + cout] = w_eff[:, kj]
    return t


def prepare_params(params):
    """Fold BN into conv/FC weights and pre-lay them out for the fused kernel."""
    prep = []
    for idx, (cname, bname) in enumerate(
            [("conv1", "bn1"), ("conv2", "bn2"), ("conv3", "bn3"), ("conv4", "bn4")]):
        g = _STAGES[idx]
        w, b = (np.asarray(t, np.float32) for t in params[cname])
        scale, shift = _fold_bn(params[bname])
        bias = np.tile(b * scale + shift, g["pho"]).reshape(1, 1, g["pho"] * g["cout"])
        prep.append(jnp.asarray(_build_toeplitz(w, scale, g), jnp.bfloat16))
        prep.append(jnp.asarray(bias, jnp.float32))

    # fc1 + bn5: absorb torch's NCHW flatten into per-pooled-row weight blocks.
    w1, b1 = (np.asarray(t, np.float32) for t in params["fc1"])
    s5, sh5 = _fold_bn(params["bn5"])
    w1_blk = w1.reshape(120, 64, 4, 4).transpose(2, 3, 1, 0).reshape(4, 4 * 64, 120)
    prep.append(jnp.asarray(w1_blk * s5[None, None, :], jnp.bfloat16))
    prep.append(jnp.asarray((b1 * s5 + sh5).reshape(1, 120), jnp.float32))

    w2, b2 = (np.asarray(t, np.float32) for t in params["fc2"])
    s6, sh6 = _fold_bn(params["bn6"])
    prep.append(jnp.asarray(w2.T * s6[None, :], jnp.bfloat16))
    prep.append(jnp.asarray((b2 * s6 + sh6).reshape(1, 84), jnp.float32))

    w3, b3 = (np.asarray(t, np.float32) for t in params["fc3"])
    prep.append(jnp.asarray(w3.T, jnp.bfloat16))
    prep.append(jnp.asarray(b3.reshape(1, 10), jnp.float32))
    return tuple(prep)


# ---------------------------------------------------------------------------
# Forward pass: one fused pallas_call, gridded over batch blocks
# ---------------------------------------------------------------------------
def _const_index_map(ndim):
    def index_map(b):
        return (0,) * ndim
    return index_map


@jax.jit
def net_forward(x_nchw, prep):
    n, cin, hi, wi = x_nchw.shape
    g1 = _STAGES[0]
    assert (cin, hi, wi) == (1, g1["hi"], g1["hi"]), "Net expects (N, 1, 28, 28) inputs"
    npad = ((n + NB - 1) // NB) * NB

    # Input layout prep (the only wrapper-side data movement): NCHW ->
    # (padded row, batch, padded col), plus one spare zero row so every
    # in-kernel row-tap slice stays in range.
    x = jnp.transpose(x_nchw.astype(jnp.float32).reshape(n, hi, wi), (1, 0, 2))
    x = jnp.pad(x, ((g1["pad"], g1["halloc"] - g1["pad"] - hi),
                    (0, npad - n),
                    (g1["pad"], g1["pad"])))          # (33, npad, 32)

    in_specs = [pl.BlockSpec((g1["halloc"], NB, g1["lin"]), lambda b: (0, b, 0))]
    in_specs += [pl.BlockSpec(w.shape, _const_index_map(w.ndim)) for w in prep]

    out = pl.pallas_call(
        _net_kernel,
        out_shape=jax.ShapeDtypeStruct((npad, 10), jnp.float32),
        grid_spec=pltpu.PrefetchScalarGridSpec(
            num_scalar_prefetch=0,
            grid=(npad // NB,),
            in_specs=in_specs,
            out_specs=pl.BlockSpec((NB, 10), lambda b: (b, 0)),
            scratch_shapes=[
                pltpu.VMEM((g["halloc"], NB, g["lin"]), jnp.float32)
                for g in _STAGES[1:]
            ],
        ),
        compiler_params=pltpu.CompilerParams(
            dimension_semantics=("parallel",),
            vmem_limit_bytes=32 * 1024 * 1024,
        ),
    )(x, *prep)
    return out[:n]


# ---------------------------------------------------------------------------
# Pure-JAX f32 reference of the PyTorch forward pass (self-check only)
# ---------------------------------------------------------------------------
@jax.jit
def net_reference(x, params):
    def bn(y, p, nd):
        g, b, m, v = p
        shape = (1, -1) + (1,) * (nd - 2)
        return ((y - m.reshape(shape)) / jnp.sqrt(v.reshape(shape) + BN_EPS)
                * g.reshape(shape) + b.reshape(shape))

    def pool(y):
        return lax.reduce_window(y, -jnp.inf, lax.max, (1, 1, 2, 2), (1, 1, 2, 2),
                                 ((0, 0), (0, 0), (1, 1), (1, 1)),
                                 window_dilation=(1, 1, 2, 2))

    h = x.astype(jnp.float32)
    for cname, bname in [("conv1", "bn1"), ("conv2", "bn2"),
                         ("conv3", "bn3"), ("conv4", "bn4")]:
        w, b = params[cname]
        h = lax.conv_general_dilated(h, w, (1, 1), ((2, 2), (2, 2)),
                                     dimension_numbers=("NCHW", "OIHW", "NCHW"))
        h = pool(jax.nn.relu(bn(h + b.reshape(1, -1, 1, 1), params[bname], 4)))
    h = h.reshape(h.shape[0], -1)
    w, b = params["fc1"]
    h = jax.nn.relu(bn(h @ w.T + b, params["bn5"], 2))
    w, b = params["fc2"]
    h = jax.nn.relu(bn(h @ w.T + b, params["bn6"], 2))
    w, b = params["fc3"]
    return h @ w.T + b


# ---------------------------------------------------------------------------
# Deterministic parameter initialization (shapes from Net.__init__)
# ---------------------------------------------------------------------------
def init_params(key):
    keys = iter(jax.random.split(key, 40))

    def conv(cout, cin, k):
        bound = 1.0 / math.sqrt(cin * k * k)
        w = jax.random.uniform(next(keys), (cout, cin, k, k), jnp.float32, -bound, bound)
        b = jax.random.uniform(next(keys), (cout,), jnp.float32, -bound, bound)
        return (w, b)

    def lin(fout, fin):
        bound = 1.0 / math.sqrt(fin)
        w = jax.random.uniform(next(keys), (fout, fin), jnp.float32, -bound, bound)
        b = jax.random.uniform(next(keys), (fout,), jnp.float32, -bound, bound)
        return (w, b)

    def bn(c):
        gamma = 1.0 + 0.1 * jax.random.normal(next(keys), (c,), jnp.float32)
        beta = 0.1 * jax.random.normal(next(keys), (c,), jnp.float32)
        mean = 0.1 * jax.random.normal(next(keys), (c,), jnp.float32)
        var = 0.9 + 0.2 * jax.random.uniform(next(keys), (c,), jnp.float32)
        return (gamma, beta, mean, var)

    return {
        "conv1": conv(6, 1, 5), "conv2": conv(16, 6, 5),
        "conv3": conv(32, 16, 3), "conv4": conv(64, 32, 3),
        "fc1": lin(120, 64 * 4 * 4), "fc2": lin(84, 120), "fc3": lin(10, 84),
        "bn1": bn(6), "bn2": bn(16), "bn3": bn(32), "bn4": bn(64),
        "bn5": bn(120), "bn6": bn(84),
    }


if __name__ == "__main__":
    key = jax.random.PRNGKey(0)
    k_param, k_x = jax.random.split(key)
    params = init_params(k_param)
    prep = prepare_params(params)

    # NCHW input, 28x28 so the spatial path ends at 64 x 4 x 4 (as fc1 implies).
    x = jax.random.normal(k_x, (2, 1, 28, 28), jnp.float32)

    out = jax.block_until_ready(net_forward(x, prep))
    assert out.shape == (2, 10) and out.dtype == jnp.float32, out.shape
    assert bool(jnp.all(jnp.isfinite(out)))

    # Self-check against the pure-JAX f32 reference (bf16 matmuls => loose tol).
    ref = jax.block_until_ready(net_reference(x, params))
    err = float(jnp.max(jnp.abs(out - ref)))
    assert err < 1e-1, f"kernel/reference mismatch: max abs err = {err}"

    print("KERNEL_OK")
</pallas_src>

<mosaic_0001>
module attributes {stable_mosaic.version = 11 : i64} {
  func.func @_net_kernel(%arg0: i32, %arg1: memref<33x8x32xf32, #tpu.memory_space<vmem>>, %arg2: memref<5x32x168xbf16, #tpu.memory_space<vmem>>, %arg3: memref<1x1x84xf32, #tpu.memory_space<vmem>>, %arg4: memref<5x108x224xbf16, #tpu.memory_space<vmem>>, %arg5: memref<1x1x112xf32, #tpu.memory_space<vmem>>, %arg6: memref<3x176x320xbf16, #tpu.memory_space<vmem>>, %arg7: memref<1x1x160xf32, #tpu.memory_space<vmem>>, %arg8: memref<3x288x512xbf16, #tpu.memory_space<vmem>>, %arg9: memref<1x1x256xf32, #tpu.memory_space<vmem>>, %arg10: memref<4x256x120xbf16, #tpu.memory_space<vmem>>, %arg11: memref<1x120xf32, #tpu.memory_space<vmem>>, %arg12: memref<120x84xbf16, #tpu.memory_space<vmem>>, %arg13: memref<1x84xf32, #tpu.memory_space<vmem>>, %arg14: memref<84x10xbf16, #tpu.memory_space<vmem>>, %arg15: memref<1x10xf32, #tpu.memory_space<vmem>>, %arg16: memref<8x10xf32, #tpu.memory_space<vmem>>, %arg17: memref<19x8x108xf32, #tpu.memory_space<vmem>>, %arg18: memref<11x8x176xf32, #tpu.memory_space<vmem>>, %arg19: memref<9x8x288xf32, #tpu.memory_space<vmem>>) attributes {dimension_semantics = [#tpu.dimension_semantics<parallel>], iteration_bounds = array<i64: 1>, scalar_prefetch = 0 : i64, scratch_operands = 3 : i64, tpu.core_type = #tpu.core_type<tc>, window_params = [{transform_indices = @transform_0, window_bounds = array<i64: 33, 8, 32>}, {pipeline_mode = #tpu.pipeline_mode<synchronous>, transform_indices = @transform_1, window_bounds = array<i64: 5, 32, 168>}, {pipeline_mode = #tpu.pipeline_mode<synchronous>, transform_indices = @transform_2, window_bounds = array<i64: 1, 1, 84>}, {pipeline_mode = #tpu.pipeline_mode<synchronous>, transform_indices = @transform_3, window_bounds = array<i64: 5, 108, 224>}, {pipeline_mode = #tpu.pipeline_mode<synchronous>, transform_indices = @transform_4, window_bounds = array<i64: 1, 1, 112>}, {pipeline_mode = #tpu.pipeline_mode<synchronous>, transform_indices = @transform_5, window_bounds = array<i64: 3, 176, 320>}, {pipeline_mode = #tpu.pipeline_mode<synchronous>, transform_indices = @transform_6, window_bounds = array<i64: 1, 1, 160>}, {pipeline_mode = #tpu.pipeline_mode<synchronous>, transform_indices = @transform_7, window_bounds = array<i64: 3, 288, 512>}, {pipeline_mode = #tpu.pipeline_mode<synchronous>, transform_indices = @transform_8, window_bounds = array<i64: 1, 1, 256>}, {pipeline_mode = #tpu.pipeline_mode<synchronous>, transform_indices = @transform_9, window_bounds = array<i64: 4, 256, 120>}, {pipeline_mode = #tpu.pipeline_mode<synchronous>, transform_indices = @transform_10, window_bounds = array<i64: 1, 120>}, {pipeline_mode = #tpu.pipeline_mode<synchronous>, transform_indices = @transform_11, window_bounds = array<i64: 120, 84>}, {pipeline_mode = #tpu.pipeline_mode<synchronous>, transform_indices = @transform_12, window_bounds = array<i64: 1, 84>}, {pipeline_mode = #tpu.pipeline_mode<synchronous>, transform_indices = @transform_13, window_bounds = array<i64: 84, 10>}, {pipeline_mode = #tpu.pipeline_mode<synchronous>, transform_indices = @transform_14, window_bounds = array<i64: 1, 10>}, {transform_indices = @transform_15, window_bounds = array<i64: 8, 10>}]} {
    %c1 = arith.constant 1 : index
    %c0 = arith.constant 0 : index
    %c0_0 = arith.constant 0 : index
    %0 = vector.load %arg1[%c1, %c0, %c0_0] : memref<33x8x32xf32, #tpu.memory_space<vmem>>, vector<28x8x32xf32>
    %1 = vector.shape_cast %0 : vector<28x8x32xf32> to vector<14x2x8x32xf32>
    %2 = vector.extract_strided_slice %1 {offsets = [0, 0, 0, 0], sizes = [14, 1, 8, 32], strides = [1, 1, 1, 1]} : vector<14x2x8x32xf32> to vector<14x1x8x32xf32>
    %3 = vector.shape_cast %2 : vector<14x1x8x32xf32> to vector<14x8x32xf32>
    %4 = vector.shape_cast %3 : vector<14x8x32xf32> to vector<112x32xf32>
    %5 = arith.truncf %4 : vector<112x32xf32> to vector<112x32xbf16>
    %c0_1 = arith.constant 0 : index
    %c0_2 = arith.constant 0 : index
    %c0_3 = arith.constant 0 : index
    %6 = vector.load %arg2[%c0_1, %c0_2, %c0_3] : memref<5x32x168xbf16, #tpu.memory_space<vmem>>, vector<1x32x168xbf16>
    %7 = vector.shape_cast %6 : vector<1x32x168xbf16> to vector<32x168xbf16>
    %cst = arith.constant dense<0.000000e+00> : vector<112x168xf32>
    %8 = tpu.matmul %5, %7, %cst {dimension_numbers = #tpu.dot_dimension_numbers<[1], [0], [0], [1], [0, 0, 1, 1], [], []>} : vector<112x32xbf16>, vector<32x168xbf16>, vector<112x168xf32> -> vector<112x168xf32>
    %c2 = arith.constant 2 : index
    %c0_4 = arith.constant 0 : index
    %c0_5 = arith.constant 0 : index
    %9 = vector.load %arg1[%c2, %c0_4, %c0_5] : memref<33x8x32xf32, #tpu.memory_space<vmem>>, vector<28x8x32xf32>
    %10 = vector.shape_cast %9 : vector<28x8x32xf32> to vector<14x2x8x32xf32>
    %11 = vector.extract_strided_slice %10 {offsets = [0, 0, 0, 0], sizes = [14, 1, 8, 32], strides = [1, 1, 1, 1]} : vector<14x2x8x32xf32> to vector<14x1x8x32xf32>
    %12 = vector.shape_cast %11 : vector<14x1x8x32xf32> to vector<14x8x32xf32>
    %13 = vector.shape_cast %12 : vector<14x8x32xf32> to vector<112x32xf32>
    %14 = arith.truncf %13 : vector<112x32xf32> to vector<112x32xbf16>
    %c1_6 = arith.constant 1 : index
    %c0_7 = arith.constant 0 : index
    %c0_8 = arith.constant 0 : index
    %15 = vector.load %arg2[%c1_6, %c0_7, %c0_8] : memref<5x32x168xbf16, #tpu.memory_space<vmem>>, vector<1x32x168xbf16>
    %16 = vector.shape_cast %15 : vector<1x32x168xbf16> to vector<32x168xbf16>
    %cst_9 = arith.constant dense<0.000000e+00> : vector<112x168xf32>
    %17 = tpu.matmul %14, %16, %cst_9 {dimension_numbers = #tpu.dot_dimension_numbers<[1], [0], [0], [1], [0, 0, 1, 1], [], []>} : vector<112x32xbf16>, vector<32x168xbf16>, vector<112x168xf32> -> vector<112x168xf32>
    %18 = arith.addf %8, %17 : vector<112x168xf32>
    %c3 = arith.constant 3 : index
    %c0_10 = arith.constant 0 : index
    %c0_11 = arith.constant 0 : index
    %19 = vector.load %arg1[%c3, %c0_10, %c0_11] : memref<33x8x32xf32, #tpu.memory_space<vmem>>, vector<28x8x32xf32>
    %20 = vector.shape_cast %19 : vector<28x8x32xf32> to vector<14x2x8x32xf32>
    %21 = vector.extract_strided_slice %20 {offsets = [0, 0, 0, 0], sizes = [14, 1, 8, 32], strides = [1, 1, 1, 1]} : vector<14x2x8x32xf32> to vector<14x1x8x32xf32>
    %22 = vector.shape_cast %21 : vector<14x1x8x32xf32> to vector<14x8x32xf32>
    %23 = vector.shape_cast %22 : vector<14x8x32xf32> to vector<112x32xf32>
    %24 = arith.truncf %23 : vector<112x32xf32> to vector<112x32xbf16>
    %c2_12 = arith.constant 2 : index
    %c0_13 = arith.constant 0 : index
    %c0_14 = arith.constant 0 : index
    %25 = vector.load %arg2[%c2_12, %c0_13, %c0_14] : memref<5x32x168xbf16, #tpu.memory_space<vmem>>, vector<1x32x168xbf16>
    %26 = vector.shape_cast %25 : vector<1x32x168xbf16> to vector<32x168xbf16>
    %cst_15 = arith.constant dense<0.000000e+00> : vector<112x168xf32>
    %27 = tpu.matmul %24, %26, %cst_15 {dimension_numbers = #tpu.dot_dimension_numbers<[1], [0], [0], [1], [0, 0, 1, 1], [], []>} : vector<112x32xbf16>, vector<32x168xbf16>, vector<112x168xf32> -> vector<112x168xf32>
    %28 = arith.addf %18, %27 : vector<112x168xf32>
    %c4 = arith.constant 4 : index
    %c0_16 = arith.constant 0 : index
    %c0_17 = arith.constant 0 : index
    %29 = vector.load %arg1[%c4, %c0_16, %c0_17] : memref<33x8x32xf32, #tpu.memory_space<vmem>>, vector<28x8x32xf32>
    %30 = vector.shape_cast %29 : vector<28x8x32xf32> to vector<14x2x8x32xf32>
    %31 = vector.extract_strided_slice %30 {offsets = [0, 0, 0, 0], sizes = [14, 1, 8, 32], strides = [1, 1, 1, 1]} : vector<14x2x8x32xf32> to vector<14x1x8x32xf32>
    %32 = vector.shape_cast %31 : vector<14x1x8x32xf32> to vector<14x8x32xf32>
    %33 = vector.shape_cast %32 : vector<14x8x32xf32> to vector<112x32xf32>
    %34 = arith.truncf %33 : vector<112x32xf32> to vector<112x32xbf16>
    %c3_18 = arith.constant 3 : index
    %c0_19 = arith.constant 0 : index
    %c0_20 = arith.constant 0 : index
    %35 = vector.load %arg2[%c3_18, %c0_19, %c0_20] : memref<5x32x168xbf16, #tpu.memory_space<vmem>>, vector<1x32x168xbf16>
    %36 = vector.shape_cast %35 : vector<1x32x168xbf16> to vector<32x168xbf16>
    %cst_21 = arith.constant dense<0.000000e+00> : vector<112x168xf32>
    %37 = tpu.matmul %34, %36, %cst_21 {dimension_numbers = #tpu.dot_dimension_numbers<[1], [0], [0], [1], [0, 0, 1, 1], [], []>} : vector<112x32xbf16>, vector<32x168xbf16>, vector<112x168xf32> -> vector<112x168xf32>
    %38 = arith.addf %28, %37 : vector<112x168xf32>
    %c5 = arith.constant 5 : index
    %c0_22 = arith.constant 0 : index
    %c0_23 = arith.constant 0 : index
    %39 = vector.load %arg1[%c5, %c0_22, %c0_23] : memref<33x8x32xf32, #tpu.memory_space<vmem>>, vector<28x8x32xf32>
    %40 = vector.shape_cast %39 : vector<28x8x32xf32> to vector<14x2x8x32xf32>
    %41 = vector.extract_strided_slice %40 {offsets = [0, 0, 0, 0], sizes = [14, 1, 8, 32], strides = [1, 1, 1, 1]} : vector<14x2x8x32xf32> to vector<14x1x8x32xf32>
    %42 = vector.shape_cast %41 : vector<14x1x8x32xf32> to vector<14x8x32xf32>
    %43 = vector.shape_cast %42 : vector<14x8x32xf32> to vector<112x32xf32>
    %44 = arith.truncf %43 : vector<112x32xf32> to vector<112x32xbf16>
    %c4_24 = arith.constant 4 : index
    %c0_25 = arith.constant 0 : index
    %c0_26 = arith.constant 0 : index
    %45 = vector.load %arg2[%c4_24, %c0_25, %c0_26] : memref<5x32x168xbf16, #tpu.memory_space<vmem>>, vector<1x32x168xbf16>
    %46 = vector.shape_cast %45 : vector<1x32x168xbf16> to vector<32x168xbf16>
    %cst_27 = arith.constant dense<0.000000e+00> : vector<112x168xf32>
    %47 = tpu.matmul %44, %46, %cst_27 {dimension_numbers = #tpu.dot_dimension_numbers<[1], [0], [0], [1], [0, 0, 1, 1], [], []>} : vector<112x32xbf16>, vector<32x168xbf16>, vector<112x168xf32> -> vector<112x168xf32>
    %48 = arith.addf %38, %47 : vector<112x168xf32>
    %49 = vector.shape_cast %48 : vector<112x168xf32> to vector<14x8x168xf32>
    %50 = vector.extract_strided_slice %49 {offsets = [0, 0, 0], sizes = [1, 8, 168], strides = [1, 1, 1]} : vector<14x8x168xf32> to vector<1x8x168xf32>
    %51 = vector.extract_strided_slice %49 {offsets = [0, 0, 0], sizes = [13, 8, 168], strides = [1, 1, 1]} : vector<14x8x168xf32> to vector<13x8x168xf32>
    %52 = vector.extract_strided_slice %49 {offsets = [1, 0, 0], sizes = [13, 8, 168], strides = [1, 1, 1]} : vector<14x8x168xf32> to vector<13x8x168xf32>
    %53 = arith.maximumf %51, %52 : vector<13x8x168xf32>
    %54 = tpu.concatenate %50, %53 in 0 : vector<1x8x168xf32>, vector<13x8x168xf32> -> vector<14x8x168xf32>
    %55 = vector.extract_strided_slice %54 {offsets = [0, 0, 0], sizes = [14, 8, 84], strides = [1, 1, 1]} : vector<14x8x168xf32> to vector<14x8x84xf32>
    %56 = vector.extract_strided_slice %54 {offsets = [0, 0, 84], sizes = [14, 8, 84], strides = [1, 1, 1]} : vector<14x8x168xf32> to vector<14x8x84xf32>
    %57 = arith.maximumf %55, %56 : vector<14x8x84xf32>
    %c0_28 = arith.constant 0 : index
    %c0_29 = arith.constant 0 : index
    %c0_30 = arith.constant 0 : index
    %58 = vector.load %arg3[%c0_28, %c0_29, %c0_30] : memref<1x1x84xf32, #tpu.memory_space<vmem>>, vector<1x1x84xf32>
    %59 = vector.broadcast %58 : vector<1x1x84xf32> to vector<14x8x84xf32>
    %60 = arith.addf %57, %59 : vector<14x8x84xf32>
    %cst_31 = arith.constant 0.000000e+00 : f32
    %61 = vector.broadcast %cst_31 : f32 to vector<14x8x84xf32>
    %62 = arith.maximumf %60, %61 : vector<14x8x84xf32>
    %cst_32 = arith.constant 0.000000e+00 : f32
    %63 = vector.broadcast %cst_32 : f32 to vector<19x8x108xf32>
    %c0_33 = arith.constant 0 : index
    %c0_34 = arith.constant 0 : index
    %c0_35 = arith.constant 0 : index
    %64 = vector.load %arg17[%c0_33, %c0_34, %c0_35] : memref<19x8x108xf32, #tpu.memory_space<vmem>>, vector<19x8x108xf32>
    tpu.vector_store %arg17[%c0_33, %c0_34, %c0_35], %63 {strides = array<i32>} : memref<19x8x108xf32, #tpu.memory_space<vmem>>, vector<19x8x108xf32>,
    %c2_36 = arith.constant 2 : index
    %c0_37 = arith.constant 0 : index
    %c12 = arith.constant 12 : index
    %65 = vector.load %arg17[%c2_36, %c0_37, %c12] : memref<19x8x108xf32, #tpu.memory_space<vmem>>, vector<14x8x84xf32>
    tpu.vector_store %arg17[%c2_36, %c0_37, %c12], %62 {strides = array<i32>} : memref<19x8x108xf32, #tpu.memory_space<vmem>>, vector<14x8x84xf32>,
    %c1_38 = arith.constant 1 : index
    %c0_39 = arith.constant 0 : index
    %c0_40 = arith.constant 0 : index
    %66 = vector.load %arg17[%c1_38, %c0_39, %c0_40] : memref<19x8x108xf32, #tpu.memory_space<vmem>>, vector<14x8x108xf32>
    %67 = vector.shape_cast %66 : vector<14x8x108xf32> to vector<7x2x8x108xf32>
    %68 = vector.extract_strided_slice %67 {offsets = [0, 0, 0, 0], sizes = [7, 1, 8, 108], strides = [1, 1, 1, 1]} : vector<7x2x8x108xf32> to vector<7x1x8x108xf32>
    %69 = vector.shape_cast %68 : vector<7x1x8x108xf32> to vector<7x8x108xf32>
    %70 = vector.shape_cast %69 : vector<7x8x108xf32> to vector<56x108xf32>
    %71 = arith.truncf %70 : vector<56x108xf32> to vector<56x108xbf16>
    %c0_41 = arith.constant 0 : index
    %c0_42 = arith.constant 0 : index
    %c0_43 = arith.constant 0 : index
    %72 = vector.load %arg4[%c0_41, %c0_42, %c0_43] : memref<5x108x224xbf16, #tpu.memory_space<vmem>>, vector<1x108x224xbf16>
    %73 = vector.shape_cast %72 : vector<1x108x224xbf16> to vector<108x224xbf16>
    %cst_44 = arith.constant dense<0.000000e+00> : vector<56x224xf32>
    %74 = tpu.matmul %71, %73, %cst_44 {dimension_numbers = #tpu.dot_dimension_numbers<[1], [0], [0], [1], [0, 0, 1, 1], [], []>} : vector<56x108xbf16>, vector<108x224xbf16>, vector<56x224xf32> -> vector<56x224xf32>
    %c2_45 = arith.constant 2 : index
    %c0_46 = arith.constant 0 : index
    %c0_47 = arith.constant 0 : index
    %75 = vector.load %arg17[%c2_45, %c0_46, %c0_47] : memref<19x8x108xf32, #tpu.memory_space<vmem>>, vector<14x8x108xf32>
    %76 = vector.shape_cast %75 : vector<14x8x108xf32> to vector<7x2x8x108xf32>
    %77 = vector.extract_strided_slice %76 {offsets = [0, 0, 0, 0], sizes = [7, 1, 8, 108], strides = [1, 1, 1, 1]} : vector<7x2x8x108xf32> to vector<7x1x8x108xf32>
    %78 = vector.shape_cast %77 : vector<7x1x8x108xf32> to vector<7x8x108xf32>
    %79 = vector.shape_cast %78 : vector<7x8x108xf32> to vector<56x108xf32>
    %80 = arith.truncf %79 : vector<56x108xf32> to vector<56x108xbf16>
    %c1_48 = arith.constant 1 : index
    %c0_49 = arith.constant 0 : index
    %c0_50 = arith.constant 0 : index
    %81 = vector.load %arg4[%c1_48, %c0_49, %c0_50] : memref<5x108x224xbf16, #tpu.memory_space<vmem>>, vector<1x108x224xbf16>
    %82 = vector.shape_cast %81 : vector<1x108x224xbf16> to vector<108x224xbf16>
    %cst_51 = arith.constant dense<0.000000e+00> : vector<56x224xf32>
    %83 = tpu.matmul %80, %82, %cst_51 {dimension_numbers = #tpu.dot_dimension_numbers<[1], [0], [0], [1], [0, 0, 1, 1], [], []>} : vector<56x108xbf16>, vector<108x224xbf16>, vector<56x224xf32> -> vector<56x224xf32>
    %84 = arith.addf %74, %83 : vector<56x224xf32>
    %c3_52 = arith.constant 3 : index
    %c0_53 = arith.constant 0 : index
    %c0_54 = arith.constant 0 : index
    %85 = vector.load %arg17[%c3_52, %c0_53, %c0_54] : memref<19x8x108xf32, #tpu.memory_space<vmem>>, vector<14x8x108xf32>
    %86 = vector.shape_cast %85 : vector<14x8x108xf32> to vector<7x2x8x108xf32>
    %87 = vector.extract_strided_slice %86 {offsets = [0, 0, 0, 0], sizes = [7, 1, 8, 108], strides = [1, 1, 1, 1]} : vector<7x2x8x108xf32> to vector<7x1x8x108xf32>
    %88 = vector.shape_cast %87 : vector<7x1x8x108xf32> to vector<7x8x108xf32>
    %89 = vector.shape_cast %88 : vector<7x8x108xf32> to vector<56x108xf32>
    %90 = arith.truncf %89 : vector<56x108xf32> to vector<56x108xbf16>
    %c2_55 = arith.constant 2 : index
    %c0_56 = arith.constant 0 : index
    %c0_57 = arith.constant 0 : index
    %91 = vector.load %arg4[%c2_55, %c0_56, %c0_57] : memref<5x108x224xbf16, #tpu.memory_space<vmem>>, vector<1x108x224xbf16>
    %92 = vector.shape_cast %91 : vector<1x108x224xbf16> to vector<108x224xbf16>
    %cst_58 = arith.constant dense<0.000000e+00> : vector<56x224xf32>
    %93 = tpu.matmul %90, %92, %cst_58 {dimension_numbers = #tpu.dot_dimension_numbers<[1], [0], [0], [1], [0, 0, 1, 1], [], []>} : vector<56x108xbf16>, vector<108x224xbf16>, vector<56x224xf32> -> vector<56x224xf32>
    %94 = arith.addf %84, %93 : vector<56x224xf32>
    %c4_59 = arith.constant 4 : index
    %c0_60 = arith.constant 0 : index
    %c0_61 = arith.constant 0 : index
    %95 = vector.load %arg17[%c4_59, %c0_60, %c0_61] : memref<19x8x108xf32, #tpu.memory_space<vmem>>, vector<14x8x108xf32>
    %96 = vector.shape_cast %95 : vector<14x8x108xf32> to vector<7x2x8x108xf32>
    %97 = vector.extract_strided_slice %96 {offsets = [0, 0, 0, 0], sizes = [7, 1, 8, 108], strides = [1, 1, 1, 1]} : vector<7x2x8x108xf32> to vector<7x1x8x108xf32>
    %98 = vector.shape_cast %97 : vector<7x1x8x108xf32> to vector<7x8x108xf32>
    %99 = vector.shape_cast %98 : vector<7x8x108xf32> to vector<56x108xf32>
    %100 = arith.truncf %99 : vector<56x108xf32> to vector<56x108xbf16>
    %c3_62 = arith.constant 3 : index
    %c0_63 = arith.constant 0 : index
    %c0_64 = arith.constant 0 : index
    %101 = vector.load %arg4[%c3_62, %c0_63, %c0_64] : memref<5x108x224xbf16, #tpu.memory_space<vmem>>, vector<1x108x224xbf16>
    %102 = vector.shape_cast %101 : vector<1x108x224xbf16> to vector<108x224xbf16>
    %cst_65 = arith.constant dense<0.000000e+00> : vector<56x224xf32>
    %103 = tpu.matmul %100, %102, %cst_65 {dimension_numbers = #tpu.dot_dimension_numbers<[1], [0], [0], [1], [0, 0, 1, 1], [], []>} : vector<56x108xbf16>, vector<108x224xbf16>, vector<56x224xf32> -> vector<56x224xf32>
    %104 = arith.addf %94, %103 : vector<56x224xf32>
    %c5_66 = arith.constant 5 : index
    %c0_67 = arith.constant 0 : index
    %c0_68 = arith.constant 0 : index
    %105 = vector.load %arg17[%c5_66, %c0_67, %c0_68] : memref<19x8x108xf32, #tpu.memory_space<vmem>>, vector<14x8x108xf32>
    %106 = vector.shape_cast %105 : vector<14x8x108xf32> to vector<7x2x8x108xf32>
    %107 = vector.extract_strided_slice %106 {offsets = [0, 0, 0, 0], sizes = [7, 1, 8, 108], strides = [1, 1, 1, 1]} : vector<7x2x8x108xf32> to vector<7x1x8x108xf32>
    %108 = vector.shape_cast %107 : vector<7x1x8x108xf32> to vector<7x8x108xf32>
    %109 = vector.shape_cast %108 : vector<7x8x108xf32> to vector<56x108xf32>
    %110 = arith.truncf %109 : vector<56x108xf32> to vector<56x108xbf16>
    %c4_69 = arith.constant 4 : index
    %c0_70 = arith.constant 0 : index
    %c0_71 = arith.constant 0 : index
    %111 = vector.load %arg4[%c4_69, %c0_70, %c0_71] : memref<5x108x224xbf16, #tpu.memory_space<vmem>>, vector<1x108x224xbf16>
    %112 = vector.shape_cast %111 : vector<1x108x224xbf16> to vector<108x224xbf16>
    %cst_72 = arith.constant dense<0.000000e+00> : vector<56x224xf32>
    %113 = tpu.matmul %110, %112, %cst_72 {dimension_numbers = #tpu.dot_dimension_numbers<[1], [0], [0], [1], [0, 0, 1, 1], [], []>} : vector<56x108xbf16>, vector<108x224xbf16>, vector<56x224xf32> -> vector<56x224xf32>
    %114 = arith.addf %104, %113 : vector<56x224xf32>
    %115 = vector.shape_cast %114 : vector<56x224xf32> to vector<7x8x224xf32>
    %116 = vector.extract_strided_slice %115 {offsets = [0, 0, 0], sizes = [1, 8, 224], strides = [1, 1, 1]} : vector<7x8x224xf32> to vector<1x8x224xf32>
    %117 = vector.extract_strided_slice %115 {offsets = [0, 0, 0], sizes = [6, 8, 224], strides = [1, 1, 1]} : vector<7x8x224xf32> to vector<6x8x224xf32>
    %118 = vector.extract_strided_slice %115 {offsets = [1, 0, 0], sizes = [6, 8, 224], strides = [1, 1, 1]} : vector<7x8x224xf32> to vector<6x8x224xf32>
    %119 = arith.maximumf %117, %118 : vector<6x8x224xf32>
    %120 = tpu.concatenate %116, %119 in 0 : vector<1x8x224xf32>, vector<6x8x224xf32> -> vector<7x8x224xf32>
    %121 = vector.extract_strided_slice %120 {offsets = [0, 0, 0], sizes = [7, 8, 112], strides = [1, 1, 1]} : vector<7x8x224xf32> to vector<7x8x112xf32>
    %122 = vector.extract_strided_slice %120 {offsets = [0, 0, 112], sizes = [7, 8, 112], strides = [1, 1, 1]} : vector<7x8x224xf32> to vector<7x8x112xf32>
    %123 = arith.maximumf %121, %122 : vector<7x8x112xf32>
    %c0_73 = arith.constant 0 : index
    %c0_74 = arith.constant 0 : index
    %c0_75 = arith.constant 0 : index
    %124 = vector.load %arg5[%c0_73, %c0_74, %c0_75] : memref<1x1x112xf32, #tpu.memory_space<vmem>>, vector<1x1x112xf32>
    %125 = vector.broadcast %124 : vector<1x1x112xf32> to vector<7x8x112xf32>
    %126 = arith.addf %123, %125 : vector<7x8x112xf32>
    %cst_76 = arith.constant 0.000000e+00 : f32
    %127 = vector.broadcast %cst_76 : f32 to vector<7x8x112xf32>
    %128 = arith.maximumf %126, %127 : vector<7x8x112xf32>
    %cst_77 = arith.constant 0.000000e+00 : f32
    %129 = vector.broadcast %cst_77 : f32 to vector<11x8x176xf32>
    %c0_78 = arith.constant 0 : index
    %c0_79 = arith.constant 0 : index
    %c0_80 = arith.constant 0 : index
    %130 = vector.load %arg18[%c0_78, %c0_79, %c0_80] : memref<11x8x176xf32, #tpu.memory_space<vmem>>, vector<11x8x176xf32>
    tpu.vector_store %arg18[%c0_78, %c0_79, %c0_80], %129 {strides = array<i32>} : memref<11x8x176xf32, #tpu.memory_space<vmem>>, vector<11x8x176xf32>,
    %c2_81 = arith.constant 2 : index
    %c0_82 = arith.constant 0 : index
    %c32 = arith.constant 32 : index
    %131 = vector.load %arg18[%c2_81, %c0_82, %c32] : memref<11x8x176xf32, #tpu.memory_space<vmem>>, vector<7x8x112xf32>
    tpu.vector_store %arg18[%c2_81, %c0_82, %c32], %128 {strides = array<i32>} : memref<11x8x176xf32, #tpu.memory_space<vmem>>, vector<7x8x112xf32>,
    %c1_83 = arith.constant 1 : index
    %c0_84 = arith.constant 0 : index
    %c0_85 = arith.constant 0 : index
    %132 = vector.load %arg18[%c1_83, %c0_84, %c0_85] : memref<11x8x176xf32, #tpu.memory_space<vmem>>, vector<8x8x176xf32>
    %133 = vector.shape_cast %132 : vector<8x8x176xf32> to vector<4x2x8x176xf32>
    %134 = vector.extract_strided_slice %133 {offsets = [0, 0, 0, 0], sizes = [4, 1, 8, 176], strides = [1, 1, 1, 1]} : vector<4x2x8x176xf32> to vector<4x1x8x176xf32>
    %135 = vector.shape_cast %134 : vector<4x1x8x176xf32> to vector<4x8x176xf32>
    %136 = vector.shape_cast %135 : vector<4x8x176xf32> to vector<32x176xf32>
    %137 = arith.truncf %136 : vector<32x176xf32> to vector<32x176xbf16>
    %c0_86 = arith.constant 0 : index
    %c0_87 = arith.constant 0 : index
    %c0_88 = arith.constant 0 : index
    %138 = vector.load %arg6[%c0_86, %c0_87, %c0_88] : memref<3x176x320xbf16, #tpu.memory_space<vmem>>, vector<1x176x320xbf16>
    %139 = vector.shape_cast %138 : vector<1x176x320xbf16> to vector<176x320xbf16>
    %cst_89 = arith.constant dense<0.000000e+00> : vector<32x320xf32>
    %140 = tpu.matmul %137, %139, %cst_89 {dimension_numbers = #tpu.dot_dimension_numbers<[1], [0], [0], [1], [0, 0, 1, 1], [], []>} : vector<32x176xbf16>, vector<176x320xbf16>, vector<32x320xf32> -> vector<32x320xf32>
    %c2_90 = arith.constant 2 : index
    %c0_91 = arith.constant 0 : index
    %c0_92 = arith.constant 0 : index
    %141 = vector.load %arg18[%c2_90, %c0_91, %c0_92] : memref<11x8x176xf32, #tpu.memory_space<vmem>>, vector<8x8x176xf32>
    %142 = vector.shape_cast %141 : vector<8x8x176xf32> to vector<4x2x8x176xf32>
    %143 = vector.extract_strided_slice %142 {offsets = [0, 0, 0, 0], sizes = [4, 1, 8, 176], strides = [1, 1, 1, 1]} : vector<4x2x8x176xf32> to vector<4x1x8x176xf32>
    %144 = vector.shape_cast %143 : vector<4x1x8x176xf32> to vector<4x8x176xf32>
    %145 = vector.shape_cast %144 : vector<4x8x176xf32> to vector<32x176xf32>
    %146 = arith.truncf %145 : vector<32x176xf32> to vector<32x176xbf16>
    %c1_93 = arith.constant 1 : index
    %c0_94 = arith.constant 0 : index
    %c0_95 = arith.constant 0 : index
    %147 = vector.load %arg6[%c1_93, %c0_94, %c0_95] : memref<3x176x320xbf16, #tpu.memory_space<vmem>>, vector<1x176x320xbf16>
    %148 = vector.shape_cast %147 : vector<1x176x320xbf16> to vector<176x320xbf16>
    %cst_96 = arith.constant dense<0.000000e+00> : vector<32x320xf32>
    %149 = tpu.matmul %146, %148, %cst_96 {dimension_numbers = #tpu.dot_dimension_numbers<[1], [0], [0], [1], [0, 0, 1, 1], [], []>} : vector<32x176xbf16>, vector<176x320xbf16>, vector<32x320xf32> -> vector<32x320xf32>
    %150 = arith.addf %140, %149 : vector<32x320xf32>
    %c3_97 = arith.constant 3 : index
    %c0_98 = arith.constant 0 : index
    %c0_99 = arith.constant 0 : index
    %151 = vector.load %arg18[%c3_97, %c0_98, %c0_99] : memref<11x8x176xf32, #tpu.memory_space<vmem>>, vector<8x8x176xf32>
    %152 = vector.shape_cast %151 : vector<8x8x176xf32> to vector<4x2x8x176xf32>
    %153 = vector.extract_strided_slice %152 {offsets = [0, 0, 0, 0], sizes = [4, 1, 8, 176], strides = [1, 1, 1, 1]} : vector<4x2x8x176xf32> to vector<4x1x8x176xf32>
    %154 = vector.shape_cast %153 : vector<4x1x8x176xf32> to vector<4x8x176xf32>
    %155 = vector.shape_cast %154 : vector<4x8x176xf32> to vector<32x176xf32>
    %156 = arith.truncf %155 : vector<32x176xf32> to vector<32x176xbf16>
    %c2_100 = arith.constant 2 : index
    %c0_101 = arith.constant 0 : index
    %c0_102 = arith.constant 0 : index
    %157 = vector.load %arg6[%c2_100, %c0_101, %c0_102] : memref<3x176x320xbf16, #tpu.memory_space<vmem>>, vector<1x176x320xbf16>
    %158 = vector.shape_cast %157 : vector<1x176x320xbf16> to vector<176x320xbf16>
    %cst_103 = arith.constant dense<0.000000e+00> : vector<32x320xf32>
    %159 = tpu.matmul %156, %158, %cst_103 {dimension_numbers = #tpu.dot_dimension_numbers<[1], [0], [0], [1], [0, 0, 1, 1], [], []>} : vector<32x176xbf16>, vector<176x320xbf16>, vector<32x320xf32> -> vector<32x320xf32>
    %160 = arith.addf %150, %159 : vector<32x320xf32>
    %161 = vector.shape_cast %160 : vector<32x320xf32> to vector<4x8x320xf32>
    %162 = vector.extract_strided_slice %161 {offsets = [0, 0, 0], sizes = [1, 8, 320], strides = [1, 1, 1]} : vector<4x8x320xf32> to vector<1x8x320xf32>
    %163 = vector.extract_strided_slice %161 {offsets = [0, 0, 0], sizes = [3, 8, 320], strides = [1, 1, 1]} : vector<4x8x320xf32> to vector<3x8x320xf32>
    %164 = vector.extract_strided_slice %161 {offsets = [1, 0, 0], sizes = [3, 8, 320], strides = [1, 1, 1]} : vector<4x8x320xf32> to vector<3x8x320xf32>
    %165 = arith.maximumf %163, %164 : vector<3x8x320xf32>
    %166 = vector.extract_strided_slice %161 {offsets = [3, 0, 0], sizes = [1, 8, 320], strides = [1, 1, 1]} : vector<4x8x320xf32> to vector<1x8x320xf32>
    %167 = tpu.concatenate %162, %165, %166 in 0 : vector<1x8x320xf32>, vector<3x8x320xf32>, vector<1x8x320xf32> -> vector<5x8x320xf32>
    %168 = vector.extract_strided_slice %167 {offsets = [0, 0, 0], sizes = [5, 8, 160], strides = [1, 1, 1]} : vector<5x8x320xf32> to vector<5x8x160xf32>
    %169 = vector.extract_strided_slice %167 {offsets = [0, 0, 160], sizes = [5, 8, 160], strides = [1, 1, 1]} : vector<5x8x320xf32> to vector<5x8x160xf32>
    %170 = arith.maximumf %168, %169 : vector<5x8x160xf32>
    %c0_104 = arith.constant 0 : index
    %c0_105 = arith.constant 0 : index
    %c0_106 = arith.constant 0 : index
    %171 = vector.load %arg7[%c0_104, %c0_105, %c0_106] : memref<1x1x160xf32, #tpu.memory_space<vmem>>, vector<1x1x160xf32>
    %172 = vector.broadcast %171 : vector<1x1x160xf32> to vector<5x8x160xf32>
    %173 = arith.addf %170, %172 : vector<5x8x160xf32>
    %cst_107 = arith.constant 0.000000e+00 : f32
    %174 = vector.broadcast %cst_107 : f32 to vector<5x8x160xf32>
    %175 = arith.maximumf %173, %174 : vector<5x8x160xf32>
    %cst_108 = arith.constant 0.000000e+00 : f32
    %176 = vector.broadcast %cst_108 : f32 to vector<9x8x288xf32>
    %c0_109 = arith.constant 0 : index
    %c0_110 = arith.constant 0 : index
    %c0_111 = arith.constant 0 : index
    %177 = vector.load %arg19[%c0_109, %c0_110, %c0_111] : memref<9x8x288xf32, #tpu.memory_space<vmem>>, vector<9x8x288xf32>
    tpu.vector_store %arg19[%c0_109, %c0_110, %c0_111], %176 {strides = array<i32>} : memref<9x8x288xf32, #tpu.memory_space<vmem>>, vector<9x8x288xf32>,
    %c2_112 = arith.constant 2 : index
    %c0_113 = arith.constant 0 : index
    %c64 = arith.constant 64 : index
    %178 = vector.load %arg19[%c2_112, %c0_113, %c64] : memref<9x8x288xf32, #tpu.memory_space<vmem>>, vector<5x8x160xf32>
    tpu.vector_store %arg19[%c2_112, %c0_113, %c64], %175 {strides = array<i32>} : memref<9x8x288xf32, #tpu.memory_space<vmem>>, vector<5x8x160xf32>,
    %c1_114 = arith.constant 1 : index
    %c0_115 = arith.constant 0 : index
    %c0_116 = arith.constant 0 : index
    %179 = vector.load %arg19[%c1_114, %c0_115, %c0_116] : memref<9x8x288xf32, #tpu.memory_space<vmem>>, vector<6x8x288xf32>
    %180 = vector.shape_cast %179 : vector<6x8x288xf32> to vector<3x2x8x288xf32>
    %181 = vector.extract_strided_slice %180 {offsets = [0, 0, 0, 0], sizes = [3, 1, 8, 288], strides = [1, 1, 1, 1]} : vector<3x2x8x288xf32> to vector<3x1x8x288xf32>
    %182 = vector.shape_cast %181 : vector<3x1x8x288xf32> to vector<3x8x288xf32>
    %183 = vector.shape_cast %182 : vector<3x8x288xf32> to vector<24x288xf32>
    %184 = arith.truncf %183 : vector<24x288xf32> to vector<24x288xbf16>
    %c0_117 = arith.constant 0 : index
    %c0_118 = arith.constant 0 : index
    %c0_119 = arith.constant 0 : index
    %185 = vector.load %arg8[%c0_117, %c0_118, %c0_119] : memref<3x288x512xbf16, #tpu.memory_space<vmem>>, vector<1x288x512xbf16>
    %186 = vector.shape_cast %185 : vector<1x288x512xbf16> to vector<288x512xbf16>
    %cst_120 = arith.constant dense<0.000000e+00> : vector<24x512xf32>
    %187 = tpu.matmul %184, %186, %cst_120 {dimension_numbers = #tpu.dot_dimension_numbers<[1], [0], [0], [1], [0, 0, 1, 1], [], []>} : vector<24x288xbf16>, vector<288x512xbf16>, vector<24x512xf32> -> vector<24x512xf32>
    %c2_121 = arith.constant 2 : index
    %c0_122 = arith.constant 0 : index
    %c0_123 = arith.constant 0 : index
    %188 = vector.load %arg19[%c2_121, %c0_122, %c0_123] : memref<9x8x288xf32, #tpu.memory_space<vmem>>, vector<6x8x288xf32>
    %189 = vector.shape_cast %188 : vector<6x8x288xf32> to vector<3x2x8x288xf32>
    %190 = vector.extract_strided_slice %189 {offsets = [0, 0, 0, 0], sizes = [3, 1, 8, 288], strides = [1, 1, 1, 1]} : vector<3x2x8x288xf32> to vector<3x1x8x288xf32>
    %191 = vector.shape_cast %190 : vector<3x1x8x288xf32> to vector<3x8x288xf32>
    %192 = vector.shape_cast %191 : vector<3x8x288xf32> to vector<24x288xf32>
    %193 = arith.truncf %192 : vector<24x288xf32> to vector<24x288xbf16>
    %c1_124 = arith.constant 1 : index
    %c0_125 = arith.constant 0 : index
    %c0_126 = arith.constant 0 : index
    %194 = vector.load %arg8[%c1_124, %c0_125, %c0_126] : memref<3x288x512xbf16, #tpu.memory_space<vmem>>, vector<1x288x512xbf16>
    %195 = vector.shape_cast %194 : vector<1x288x512xbf16> to vector<288x512xbf16>
    %cst_127 = arith.constant dense<0.000000e+00> : vector<24x512xf32>
    %196 = tpu.matmul %193, %195, %cst_127 {dimension_numbers = #tpu.dot_dimension_numbers<[1], [0], [0], [1], [0, 0, 1, 1], [], []>} : vector<24x288xbf16>, vector<288x512xbf16>, vector<24x512xf32> -> vector<24x512xf32>
    %197 = arith.addf %187, %196 : vector<24x512xf32>
    %c3_128 = arith.constant 3 : index
    %c0_129 = arith.constant 0 : index
    %c0_130 = arith.constant 0 : index
    %198 = vector.load %arg19[%c3_128, %c0_129, %c0_130] : memref<9x8x288xf32, #tpu.memory_space<vmem>>, vector<6x8x288xf32>
    %199 = vector.shape_cast %198 : vector<6x8x288xf32> to vector<3x2x8x288xf32>
    %200 = vector.extract_strided_slice %199 {offsets = [0, 0, 0, 0], sizes = [3, 1, 8, 288], strides = [1, 1, 1, 1]} : vector<3x2x8x288xf32> to vector<3x1x8x288xf32>
    %201 = vector.shape_cast %200 : vector<3x1x8x288xf32> to vector<3x8x288xf32>
    %202 = vector.shape_cast %201 : vector<3x8x288xf32> to vector<24x288xf32>
    %203 = arith.truncf %202 : vector<24x288xf32> to vector<24x288xbf16>
    %c2_131 = arith.constant 2 : index
    %c0_132 = arith.constant 0 : index
    %c0_133 = arith.constant 0 : index
    %204 = vector.load %arg8[%c2_131, %c0_132, %c0_133] : memref<3x288x512xbf16, #tpu.memory_space<vmem>>, vector<1x288x512xbf16>
    %205 = vector.shape_cast %204 : vector<1x288x512xbf16> to vector<288x512xbf16>
    %cst_134 = arith.constant dense<0.000000e+00> : vector<24x512xf32>
    %206 = tpu.matmul %203, %205, %cst_134 {dimension_numbers = #tpu.dot_dimension_numbers<[1], [0], [0], [1], [0, 0, 1, 1], [], []>} : vector<24x288xbf16>, vector<288x512xbf16>, vector<24x512xf32> -> vector<24x512xf32>
    %207 = arith.addf %197, %206 : vector<24x512xf32>
    %208 = vector.shape_cast %207 : vector<24x512xf32> to vector<3x8x512xf32>
    %209 = vector.extract_strided_slice %208 {offsets = [0, 0, 0], sizes = [1, 8, 512], strides = [1, 1, 1]} : vector<3x8x512xf32> to vector<1x8x512xf32>
    %210 = vector.extract_strided_slice %208 {offsets = [0, 0, 0], sizes = [2, 8, 512], strides = [1, 1, 1]} : vector<3x8x512xf32> to vector<2x8x512xf32>
    %211 = vector.extract_strided_slice %208 {offsets = [1, 0, 0], sizes = [2, 8, 512], strides = [1, 1, 1]} : vector<3x8x512xf32> to vector<2x8x512xf32>
    %212 = arith.maximumf %210, %211 : vector<2x8x512xf32>
    %213 = vector.extract_strided_slice %208 {offsets = [2, 0, 0], sizes = [1, 8, 512], strides = [1, 1, 1]} : vector<3x8x512xf32> to vector<1x8x512xf32>
    %214 = tpu.concatenate %209, %212, %213 in 0 : vector<1x8x512xf32>, vector<2x8x512xf32>, vector<1x8x512xf32> -> vector<4x8x512xf32>
    %215 = vector.extract_strided_slice %214 {offsets = [0, 0, 0], sizes = [4, 8, 256], strides = [1, 1, 1]} : vector<4x8x512xf32> to vector<4x8x256xf32>
    %216 = vector.extract_strided_slice %214 {offsets = [0, 0, 256], sizes = [4, 8, 256], strides = [1, 1, 1]} : vector<4x8x512xf32> to vector<4x8x256xf32>
    %217 = arith.maximumf %215, %216 : vector<4x8x256xf32>
    %c0_135 = arith.constant 0 : index
    %c0_136 = arith.constant 0 : index
    %c0_137 = arith.constant 0 : index
    %218 = vector.load %arg9[%c0_135, %c0_136, %c0_137] : memref<1x1x256xf32, #tpu.memory_space<vmem>>, vector<1x1x256xf32>
    %219 = vector.broadcast %218 : vector<1x1x256xf32> to vector<4x8x256xf32>
    %220 = arith.addf %217, %219 : vector<4x8x256xf32>
    %cst_138 = arith.constant 0.000000e+00 : f32
    %221 = vector.broadcast %cst_138 : f32 to vector<4x8x256xf32>
    %222 = arith.maximumf %220, %221 : vector<4x8x256xf32>
    %223 = vector.extract_strided_slice %222 {offsets = [0, 0, 0], sizes = [1, 8, 256], strides = [1, 1, 1]} : vector<4x8x256xf32> to vector<1x8x256xf32>
    %224 = vector.shape_cast %223 : vector<1x8x256xf32> to vector<8x256xf32>
    %225 = arith.truncf %224 : vector<8x256xf32> to vector<8x256xbf16>
    %c0_139 = arith.constant 0 : index
    %c0_140 = arith.constant 0 : index
    %c0_141 = arith.constant 0 : index
    %226 = vector.load %arg10[%c0_139, %c0_140, %c0_141] : memref<4x256x120xbf16, #tpu.memory_space<vmem>>, vector<1x256x120xbf16>
    %227 = vector.shape_cast %226 : vector<1x256x120xbf16> to vector<256x120xbf16>
    %cst_142 = arith.constant dense<0.000000e+00> : vector<8x120xf32>
    %228 = tpu.matmul %225, %227, %cst_142 {dimension_numbers = #tpu.dot_dimension_numbers<[1], [0], [0], [1], [0, 0, 1, 1], [], []>} : vector<8x256xbf16>, vector<256x120xbf16>, vector<8x120xf32> -> vector<8x120xf32>
    %229 = vector.extract_strided_slice %222 {offsets = [1, 0, 0], sizes = [1, 8, 256], strides = [1, 1, 1]} : vector<4x8x256xf32> to vector<1x8x256xf32>
    %230 = vector.shape_cast %229 : vector<1x8x256xf32> to vector<8x256xf32>
    %231 = arith.truncf %230 : vector<8x256xf32> to vector<8x256xbf16>
    %c1_143 = arith.constant 1 : index
    %c0_144 = arith.constant 0 : index
    %c0_145 = arith.constant 0 : index
    %232 = vector.load %arg10[%c1_143, %c0_144, %c0_145] : memref<4x256x120xbf16, #tpu.memory_space<vmem>>, vector<1x256x120xbf16>
    %233 = vector.shape_cast %232 : vector<1x256x120xbf16> to vector<256x120xbf16>
    %cst_146 = arith.constant dense<0.000000e+00> : vector<8x120xf32>
    %234 = tpu.matmul %231, %233, %cst_146 {dimension_numbers = #tpu.dot_dimension_numbers<[1], [0], [0], [1], [0, 0, 1, 1], [], []>} : vector<8x256xbf16>, vector<256x120xbf16>, vector<8x120xf32> -> vector<8x120xf32>
    %235 = arith.addf %228, %234 : vector<8x120xf32>
    %236 = vector.extract_strided_slice %222 {offsets = [2, 0, 0], sizes = [1, 8, 256], strides = [1, 1, 1]} : vector<4x8x256xf32> to vector<1x8x256xf32>
    %237 = vector.shape_cast %236 : vector<1x8x256xf32> to vector<8x256xf32>
    %238 = arith.truncf %237 : vector<8x256xf32> to vector<8x256xbf16>
    %c2_147 = arith.constant 2 : index
    %c0_148 = arith.constant 0 : index
    %c0_149 = arith.constant 0 : index
    %239 = vector.load %arg10[%c2_147, %c0_148, %c0_149] : memref<4x256x120xbf16, #tpu.memory_space<vmem>>, vector<1x256x120xbf16>
    %240 = vector.shape_cast %239 : vector<1x256x120xbf16> to vector<256x120xbf16>
    %cst_150 = arith.constant dense<0.000000e+00> : vector<8x120xf32>
    %241 = tpu.matmul %238, %240, %cst_150 {dimension_numbers = #tpu.dot_dimension_numbers<[1], [0], [0], [1], [0, 0, 1, 1], [], []>} : vector<8x256xbf16>, vector<256x120xbf16>, vector<8x120xf32> -> vector<8x120xf32>
    %242 = arith.addf %235, %241 : vector<8x120xf32>
    %243 = vector.extract_strided_slice %222 {offsets = [3, 0, 0], sizes = [1, 8, 256], strides = [1, 1, 1]} : vector<4x8x256xf32> to vector<1x8x256xf32>
    %244 = vector.shape_cast %243 : vector<1x8x256xf32> to vector<8x256xf32>
    %245 = arith.truncf %244 : vector<8x256xf32> to vector<8x256xbf16>
    %c3_151 = arith.constant 3 : index
    %c0_152 = arith.constant 0 : index
    %c0_153 = arith.constant 0 : index
    %246 = vector.load %arg10[%c3_151, %c0_152, %c0_153] : memref<4x256x120xbf16, #tpu.memory_space<vmem>>, vector<1x256x120xbf16>
    %247 = vector.shape_cast %246 : vector<1x256x120xbf16> to vector<256x120xbf16>
    %cst_154 = arith.constant dense<0.000000e+00> : vector<8x120xf32>
    %248 = tpu.matmul %245, %247, %cst_154 {dimension_numbers = #tpu.dot_dimension_numbers<[1], [0], [0], [1], [0, 0, 1, 1], [], []>} : vector<8x256xbf16>, vector<256x120xbf16>, vector<8x120xf32> -> vector<8x120xf32>
    %249 = arith.addf %242, %248 : vector<8x120xf32>
    %c0_155 = arith.constant 0 : index
    %c0_156 = arith.constant 0 : index
    %250 = vector.load %arg11[%c0_155, %c0_156] : memref<1x120xf32, #tpu.memory_space<vmem>>, vector<1x120xf32>
    %251 = vector.broadcast %250 : vector<1x120xf32> to vector<8x120xf32>
    %252 = arith.addf %249, %251 : vector<8x120xf32>
    %cst_157 = arith.constant 0.000000e+00 : f32
    %253 = vector.broadcast %cst_157 : f32 to vector<8x120xf32>
    %254 = arith.maximumf %252, %253 : vector<8x120xf32>
    %255 = arith.truncf %254 : vector<8x120xf32> to vector<8x120xbf16>
    %c0_158 = arith.constant 0 : index
    %c0_159 = arith.constant 0 : index
    %256 = vector.load %arg12[%c0_158, %c0_159] : memref<120x84xbf16, #tpu.memory_space<vmem>>, vector<120x84xbf16>
    %cst_160 = arith.constant dense<0.000000e+00> : vector<8x84xf32>
    %257 = tpu.matmul %255, %256, %cst_160 {dimension_numbers = #tpu.dot_dimension_numbers<[1], [0], [0], [1], [0, 0, 1, 1], [], []>} : vector<8x120xbf16>, vector<120x84xbf16>, vector<8x84xf32> -> vector<8x84xf32>
    %c0_161 = arith.constant 0 : index
    %c0_162 = arith.constant 0 : index
    %258 = vector.load %arg13[%c0_161, %c0_162] : memref<1x84xf32, #tpu.memory_space<vmem>>, vector<1x84xf32>
    %259 = vector.broadcast %258 : vector<1x84xf32> to vector<8x84xf32>
    %260 = arith.addf %257, %259 : vector<8x84xf32>
    %cst_163 = arith.constant 0.000000e+00 : f32
    %261 = vector.broadcast %cst_163 : f32 to vector<8x84xf32>
    %262 = arith.maximumf %260, %261 : vector<8x84xf32>
    %263 = arith.truncf %262 : vector<8x84xf32> to vector<8x84xbf16>
    %c0_164 = arith.constant 0 : index
    %c0_165 = arith.constant 0 : index
    %264 = vector.load %arg14[%c0_164, %c0_165] : memref<84x10xbf16, #tpu.memory_space<vmem>>, vector<84x10xbf16>
    %cst_166 = arith.constant dense<0.000000e+00> : vector<8x10xf32>
    %265 = tpu.matmul %263, %264, %cst_166 {dimension_numbers = #tpu.dot_dimension_numbers<[1], [0], [0], [1], [0, 0, 1, 1], [], []>} : vector<8x84xbf16>, vector<84x10xbf16>, vector<8x10xf32> -> vector<8x10xf32>
    %c0_167 = arith.constant 0 : index
    %c0_168 = arith.constant 0 : index
    %266 = vector.load %arg15[%c0_167, %c0_168] : memref<1x10xf32, #tpu.memory_space<vmem>>, vector<1x10xf32>
    %267 = vector.broadcast %266 : vector<1x10xf32> to vector<8x10xf32>
    %268 = arith.addf %265, %267 : vector<8x10xf32>
    %c0_169 = arith.constant 0 : index
    %c0_170 = arith.constant 0 : index
    %269 = vector.load %arg16[%c0_169, %c0_170] : memref<8x10xf32, #tpu.memory_space<vmem>>, vector<8x10xf32>
    tpu.vector_store %arg16[%c0_169, %c0_170], %268 {strides = array<i32>} : memref<8x10xf32, #tpu.memory_space<vmem>>, vector<8x10xf32>,
    return
  }
  func.func @transform_0(%arg0: i32) -> (i32, i32, i32) {
    %c0_i32 = arith.constant 0 : i32
    %c0_i32_0 = arith.constant 0 : i32
    %c0_i32_1 = arith.constant 0 : i32
    return %c0_i32, %arg0, %c0_i32_0 : i32, i32, i32
  }
  func.func @transform_1(%arg0: i32) -> (i32, i32, i32) {
    %c0_i32 = arith.constant 0 : i32
    %c0_i32_0 = arith.constant 0 : i32
    %c0_i32_1 = arith.constant 0 : i32
    %c0_i32_2 = arith.constant 0 : i32
    return %c0_i32, %c0_i32_0, %c0_i32_1 : i32, i32, i32
  }
  func.func @transform_2(%arg0: i32) -> (i32, i32, i32) {
    %c0_i32 = arith.constant 0 : i32
    %c0_i32_0 = arith.constant 0 : i32
    %c0_i32_1 = arith.constant 0 : i32
    %c0_i32_2 = arith.constant 0 : i32
    return %c0_i32, %c0_i32_0, %c0_i32_1 : i32, i32, i32
  }
  func.func @transform_3(%arg0: i32) -> (i32, i32, i32) {
    %c0_i32 = arith.constant 0 : i32
    %c0_i32_0 = arith.constant 0 : i32
    %c0_i32_1 = arith.constant 0 : i32
    %c0_i32_2 = arith.constant 0 : i32
    return %c0_i32, %c0_i32_0, %c0_i32_1 : i32, i32, i32
  }
  func.func @transform_4(%arg0: i32) -> (i32, i32, i32) {
    %c0_i32 = arith.constant 0 : i32
    %c0_i32_0 = arith.constant 0 : i32
    %c0_i32_1 = arith.constant 0 : i32
    %c0_i32_2 = arith.constant 0 : i32
    return %c0_i32, %c0_i32_0, %c0_i32_1 : i32, i32, i32
  }
  func.func @transform_5(%arg0: i32) -> (i32, i32, i32) {
    %c0_i32 = arith.constant 0 : i32
    %c0_i32_0 = arith.constant 0 : i32
    %c0_i32_1 = arith.constant 0 : i32
    %c0_i32_2 = arith.constant 0 : i32
    return %c0_i32, %c0_i32_0, %c0_i32_1 : i32, i32, i32
  }
  func.func @transform_6(%arg0: i32) -> (i32, i32, i32) {
    %c0_i32 = arith.constant 0 : i32
    %c0_i32_0 = arith.constant 0 : i32
    %c0_i32_1 = arith.constant 0 : i32
    %c0_i32_2 = arith.constant 0 : i32
    return %c0_i32, %c0_i32_0, %c0_i32_1 : i32, i32, i32
  }
  func.func @transform_7(%arg0: i32) -> (i32, i32, i32) {
    %c0_i32 = arith.constant 0 : i32
    %c0_i32_0 = arith.constant 0 : i32
    %c0_i32_1 = arith.constant 0 : i32
    %c0_i32_2 = arith.constant 0 : i32
    return %c0_i32, %c0_i32_0, %c0_i32_1 : i32, i32, i32
  }
  func.func @transform_8(%arg0: i32) -> (i32, i32, i32) {
    %c0_i32 = arith.constant 0 : i32
    %c0_i32_0 = arith.constant 0 : i32
    %c0_i32_1 = arith.constant 0 : i32
    %c0_i32_2 = arith.constant 0 : i32
    return %c0_i32, %c0_i32_0, %c0_i32_1 : i32, i32, i32
  }
  func.func @transform_9(%arg0: i32) -> (i32, i32, i32) {
    %c0_i32 = arith.constant 0 : i32
    %c0_i32_0 = arith.constant 0 : i32
    %c0_i32_1 = arith.constant 0 : i32
    %c0_i32_2 = arith.constant 0 : i32
    return %c0_i32, %c0_i32_0, %c0_i32_1 : i32, i32, i32
  }
  func.func @transform_10(%arg0: i32) -> (i32, i32) {
    %c0_i32 = arith.constant 0 : i32
    %c0_i32_0 = arith.constant 0 : i32
    %c0_i32_1 = arith.constant 0 : i32
    return %c0_i32, %c0_i32_0 : i32, i32
  }
  func.func @transform_11(%arg0: i32) -> (i32, i32) {
    %c0_i32 = arith.constant 0 : i32
    %c0_i32_0 = arith.constant 0 : i32
    %c0_i32_1 = arith.constant 0 : i32
    return %c0_i32, %c0_i32_0 : i32, i32
  }
  func.func @transform_12(%arg0: i32) -> (i32, i32) {
    %c0_i32 = arith.constant 0 : i32
    %c0_i32_0 = arith.constant 0 : i32
    %c0_i32_1 = arith.constant 0 : i32
    return %c0_i32, %c0_i32_0 : i32, i32
  }
  func.func @transform_13(%arg0: i32) -> (i32, i32) {
    %c0_i32 = arith.constant 0 : i32
    %c0_i32_0 = arith.constant 0 : i32
    %c0_i32_1 = arith.constant 0 : i32
    return %c0_i32, %c0_i32_0 : i32, i32
  }
  func.func @transform_14(%arg0: i32) -> (i32, i32) {
    %c0_i32 = arith.constant 0 : i32
    %c0_i32_0 = arith.constant 0 : i32
    %c0_i32_1 = arith.constant 0 : i32
    return %c0_i32, %c0_i32_0 : i32, i32
  }
  func.func @transform_15(%arg0: i32) -> (i32, i32) {
    %c0_i32 = arith.constant 0 : i32
    %c0_i32_0 = arith.constant 0 : i32
    return %arg0, %c0_i32 : i32, i32
  }
}

</mosaic_0001>

<bundles_post_ra>
// kernel: net_forward.1
= control target key start
LH: loop header
LB: loop body
LE: loop exit
PB: predicated region body
PF: predicated region fallthrough
CT: control target
= control target key end

     0   :  { %20 = vsyncpa [#allocation6], 0  ;;  %s8607_s18 = smov [#allocation5]   ;;  %s10664_s0 = inlined_call_operand.vmem [shape: f32[33,8,32], index: 0, kind: input, shape index: {}]   ;;  %s10665_s1 = inlined_call_operand.vmem [shape: bf16[5,32,168], index: 1, kind: input, shape index: {}]   ;;  %s10666_s2 = inlined_call_operand.vmem [shape: f32[1,1,84], index: 2, kind: input, shape index: {}]   ;;  %s10667_s3 = inlined_call_operand.vmem [shape: bf16[5,108,224], index: 3, kind: input, shape index: {}]   ;;  %s10668_s4 = inlined_call_operand.vmem [shape: f32[1,1,112], index: 4, kind: input, shape index: {}]   ;;  %s10669_s5 = inlined_call_operand.vmem [shape: bf16[3,176,320], index: 5, kind: input, shape index: {}]   ;;  %s10670_s6 = inlined_call_operand.vmem [shape: f32[1,1,160], index: 6, kind: input, shape index: {}]   ;;  %s10671_s7 = inlined_call_operand.hbm [shape: bf16[3,288,512], index: 7, kind: input, shape index: {}]   ;;  %s10672_s8 = inlined_call_operand.vmem [shape: f32[1,1,256], index: 8, kind: input, shape index: {}]   ;;  %s10673_s9 = inlined_call_operand.vmem [shape: bf16[4,256,120], index: 9, kind: input, shape index: {}]   ;;  %s10674_s10 = inlined_call_operand.vmem [shape: f32[1,120], index: 10, kind: input, shape index: {}]   ;;  %s10675_s11 = inlined_call_operand.vmem [shape: bf16[120,84], index: 11, kind: input, shape index: {}]   ;;  %s10676_s12 = inlined_call_operand.vmem [shape: f32[1,84], index: 12, kind: input, shape index: {}]   ;;  %s10677_s13 = inlined_call_operand.vmem [shape: bf16[84,10], index: 13, kind: input, shape index: {}]   ;;  %s10678_s14 = inlined_call_operand.vmem [shape: f32[1,10], index: 14, kind: input, shape index: {}]   ;;  %s10679_s15 = inlined_call_operand.vmem [shape: f32[8,10], index: 15, kind: output, shape index: {}]  }
   0x1   :  { %s40_s19 = sshll.u32 %s8607_s18, 4  ;;  %s8583_s22 = scalar_lea.hbm %s10671_s7, 27648  ;;  %s41_s19 = int_to_ptr.vmem [resolvable:$true] %s40_s19 }
   0x2   :  { %p8584_p0 = scmp.ne.s32.totalorder %s10671_s7, %s8583_s22  ;;  %p8587_p1 = scmp.lt.u32.totalorder %s8583_s22, %s10671_s7 }
   0x4   :  { %p8589_p2 = pnand %p8587_p1, %p8584_p0 }
   0x6   :  { %8592 = shalt.err (!%p8589_p2)
}
   0x7   :  { %s8593_s27 = scalar_lea.vmem %s41_s19, 27648  ;;  %p8598_p4 = scmp.lt.s32.totalorder %s41_s19, %s41_s19 }
   0x8   :  { %p8594_p3 = scmp.ne.s32.totalorder %s41_s19, %s8593_s27  ;;  %p8599_p5 = scmp.lt.s32.totalorder %s8593_s27, %s8593_s27 }
   0xa   :  { %p8600_p6 = por %p8599_p5, %p8598_p4 }
   0xc   :  { %p8601_p7 = pnand %p8600_p6, %p8594_p3 }
   0xe   :  { %8604 = shalt.err (!%p8601_p7)
}
   0xf   :  { %s8608_s28 = smov 256   ;;  %s8609_s29 = smov 16  }
  0x10   :  { %46 = dma.hbm_to_vmem [thread:$0]  %s10671_s7, 27648, %s41_s19, [#allocation6], %s8608_s28, %s8608_s28, %s8609_s29  }
  0x11   :  { %8605 = dma.done.wait [#allocation6], 27648  }
  0x12   :  { %8606 = vsyncadd [#allocation6], 4294939648  ;;  %vm138_vm0 = vcmask 261120   ;;  %vm1192_vm1 = vcmask 883712   ;;  %v8610_v0 = vmov 0.0   ;;  %v8611_v1 = vmov 0  }
  0x13   :  { %2342 = vst [vmem:[#allocation3] sm:$0xff] %v8610_v0  ;;  %1194 = vst.msk [vmem:[#allocation2 + $0x8] sm:$0xff] %vm1192_vm1, %v8610_v0  ;;  %336 = vmatprep.mubr.bf16.mxu0 %v8611_v1  ;;  %192 = vmatprep.mubr.bf16.mxu1 %v8611_v1  ;;  %v7911_v2 = vld [vmem:[%s10665_s1 + $0x4] ss:$8 sps:$4 sm:$0xff]   ;;  %v7913_v3 = vld [vmem:[%s10665_s1] ss:$8 sps:$4 sm:$0xff]  }
  0x14   :  { %1195 = vst.msk [vmem:[#allocation2 + $0x10] sm:$0xff] %vm1192_vm1, %v8610_v0  ;;  %1196 = vst.msk [vmem:[#allocation2 + $0x18] sm:$0xff] %vm1192_vm1, %v8610_v0  ;;  %304 = vmatprep.subr.bf16.mxu0 %v7911_v2  ;;  %v7914_v4 = vld [vmem:[%s10665_s1 + $0x14] ss:$8 sps:$4 sm:$0xff]   ;;  %v7916_v5 = vld [vmem:[%s10665_s1 + $0x10] ss:$8 sps:$4 sm:$0xff]  }
  0x15   :  { %1197 = vst.msk [vmem:[#allocation2 + $0x20] sm:$0xff] %vm1192_vm1, %v8610_v0  ;;  %1198 = vst.msk [vmem:[#allocation2 + $0x28] sm:$0xff] %vm1192_vm1, %v8610_v0  ;;  %v6576_v6 = vld [vmem:[%s10664_s0 + $0x8] sm:$0xff]  ;;  %305 = vmatpush1.bf16.msra.mxu0 %v7913_v3  ;;  %v8755_v7 = vld [vmem:[%s10664_s0 + $0x18] sm:$0xff]  ;;  %vm1114_vm2 = vcmask 359424   ;;  %s8613_s22 = smov 12  }
  0x16   :  { %1199 = vst.msk [vmem:[#allocation2 + $0x30] sm:$0xff] %vm1192_vm1, %v8610_v0  ;;  %1200 = vst.msk [vmem:[#allocation2 + $0x38] sm:$0xff] %vm1192_vm1, %v8610_v0  ;;  %306 = vmatprep.subr.bf16.mxu0 %v7914_v4  ;;  %v7919_v8 = vld [vmem:[%s10665_s1 + $0x44] ss:$8 sps:$4 sm:$0xff]   ;;  %v80_v9 = vpack.c.bf16 %v8755_v7, %v6576_v6  ;;  %v7917_v10 = vld [vmem:[%s10665_s1 + $0x40] ss:$8 sps:$4 sm:$0xff]  }
  0x17   :  { %1201 = vst.msk [vmem:[#allocation2 + $0x40] sm:$0xff] %vm1192_vm1, %v8610_v0  ;;  %1202 = vst.msk [vmem:[#allocation2 + $0x48] sm:$0xff] %vm1192_vm1, %v8610_v0  ;;  %v7922_v11 = vld [vmem:[%s10665_s1 + $0x54] ss:$8 sps:$4 sm:$0xff]   ;;  %v8770_v12 = vld [vmem:[%s10664_s0 + $0x28] sm:$0xff]  ;;  %vm1416_vm3 = vcmask 1045504  }
  0x18   :  { %1203 = vst.msk [vmem:[#allocation2 + $0x50] sm:$0xff] %vm1192_vm1, %v8610_v0  ;;  %1204 = vst.msk [vmem:[#allocation2 + $0x58] sm:$0xff] %vm1192_vm1, %v8610_v0  ;;  %v8776_v13 = vld [vmem:[%s10664_s0 + $0x38] sm:$0xff]  ;;  %v7925_v15 = vld [vmem:[%s10665_s1 + $0x64] ss:$8 sps:$4 sm:$0xff]   ;;  %v422_v59 = vpack.c.bf16 %v8770_v12, %v8755_v7  ;;  %vm1269_vm4 = vcmask 785504  }
  0x19   :  { %1205 = vst.msk [vmem:[#allocation2 + $0x60] sm:$0xff] %vm1192_vm1, %v8610_v0  ;;  %1206 = vst.msk [vmem:[#allocation2 + $0x68] sm:$0xff] %vm1192_vm1, %v8610_v0  ;;  %307 = vmatpush1.bf16.msra.mxu0 %v7916_v5  ;;  %v7920_v14 = vld [vmem:[%s10665_s1 + $0x50] ss:$8 sps:$4 sm:$0xff]   ;;  %v8788_v16 = vld [vmem:[%s10664_s0 + $0x20] sm:$0xff]  ;;  %v8797_v18 = vpack.c.bf16 %v8776_v13, %v8770_v12  ;;  %vm2343_vm5 = vcmask 392192  }
  0x1a   :  { %1207 = vst.msk [vmem:[#allocation2 + $0x70] sm:$0xff] %vm1192_vm1, %v8610_v0  ;;  %1208 = vst.msk [vmem:[#allocation2 + $0x78] sm:$0xff] %vm1192_vm1, %v8610_v0  ;;  %475 = vmatprep.subr.bf16.mxu0 %v7919_v8  ;;  %v8793_v17 = vld [vmem:[%s10664_s0 + $0x30] sm:$0xff]  ;;  %v8804_v20 = vld [vmem:[%s10664_s0 + $0x40] sm:$0xff]  ;;  %vm2299_vm6 = vcmask 130048   ;;  %s8614_s17 = smov 32  }
  0x1b   :  { %1209 = vst.msk [vmem:[#allocation2 + $0x80] sm:$0xff] %vm1192_vm1, %v8610_v0  ;;  %1210 = vst.msk [vmem:[#allocation2 + $0x88] sm:$0xff] %vm1192_vm1, %v8610_v0  ;;  %v621_v19 = vpack.c.bf16 %v8793_v17, %v8788_v16  ;;  %v8809_v21 = vld [vmem:[%s10664_s0 + $0x50] sm:$0xff]  ;;  %v8814_v22 = vld [vmem:[%s10664_s0 + $0x60] sm:$0xff]  ;;  %v107_v55 = vpack.c.bf16 %v8804_v20, %v8793_v17  ;;  %vm2394_vm7 = vcmask 1047808   ;;  %s8615_s25 = smov 96  }
  0x1c   :  { %2347 = vst [vmem:[#allocation3 + $0x20] sm:$0xff] %v8610_v0  ;;  %2349 = vst [vmem:[#allocation3 + $0x30] sm:$0xff] %v8610_v0  ;;  %6623 = vmatmul.mubr.msk.bf16.vlgmr.msra.gmra.mrb[0].mxu0 %vm138_vm0, %v80_v9  ;;  %v622_v23 = vpack.c.bf16 %v8809_v21, %v8804_v20  ;;  %v8821_v24 = vld [vmem:[%s10664_s0 + $0x70] sm:$0xff]  ;;  %v8826_v25 = vld [vmem:[%s10664_s0 + $0x80] sm:$0xff]  ;;  %v108_v57 = vpack.c.bf16 %v8814_v22, %v8809_v21  ;;  %vm3484_vm8 = vcmask 785408   ;;  %vm3599_vm9 = vcmask 523264  }
  0x1d   :  { %2351 = vst [vmem:[#allocation3 + $0x40] sm:$0xff] %v8610_v0  ;;  %2353 = vst [vmem:[#allocation3 + $0x50] sm:$0xff] %v8610_v0  ;;  %476 = vmatpush1.bf16.msra.mxu0 %v7917_v10  ;;  %346 = vmatprep.mubr.bf16.mxu0 %v8611_v1  ;;  %v8831_v26 = vld [vmem:[%s10664_s0 + $0x90] sm:$0xff]  ;;  %v623_v27 = vpack.c.bf16 %v8821_v24, %v8814_v22  ;;  %v8842_v29 = vld [vmem:[%s10664_s0 + $0x48] sm:$0xff]  ;;  %v109_v63 = vpack.c.bf16 %v8826_v25, %v8821_v24  ;;  %vm3616_vm10 = vcmask 1048064   ;;  %vm6424_vm11 = vcmask 1043456  }
  0x1e   :  { %2355 = vst [vmem:[#allocation3 + $0x60] sm:$0xff] %v8610_v0  ;;  %2357 = vst [vmem:[#allocation3 + $0x70] sm:$0xff] %v8610_v0  ;;  %477 = vmatprep.subr.bf16.mxu0 %v7922_v11  ;;  %v624_v28 = vpack.c.bf16 %v8831_v26, %v8826_v25  ;;  %v8847_v30 = vld [vmem:[%s10664_s0 + $0x58] sm:$0xff]  ;;  %v8853_v31 = vld [vmem:[%s10664_s0 + $0xa0] sm:$0xff]  ;;  %vm8617_vm12 = vmmov 0   ;;  %vm6420_vm13 = vcmask 982016  }
  0x1f   :  { %2359 = vst [vmem:[#allocation3 + $0x80] sm:$0xff] %v8610_v0  ;;  %3547 = vst.msk [vmem:[#allocation4 + $0x28] sm:$0xff] %vm138_vm0, %v8610_v0  ;;  %v8858_v32 = vld [vmem:[%s10664_s0 + $0xb0] sm:$0xff]  ;;  %v8864_v34 = vpack.c.bf16 %v8847_v30, %v8842_v29  ;;  %v8869_v35 = vld [vmem:[%s10664_s0 + $0x68] sm:$0xff]  ;;  %v110_v2 = vpack.c.bf16 %v8853_v31, %v8831_v26  ;;  %vm6525_vm14 = vcmask 1041408   ;;  %vm6521_vm15 = vcmask 687104  }
  0x20   :  { %3548 = vst [vmem:[#allocation4 + $0x30] sm:$0xff] %v8610_v0  ;;  %3549 = vst [vmem:[#allocation4 + $0x38] sm:$0xff] %v8610_v0  ;;  %v625_v33 = vpack.c.bf16 %v8858_v32, %v8853_v31  ;;  %v8874_v36 = vld [vmem:[%s10664_s0 + $0x78] sm:$0xff]  ;;  %v8882_v37 = vld [vmem:[%s10664_s0 + $0xc0] sm:$0xff]  ;;  %v424_v3 = vpack.c.bf16 %v8869_v35, %v8847_v30 }
  0x21   :  { %3550 = vst.msk [vmem:[#allocation4 + $0x40] sm:$0xff] %vm138_vm0, %v8610_v0  ;;  %3551 = vst [vmem:[#allocation4 + $0x48] sm:$0xff] %v8610_v0  ;;  %478 = vmatpush1.bf16.msra.mxu0 %v7920_v14  ;;  %v8887_v38 = vld [vmem:[%s10664_s0 + $0xd0] sm:$0xff]  ;;  %v8893_v40 = vpack.c.bf16 %v8874_v36, %v8869_v35  ;;  %v7935_v41 = vld [vmem:[%s10665_s1 + $0x24] ss:$8 sps:$4 sm:$0xff]   ;;  %v111_v4 = vpack.c.bf16 %v8882_v37, %v8858_v32 }
  0x22   :  { %3552 = vst [vmem:[#allocation4 + $0x50] sm:$0xff] %v8610_v0  ;;  %3553 = vst.msk [vmem:[#allocation4 + $0x58] sm:$0xff] %vm138_vm0, %v8610_v0  ;;  %674 = vmatprep.subr.bf16.mxu0 %v7925_v15  ;;  %v626_v39 = vpack.c.bf16 %v8887_v38, %v8882_v37  ;;  %v7937_v42 = vld [vmem:[%s10665_s1 + $0x20] ss:$8 sps:$4 sm:$0xff]   ;;  %v8910_v44 = vld [vmem:[%s10664_s0 + $0x98] sm:$0xff]  ;;  %160 = vmatprep.subr.bf16.mxu1 %v7935_v41 }
  0x23   :  { %3554 = vst [vmem:[#allocation4 + $0x60] sm:$0xff] %v8610_v0  ;;  %3555 = vst [vmem:[#allocation4 + $0x68] sm:$0xff] %v8610_v0  ;;  %v6584_v43 = vld [vmem:[%s10664_s0 + $0x88] sm:$0xff]  ;;  %161 = vmatpush1.bf16.msra.mxu1 %v7937_v42  ;;  %v8921_v47 = vld [vmem:[%s10664_s0 + $0xb8] sm:$0xff] }
  0x24   :  { %3556 = vst.msk [vmem:[#allocation4 + $0x70] sm:$0xff] %vm138_vm0, %v8610_v0  ;;  %3557 = vst [vmem:[#allocation4 + $0x78] sm:$0xff] %v8610_v0  ;;  %6624 = vmatmul.mubr.msk.bf16.gmra.mrb[4].mxu0 %vm138_vm0, %v8797_v18  ;;  %v8913_v45 = vpack.c.bf16 %v8910_v44, %v6584_v43  ;;  %v6586_v46 = vld [vmem:[%s10664_s0 + $0xa8] sm:$0xff]  ;;  %v7938_v48 = vld [vmem:[%s10665_s1 + $0x34] ss:$8 sps:$4 sm:$0xff]   ;;  %v425_v5 = vpack.c.bf16 %v6584_v43, %v8874_v36 }
  0x25   :  { %3558 = vst [vmem:[#allocation4 + $0x80] sm:$0xff] %v8610_v0  ;;  %3559 = vst.msk [vmem:[#allocation4 + $0x88] sm:$0xff] %vm138_vm0, %v8610_v0  ;;  %356 = vmatprep.mubr.bf16.mxu0 %v8611_v1  ;;  %v7940_v49 = vld [vmem:[%s10665_s1 + $0x30] ss:$8 sps:$4 sm:$0xff]   ;;  %162 = vmatprep.subr.bf16.mxu1 %v7938_v48  ;;  %v8937_v52 = vpack.c.bf16 %v8921_v47, %v6586_v46  ;;  %v6588_v53 = vld [vmem:[%s10664_s0 + $0xc8] sm:$0xff]  ;;  %v426_v8 = vpack.c.bf16 %v6586_v46, %v8910_v44 }
  0x26   :  { %3560 = vst [vmem:[#allocation4 + $0x90] sm:$0xff] %v8610_v0  ;;  %3561 = vst [vmem:[#allocation4 + $0x98] sm:$0xff] %v8610_v0  ;;  %v6590_v50 = vld [vmem:[%s10664_s0 + $0x10] sm:$0xff]  ;;  %v6589_v54 = vld [vmem:[%s10664_s0 + $0xd8] sm:$0xff]  ;;  %v427_v9 = vpack.c.bf16 %v6588_v53, %v8921_v47 }
  0x27   :  { %3562 = vst.msk [vmem:[#allocation4 + $0xa0] sm:$0xff] %vm138_vm0, %v8610_v0  ;;  %3565 = vst.msk [vmem:[#allocation4 + $0xb8] sm:$0xff] %vm138_vm0, %v8610_v0  ;;  %v106_v51 = vpack.c.bf16 %v8788_v16, %v6590_v50  ;;  %163 = vmatpush1.bf16.msra.mxu1 %v7940_v49  ;;  %v8952_v56 = vpack.c.bf16 %v6589_v54, %v6588_v53  ;;  %v7923_v58 = vld [vmem:[%s10665_s1 + $0x60] ss:$8 sps:$4 sm:$0xff]   ;;  %v7928_v60 = vld [vmem:[%s10665_s1 + $0x74] ss:$8 sps:$4 sm:$0xff]   ;;  %v423_v0 = vpack.c.bf16 %v8842_v29, %v8776_v13 }
  0x28   :  { %v7926_v61 = vld [vmem:[%s10665_s1 + $0x70] ss:$8 sps:$4 sm:$0xff]   ;;  %v7931_v62 = vld [vmem:[%s10665_s1 + $0x84] ss:$8 sps:$4 sm:$0xff]   ;;  %v7929_v12 = vld [vmem:[%s10665_s1 + $0x80] ss:$8 sps:$4 sm:$0xff]  }
  0x29   :  { %v6671_v6 = vld [vmem:[%s10664_s0 + $0xe0] sm:$0xff]  ;;  %v6643_v10 = vld [vmem:[%s10664_s0 + $0xe8] sm:$0xff]  ;;  %v7934_v13 = vld [vmem:[%s10665_s1 + $0x94] ss:$8 sps:$4 sm:$0xff]  }
  0x2a   :  { %6612 = vmatmul.mubr.msk.bf16.vlgmr.msra.gmra.mrb[0].mxu1 %vm138_vm0, %v106_v51  ;;  %v112_v7 = vpack.c.bf16 %v6671_v6, %v8887_v38  ;;  %v428_v11 = vpack.c.bf16 %v6643_v10, %v6589_v54  ;;  %v7932_v14 = vld [vmem:[%s10665_s1 + $0x90] ss:$8 sps:$4 sm:$0xff]  }
  0x2b   :  { %202 = vmatprep.mubr.bf16.mxu1 %v8611_v1  ;;  %v6672_v15 = vld [vmem:[%s10664_s0 + $0xf0] sm:$0xff]  ;;  %v6701_v17 = vld [vmem:[%s10664_s0 + $0xf8] sm:$0xff]  ;;  %s8612_s0 = smov 44  }
  0x2c   :  { %6625 = vmatmul.mubr.msk.bf16.gmra.mrb[8].mxu0 %vm138_vm0, %v8864_v34  ;;  %v627_v16 = vpack.c.bf16 %v6672_v15, %v6671_v6 }
  0x2d   :  { %366 = vmatprep.mubr.bf16.mxu0 %v8611_v1 }
  0x32   :  { %6613 = vmatmul.mubr.msk.bf16.gmra.mrb[4].mxu1 %vm138_vm0, %v107_v55 }
  0x33   :  { %212 = vmatprep.mubr.bf16.mxu1 %v8611_v1 }
  0x34   :  { %6626 = vmatmul.mubr.msk.bf16.gmra.mrb[12].mxu0 %vm138_vm0, %v8893_v40 }
  0x35   :  { %376 = vmatprep.mubr.bf16.mxu0 %v8611_v1 }
  0x3a   :  { %6614 = vmatmul.mubr.msk.bf16.gmra.mrb[8].mxu1 %vm138_vm0, %v108_v57 }
  0x3b   :  { %222 = vmatprep.mubr.bf16.mxu1 %v8611_v1 }
  0x3c   :  { %6627 = vmatmul.mubr.msk.bf16.gmra.mrb[16].mxu0 %vm138_vm0, %v8913_v45 }
  0x3d   :  { %386 = vmatprep.mubr.bf16.mxu0 %v8611_v1 }
  0x42   :  { %6615 = vmatmul.mubr.msk.bf16.gmra.mrb[12].mxu1 %vm138_vm0, %v109_v63 }
  0x43   :  { %232 = vmatprep.mubr.bf16.mxu1 %v8611_v1 }
  0x44   :  { %6628 = vmatmul.mubr.msk.bf16.gmra.mrb[20].mxu0 %vm138_vm0, %v8937_v52 }
  0x45   :  { %396 = vmatprep.mubr.bf16.mxu0 %v8611_v1 }
  0x4a   :  { %6616 = vmatmul.mubr.msk.bf16.gmra.mrb[16].mxu1 %vm138_vm0, %v110_v2 }
  0x4b   :  { %242 = vmatprep.mubr.bf16.mxu1 %v8611_v1 }
  0x4c   :  { %6629 = vmatmul.mubr.msk.bf16.gmra.mrb[24].mxu0 %vm138_vm0, %v8952_v56 }
  0x4d   :  { %507 = vmatprep.mubr.bf16.mxu0 %v8611_v1 }
  0x52   :  { %6617 = vmatmul.mubr.msk.bf16.gmra.mrb[20].mxu1 %vm138_vm0, %v111_v4 }
  0x53   :  { %252 = vmatprep.mubr.bf16.mxu1 %v8611_v1 }
  0x54   :  { %6652 = vmatmul.mubr.msk.bf16.vlgmr.msra.gmra.mrb[0].mxu0 %vm138_vm0, %v422_v59 }
  0x55   :  { %675 = vmatpush1.bf16.msra.mxu0 %v7923_v58  ;;  %517 = vmatprep.mubr.bf16.mxu0 %v8611_v1 }
  0x56   :  { %676 = vmatprep.subr.bf16.mxu0 %v7928_v60 }
  0x59   :  { %677 = vmatpush1.bf16.msra.mxu0 %v7926_v61 }
  0x5a   :  { %873 = vmatprep.subr.bf16.mxu0 %v7931_v62  ;;  %6618 = vmatmul.mubr.msk.bf16.gmra.mrb[24].mxu1 %vm138_vm0, %v112_v7 }
  0x5b   :  { %1455 = vmatprep.mubr.bf16.mxu1 %v8611_v1 }
  0x5c   :  { %6653 = vmatmul.mubr.msk.bf16.gmra.mrb[4].mxu0 %vm138_vm0, %v423_v0 }
  0x5d   :  { %527 = vmatprep.mubr.bf16.mxu0 %v8611_v1 }
  0x64   :  { %6654 = vmatmul.mubr.msk.bf16.gmra.mrb[8].mxu0 %vm138_vm0, %v424_v3 }
  0x65   :  { %537 = vmatprep.mubr.bf16.mxu0 %v8611_v1 }
  0x6c   :  { %6655 = vmatmul.mubr.msk.bf16.gmra.mrb[12].mxu0 %vm138_vm0, %v425_v5 }
  0x6d   :  { %547 = vmatprep.mubr.bf16.mxu0 %v8611_v1 }
  0x74   :  { %6656 = vmatmul.mubr.msk.bf16.gmra.mrb[16].mxu0 %vm138_vm0, %v426_v8 }
  0x75   :  { %557 = vmatprep.mubr.bf16.mxu0 %v8611_v1 }
  0x7c   :  { %6657 = vmatmul.mubr.msk.bf16.gmra.mrb[20].mxu0 %vm138_vm0, %v427_v9 }
  0x7d   :  { %567 = vmatprep.mubr.bf16.mxu0 %v8611_v1 }
  0x84   :  { %6658 = vmatmul.mubr.msk.bf16.gmra.mrb[24].mxu0 %vm138_vm0, %v428_v11 }
  0x85   :  { %706 = vmatprep.mubr.bf16.mxu0 %v8611_v1 }
  0x8c   :  { %6681 = vmatmul.mubr.msk.bf16.vlgmr.msra.gmra.mrb[0].mxu0 %vm138_vm0, %v621_v19 }
  0x8d   :  { %874 = vmatpush1.bf16.msra.mxu0 %v7929_v12  ;;  %716 = vmatprep.mubr.bf16.mxu0 %v8611_v1 }
  0x8e   :  { %875 = vmatprep.subr.bf16.mxu0 %v7934_v13 }
  0x91   :  { %876 = vmatpush1.bf16.msra.mxu0 %v7932_v14 }
  0x94   :  { %6682 = vmatmul.mubr.msk.bf16.gmra.mrb[4].mxu0 %vm138_vm0, %v622_v23 }
  0x95   :  { %726 = vmatprep.mubr.bf16.mxu0 %v8611_v1 }
  0x9c   :  { %6683 = vmatmul.mubr.msk.bf16.gmra.mrb[8].mxu0 %vm138_vm0, %v623_v27 }
  0x9d   :  { %736 = vmatprep.mubr.bf16.mxu0 %v8611_v1 }
  0xa4   :  { %6684 = vmatmul.mubr.msk.bf16.gmra.mrb[12].mxu0 %vm138_vm0, %v624_v28 }
  0xa5   :  { %746 = vmatprep.mubr.bf16.mxu0 %v8611_v1 }
  0xac   :  { %6685 = vmatmul.mubr.msk.bf16.gmra.mrb[16].mxu0 %vm138_vm0, %v625_v33 }
  0xad   :  { %756 = vmatprep.mubr.bf16.mxu0 %v8611_v1 }
  0xb4   :  { %6686 = vmatmul.mubr.msk.bf16.gmra.mrb[20].mxu0 %vm138_vm0, %v626_v39 }
  0xb5   :  { %766 = vmatprep.mubr.bf16.mxu0 %v8611_v1 }
  0xbc   :  { %6687 = vmatmul.mubr.msk.bf16.gmra.mrb[24].mxu0 %vm138_vm0, %v627_v16 }
  0xbd   :  { %905 = vmatprep.mubr.bf16.mxu0 %v8611_v1 }
  0xc4   :  { %6710 = vmatmul.mubr.msk.bf16.vlgmr.msra.gmra.mrb[0].mxu0 %vm138_vm0, %v8797_v18  ;;  %v826_v18 = vpack.c.bf16 %v6701_v17, %v6643_v10 }
  0xc5   :  { %915 = vmatprep.mubr.bf16.mxu0 %v8611_v1 }
  0xcc   :  { %6711 = vmatmul.mubr.msk.bf16.gmra.mrb[4].mxu0 %vm138_vm0, %v8864_v34 }
  0xcd   :  { %925 = vmatprep.mubr.bf16.mxu0 %v8611_v1 }
  0xd4   :  { %6712 = vmatmul.mubr.msk.bf16.gmra.mrb[8].mxu0 %vm138_vm0, %v8893_v40 }
  0xd5   :  { %935 = vmatprep.mubr.bf16.mxu0 %v8611_v1 }
  0xdc   :  { %6713 = vmatmul.mubr.msk.bf16.gmra.mrb[12].mxu0 %vm138_vm0, %v8913_v45 }
  0xdd   :  { %945 = vmatprep.mubr.bf16.mxu0 %v8611_v1 }
  0xe4   :  { %6714 = vmatmul.mubr.msk.bf16.gmra.mrb[16].mxu0 %vm138_vm0, %v8937_v52 }
  0xe5   :  { %955 = vmatprep.mubr.bf16.mxu0 %v8611_v1 }
  0xec   :  { %6715 = vmatmul.mubr.msk.bf16.gmra.mrb[20].mxu0 %vm138_vm0, %v8952_v56 }
  0xed   :  { %965 = vmatprep.mubr.bf16.mxu0 %v8611_v1 }
  0xf4   :  { %6716 = vmatmul.mubr.msk.bf16.gmra.mrb[24].mxu0 %vm138_vm0, %v826_v18 }
  0xfd   :  { %v194_v19 = vpop.f32.mrb[0].mxu1 }
  0xfe   :  { %v196_v20 = vpop.f32.mrb[1].mxu1 }
  0xff   :  { %v198_v21 = vpop.f32.mrb[2].mxu1 }
 0x100   :  { %v200_v22 = vpop.f32.mrb[3].mxu1 }
 0x105   :  { %v204_v23 = vpop.f32.mrb[4].mxu1 }
 0x106   :  { %v206_v24 = vpop.f32.mrb[5].mxu1 }
 0x107   :  { %v208_v25 = vpop.f32.mrb[6].mxu1 }
 0x108   :  { %v210_v26 = vpop.f32.mrb[7].mxu1 }
 0x10d   :  { %v214_v27 = vpop.f32.mrb[8].mxu1 }
 0x10e   :  { %v216_v28 = vpop.f32.mrb[9].mxu1 }
 0x10f   :  { %v218_v29 = vpop.f32.mrb[10].mxu1 }
 0x110   :  { %v220_v30 = vpop.f32.mrb[11].mxu1 }
 0x115   :  { %v224_v31 = vpop.f32.mrb[12].mxu1 }
 0x116   :  { %v226_v32 = vpop.f32.mrb[13].mxu1 }
 0x117   :  { %v228_v33 = vpop.f32.mrb[14].mxu1 }
 0x118   :  { %v230_v34 = vpop.f32.mrb[15].mxu1 }
 0x11d   :  { %v9085_v35 = vpop.f32.mrb[16].mxu1 }
 0x11e   :  { %v9087_v36 = vpop.f32.mrb[17].mxu1 }
 0x11f   :  { %v9089_v37 = vpop.f32.mrb[18].mxu1 }
 0x120   :  { %v9091_v38 = vpop.f32.mrb[19].mxu1 }
 0x125   :  { %v9093_v39 = vpop.f32.mrb[20].mxu1 }
 0x126   :  { %v9095_v40 = vpop.f32.mrb[21].mxu1 }
 0x127   :  { %v9097_v41 = vpop.f32.mrb[22].mxu1 }
 0x128   :  { %v9099_v42 = vpop.f32.mrb[23].mxu1 }
 0x12d   :  { %v9101_v43 = vpop.f32.mrb[24].mxu1 }
 0x12e   :  { %v9103_v44 = vpop.f32.mrb[25].mxu1 }
 0x12f   :  { %v9105_v45 = vpop.f32.mrb[26].mxu1 }
 0x130   :  { %v9107_v46 = vpop.f32.mrb[27].mxu1 }
 0x197   :  { %v907_v47 = vpop.f32.mrb[0].mxu0 }
 0x198   :  { %v9109_v48 = vadd.f32 %v907_v47, %v194_v19  ;;  %v909_v49 = vpop.f32.mrb[1].mxu0 }
 0x199   :  { %v9111_v50 = vadd.f32 %v909_v49, %v196_v20  ;;  %v911_v51 = vpop.f32.mrb[2].mxu0 }
 0x19a   :  { %v9113_v52 = vadd.f32 %v911_v51, %v198_v21  ;;  %1058 = vrot.lane.b32.xlu0 %v9109_v48, %s8612_s0  ;;  %v913_v53 = vpop.f32.mrb[3].mxu0 }
 0x19b   :  { %v9117_v54 = vadd.f32 %v913_v53, %v200_v22 }
 0x19d   :  { %v1005_v55 = vmax.f32 %v9111_v50, %v9117_v54 }
 0x19e   :  { %1060 = vrot.lane.b32.xlu0 %v9111_v50, %s8612_s0  ;;  %v7946_v50 = vld [vmem:[%s10667_s3 + $0x84] ss:$8 sps:$4 sm:$0xff]  }
 0x19f   :  { %v917_v56 = vpop.f32.mrb[4].mxu0 }
 0x1a0   :  { %v7620_v57 = vadd.f32 %v917_v56, %v204_v23  ;;  %v919_v58 = vpop.f32.mrb[5].mxu0 }
 0x1a1   :  { %v9123_v59 = vadd.f32 %v919_v58, %v206_v24  ;;  %v921_v60 = vpop.f32.mrb[6].mxu0 }
 0x1a2   :  { %v7622_v61 = vadd.f32 %v921_v60, %v208_v25  ;;  %v923_v62 = vpop.f32.mrb[7].mxu0  ;;  %v9126_v63 = vmax.f32 %v9113_v52, %v7620_v57 }
 0x1a3   :  { %v1007_v0 = vmax.f32 %v9117_v54, %v9123_v59  ;;  %v9130_v2 = vadd.f32 %v923_v62, %v210_v26  ;;  %v7949_v54 = vld [vmem:[%s10667_s3 + $0x94] ss:$8 sps:$4 sm:$0xff]  }
 0x1a4   :  { %v9132_v3 = vmax.f32 %v7620_v57, %v7622_v61  ;;  %1066 = vrot.lane.b32.xlu1 %v9126_v63, %s8612_s0 }
 0x1a5   :  { %v1009_v4 = vmax.f32 %v9123_v59, %v9130_v2  ;;  %v7952_v59 = vld [vmem:[%s10667_s3 + $0xa4] ss:$8 sps:$4 sm:$0xff]  }
 0x1a7   :  { %v927_v5 = vpop.f32.mrb[8].mxu0 }
 0x1a8   :  { %v7624_v6 = vadd.f32 %v927_v5, %v214_v27  ;;  %1068 = vrot.lane.b32.xlu1 %v1007_v0, %s8612_s0  ;;  %v929_v7 = vpop.f32.mrb[9].mxu0 }
 0x1a9   :  { %v9139_v8 = vadd.f32 %v929_v7, %v216_v28  ;;  %v931_v9 = vpop.f32.mrb[10].mxu0 }
 0x1aa   :  { %v9141_v10 = vmax.f32 %v7622_v61, %v7624_v6  ;;  %v7626_v11 = vadd.f32 %v931_v9, %v218_v29  ;;  %v933_v12 = vpop.f32.mrb[11].mxu0 }
 0x1ab   :  { %v1011_v13 = vmax.f32 %v9130_v2, %v9139_v8  ;;  %v9145_v14 = vadd.f32 %v933_v12, %v220_v30 }
 0x1ac   :  { %v9147_v15 = vmax.f32 %v7624_v6, %v7626_v11  ;;  %1074 = vrot.lane.b32.xlu0 %v9141_v10, %s8612_s0 }
 0x1ad   :  { %v1013_v16 = vmax.f32 %v9139_v8, %v9145_v14  ;;  %1076 = vrot.lane.b32.xlu1 %v1011_v13, %s8612_s0  ;;  %v7955_v8 = vld [vmem:[%s10667_s3 + $0xb4] ss:$8 sps:$4 sm:$0xff]  }
 0x1af   :  { %v937_v17 = vpop.f32.mrb[12].mxu0 }
 0x1b0   :  { %v7628_v18 = vadd.f32 %v937_v17, %v224_v31  ;;  %v939_v19 = vpop.f32.mrb[13].mxu0 }
 0x1b1   :  { %v7629_v20 = vadd.f32 %v939_v19, %v226_v32  ;;  %v941_v21 = vpop.f32.mrb[14].mxu0 }
 0x1b2   :  { %v9154_v22 = vmax.f32 %v7626_v11, %v7628_v18  ;;  %v7630_v23 = vadd.f32 %v941_v21, %v228_v33  ;;  %v943_v24 = vpop.f32.mrb[15].mxu0  ;;  %v9267_v21 = vld [vmem:[%s10666_s2] ss:$0 sm:$0xff] }
 0x1b3   :  { %v1015_v25 = vmax.f32 %v9145_v14, %v7629_v20  ;;  %v7631_v26 = vadd.f32 %v943_v24, %v230_v34 }
 0x1b4   :  { %v9157_v27 = vmax.f32 %v7628_v18, %v7630_v23  ;;  %1082 = vrot.lane.b32.xlu0 %v9154_v22, %s8612_s0 }
 0x1b5   :  { %v1017_v28 = vmax.f32 %v7629_v20, %v7631_v26  ;;  %1084 = vrot.lane.b32.xlu1 %v1015_v25, %s8612_s0  ;;  %v7956_v25 = vld [vmem:[%s10667_s3 + $0xc0] ss:$8 sps:$4 sm:$0xff]  }
 0x1b7   :  { %v947_v29 = vpop.f32.mrb[16].mxu0 }
 0x1b8   :  { %v7632_v30 = vadd.f32 %v947_v29, %v9085_v35  ;;  %v949_v31 = vpop.f32.mrb[17].mxu0 }
 0x1b9   :  { %v7633_v32 = vadd.f32 %v949_v31, %v9087_v36  ;;  %v951_v47 = vpop.f32.mrb[18].mxu0 }
 0x1ba   :  { %v9164_v33 = vmax.f32 %v7630_v23, %v7632_v30  ;;  %v7634_v49 = vadd.f32 %v951_v47, %v9089_v37  ;;  %v953_v34 = vpop.f32.mrb[19].mxu0 }
 0x1bb   :  { %v1019_v51 = vmax.f32 %v7631_v26, %v7633_v32  ;;  %v7635_v53 = vadd.f32 %v953_v34, %v9091_v38  ;;  %v7958_v26 = vld [vmem:[%s10667_s3 + $0xc4] ss:$8 sps:$4 sm:$0xff]  }
 0x1bc   :  { %v9168_v56 = vmax.f32 %v7632_v30, %v7634_v49  ;;  %1090 = vrot.lane.b32.xlu0 %v9164_v33, %s8612_s0  ;;  %v7961_v30 = vld [vmem:[%s10667_s3 + $0xd0] ss:$8 sps:$4 sm:$0x3f]  }
 0x1bd   :  { %v1021_v57 = vmax.f32 %v7633_v32, %v7635_v53  ;;  %1092 = vrot.lane.b32.xlu1 %v1019_v51, %s8612_s0  ;;  %v1418_v47 = vsel %vm1416_vm3, %v7961_v30, 0 }
 0x1bf   :  { %v957_v35 = vpop.f32.mrb[20].mxu0 }
 0x1c0   :  { %v7636_v36 = vadd.f32 %v957_v35, %v9093_v39  ;;  %v959_v58 = vpop.f32.mrb[21].mxu0 }
 0x1c1   :  { %v7637_v60 = vadd.f32 %v959_v58, %v9095_v40  ;;  %v961_v61 = vpop.f32.mrb[22].mxu0 }
 0x1c2   :  { %v9175_v37 = vmax.f32 %v7634_v49, %v7636_v36  ;;  %v7638_v62 = vadd.f32 %v961_v61, %v9097_v41  ;;  %v963_v38 = vpop.f32.mrb[23].mxu0 }
 0x1c3   :  { %v1023_v0 = vmax.f32 %v7635_v53, %v7637_v60  ;;  %v7639_v5 = vadd.f32 %v963_v38, %v9099_v42 }
 0x1c4   :  { %v9179_v6 = vmax.f32 %v7636_v36, %v7638_v62  ;;  %1098 = vrot.lane.b32.xlu0 %v9175_v37, %s8612_s0 }
 0x1c5   :  { %v1025_v7 = vmax.f32 %v7637_v60, %v7639_v5  ;;  %1100 = vrot.lane.b32.xlu1 %v1023_v0, %s8612_s0 }
 0x1c7   :  { %v967_v39 = vpop.f32.mrb[24].mxu0 }
 0x1c8   :  { %v7640_v40 = vadd.f32 %v967_v39, %v9101_v43  ;;  %v969_v9 = vpop.f32.mrb[25].mxu0 }
 0x1c9   :  { %v9186_v11 = vadd.f32 %v969_v9, %v9103_v44  ;;  %v971_v41 = vpop.f32.mrb[26].mxu0  ;;  %v9204_v44 = vmax.f32 %v9109_v48, %v9113_v52  ;;  %v7944_v52 = vld [vmem:[%s10667_s3 + $0x80] ss:$8 sps:$4 sm:$0xff]  }
 0x1ca   :  { %v9188_v12 = vmax.f32 %v7638_v62, %v7640_v40  ;;  %v7642_v42 = vadd.f32 %v971_v41, %v9105_v45  ;;  %v973_v13 = vpop.f32.mrb[27].mxu0  ;;  %v7941_v45 = vld [vmem:[%s10667_s3 + $0x70] ss:$8 sps:$4 sm:$0xff]  }
 0x1cb   :  { %v1027_v17 = vmax.f32 %v7639_v5, %v9186_v11  ;;  %v9193_v18 = vadd.f32 %v973_v13, %v9107_v46  ;;  %v7943_v46 = vld [vmem:[%s10667_s3 + $0x74] ss:$8 sps:$4 sm:$0xff]  }
 0x1cc   :  { %v9195_v19 = vmax.f32 %v7640_v40, %v7642_v42  ;;  %1106 = vrot.lane.b32.xlu0 %v9188_v12, %s8612_s0  ;;  %1423 = vmatprep.subr.bf16.mxu1 %v7943_v46 }
 0x1cd   :  { %v1029_v43 = vmax.f32 %v9186_v11, %v9193_v18  ;;  %1108 = vrot.lane.b32.xlu1 %v1027_v17, %s8612_s0  ;;  %1424 = vmatpush1.bf16.msra.mxu1 %v7941_v45 }
 0x1ce   :  { %1425 = vmatprep.subr.bf16.mxu1 %v7946_v50 }
 0x1d0   :  { %1062 = vrot.lane.b32.xlu0 %v9204_v44, %s8612_s0 }
 0x1d1   :  { %1064 = vrot.lane.b32.xlu1 %v1005_v55, %s8612_s0  ;;  %1426 = vmatpush1.bf16.msra.mxu1 %v7944_v52  ;;  %v7947_v55 = vld [vmem:[%s10667_s3 + $0x90] ss:$8 sps:$4 sm:$0xff]  }
 0x1d2   :  { %1427 = vmatprep.subr.bf16.mxu1 %v7949_v54 }
 0x1d4   :  { %1070 = vrot.lane.b32.xlu0 %v9132_v3, %s8612_s0 }
 0x1d5   :  { %1072 = vrot.lane.b32.xlu1 %v1009_v4, %s8612_s0  ;;  %1428 = vmatpush1.bf16.msra.mxu1 %v7947_v55  ;;  %v7950_v4 = vld [vmem:[%s10667_s3 + $0xa0] ss:$8 sps:$4 sm:$0xff]  }
 0x1d6   :  { %1429 = vmatprep.subr.bf16.mxu1 %v7952_v59 }
 0x1d8   :  { %1078 = vrot.lane.b32.xlu0 %v9147_v15, %s8612_s0 }
 0x1d9   :  { %1080 = vrot.lane.b32.xlu1 %v1013_v16, %s8612_s0  ;;  %1430 = vmatpush1.bf16.msra.mxu1 %v7950_v4  ;;  %v7953_v16 = vld [vmem:[%s10667_s3 + $0xb0] ss:$8 sps:$4 sm:$0xff]  }
 0x1da   :  { %1431 = vmatprep.subr.bf16.mxu1 %v7955_v8 }
 0x1dc   :  { %1086 = vrot.lane.b32.xlu0 %v9157_v27, %s8612_s0 }
 0x1dd   :  { %1088 = vrot.lane.b32.xlu1 %v1017_v28, %s8612_s0  ;;  %1432 = vmatpush1.bf16.msra.mxu1 %v7953_v16 }
 0x1de   :  { %1433 = vmatprep.subr.bf16.mxu1 %v7958_v26 }
 0x1e0   :  { %1094 = vrot.lane.b32.xlu0 %v9168_v56, %s8612_s0 }
 0x1e1   :  { %1096 = vrot.lane.b32.xlu1 %v1021_v57, %s8612_s0  ;;  %1434 = vmatpush1.bf16.msra.mxu1 %v7956_v25 }
 0x1e4   :  { %1102 = vrot.lane.b32.xlu0 %v9179_v6, %s8612_s0 }
 0x1e5   :  { %1104 = vrot.lane.b32.xlu1 %v1025_v7, %s8612_s0 }
 0x20c   :  { %v1059_v2 = vpop.permute.xlu0 %1058 }
 0x210   :  { %v1061_v14 = vpop.permute.xlu0 %1060 }
 0x211   :  { %v1115_v20 = vsel %vm1114_vm2, %v1059_v2, %v1061_v14 }
 0x212   :  { %v1143_v23 = vmax.f32 %v9109_v48, %v1115_v20  ;;  %v7959_v48 = vld [vmem:[%s10667_s3 + $0xd4] ss:$8 sps:$4 sm:$0x3f]  }
 0x213   :  { %6746 = vmatprep.subr.msk.bf16.mxu1 %vm1416_vm3, %v7959_v48 }
 0x214   :  { %v1164_v24 = vadd.f32 %v9267_v21, %v1143_v23  ;;  %1436 = vmatpush1.bf16.msra.mxu1 %v1418_v47 }
 0x216   :  { %v1067_v28 = vpop.permute.xlu1 %1066  ;;  %v1178_v29 = vmax.f32 %v1164_v24, 0.0 }
 0x218   :  { %1226 = vrot.lane.b32.xlu0 %v1178_v29, %s8613_s22 }
 0x21a   :  { %v1069_v31 = vpop.permute.xlu1 %1068 }
 0x21b   :  { %v1117_v32 = vsel %vm1114_vm2, %v1067_v28, %v1069_v31 }
 0x21c   :  { %v1145_v49 = vmax.f32 %v9126_v63, %v1117_v32 }
 0x21e   :  { %v1075_v34 = vpop.permute.xlu0 %1074  ;;  %v1166_v51 = vadd.f32 %v9267_v21, %v1145_v49 }
 0x21f   :  { %v1077_v53 = vpop.permute.xlu1 %1076 }
 0x220   :  { %v1119_v57 = vsel %vm1114_vm2, %v1075_v34, %v1077_v53  ;;  %v1180_v35 = vmax.f32 %v1166_v51, 0.0 }
 0x221   :  { %v1147_v36 = vmax.f32 %v9141_v10, %v1119_v57  ;;  %v7964_v10 = vld [vmem:[%s10667_s3 + $0x4] ss:$8 sps:$4 sm:$0xff]  }
 0x222   :  { %1230 = vrot.lane.b32.xlu1 %v1180_v35, %s8613_s22  ;;  %1580 = vmatprep.subr.bf16.mxu1 %v7964_v10 }
 0x223   :  { %v1168_v58 = vadd.f32 %v9267_v21, %v1147_v36 }
 0x225   :  { %v1182_v60 = vmax.f32 %v1168_v58, 0.0 }
 0x226   :  { %v1083_v61 = vpop.permute.xlu0 %1082 }
 0x227   :  { %v1085_v62 = vpop.permute.xlu1 %1084  ;;  %1234 = vrot.lane.b32.xlu0 %v1182_v60, %s8613_s22 }
 0x228   :  { %v1121_v63 = vsel %vm1114_vm2, %v1083_v61, %v1085_v62 }
 0x229   :  { %v1149_v38 = vmax.f32 %v9154_v22, %v1121_v63 }
 0x22b   :  { %v1170_v0 = vadd.f32 %v9267_v21, %v1149_v38 }
 0x22d   :  { %v1184_v5 = vmax.f32 %v1170_v0, 0.0 }
 0x22e   :  { %v1091_v7 = vpop.permute.xlu0 %1090 }
 0x22f   :  { %v1093_v39 = vpop.permute.xlu1 %1092  ;;  %1238 = vrot.lane.b32.xlu1 %v1184_v5, %s8613_s22  ;;  %v7962_v5 = vld [vmem:[%s10667_s3] ss:$8 sps:$4 sm:$0xff]  }
 0x230   :  { %v1123_v40 = vsel %vm1114_vm2, %v1091_v7, %v1093_v39  ;;  %v7967_v7 = vld [vmem:[%s10667_s3 + $0x14] ss:$8 sps:$4 sm:$0xff]   ;;  %v7965_v39 = vld [vmem:[%s10667_s3 + $0x10] ss:$8 sps:$4 sm:$0xff]  }
 0x231   :  { %v1151_v9 = vmax.f32 %v9164_v33, %v1123_v40 }
 0x233   :  { %v1172_v41 = vadd.f32 %v9267_v21, %v1151_v9 }
 0x235   :  { %v1186_v42 = vmax.f32 %v1172_v41, 0.0  ;;  %v7970_v41 = vld [vmem:[%s10667_s3 + $0x24] ss:$8 sps:$4 sm:$0xff]  }
 0x236   :  { %v1099_v22 = vpop.permute.xlu0 %1098 }
 0x237   :  { %v1101_v13 = vpop.permute.xlu1 %1100  ;;  %1242 = vrot.lane.b32.xlu0 %v1186_v42, %s8613_s22 }
 0x238   :  { %v1125_v17 = vsel %vm1114_vm2, %v1099_v22, %v1101_v13  ;;  %v7968_v22 = vld [vmem:[%s10667_s3 + $0x20] ss:$8 sps:$4 sm:$0xff]   ;;  %v7973_v13 = vld [vmem:[%s10667_s3 + $0x34] ss:$8 sps:$4 sm:$0xff]  }
 0x239   :  { %v1153_v45 = vmax.f32 %v9175_v37, %v1125_v17 }
 0x23b   :  { %1110 = vrot.lane.b32.xlu0 %v9195_v19, %s8612_s0  ;;  %v1174_v46 = vadd.f32 %v9267_v21, %v1153_v45 }
 0x23d   :  { %v1188_v50 = vmax.f32 %v1174_v46, 0.0  ;;  %v7971_v46 = vld [vmem:[%s10667_s3 + $0x30] ss:$8 sps:$4 sm:$0xff]  }
 0x23e   :  { %v1107_v52 = vpop.permute.xlu0 %1106 }
 0x23f   :  { %1246 = vrot.lane.b32.xlu1 %v1188_v50, %s8613_s22  ;;  %v1109_v33 = vpop.permute.xlu1 %1108 }
 0x240   :  { %v1127_v54 = vsel %vm1114_vm2, %v1107_v52, %v1109_v33  ;;  %v7976_v52 = vld [vmem:[%s10667_s3 + $0x44] ss:$8 sps:$4 sm:$0xff]   ;;  %v7974_v33 = vld [vmem:[%s10667_s3 + $0x40] ss:$8 sps:$4 sm:$0xff]  }
 0x241   :  { %v1155_v55 = vmax.f32 %v9188_v12, %v1127_v54  ;;  %v7979_v54 = vld [vmem:[%s10667_s3 + $0x54] ss:$8 sps:$4 sm:$0xff]  }
 0x242   :  { %v1063_v59 = vpop.permute.xlu0 %1062 }
 0x243   :  { %v1065_v2 = vpop.permute.xlu1 %1064  ;;  %1112 = vrot.lane.b32.xlu1 %v1029_v43, %s8612_s0  ;;  %v1176_v37 = vadd.f32 %v9267_v21, %v1155_v55 }
 0x244   :  { %v1116_v4 = vsel %vm1114_vm2, %v1063_v59, %v1065_v2  ;;  %v7977_v2 = vld [vmem:[%s10667_s3 + $0x50] ss:$8 sps:$4 sm:$0xff]  }
 0x245   :  { %v1144_v8 = vmax.f32 %v9204_v44, %v1116_v4  ;;  %v1190_v14 = vmax.f32 %v1176_v37, 0.0  ;;  %v7980_v37 = vld [vmem:[%s10667_s3 + $0x64] ss:$8 sps:$4 sm:$0x3f]  }
 0x246   :  { %v1071_v16 = vpop.permute.xlu0 %1070  ;;  %v7982_v4 = vld [vmem:[%s10667_s3 + $0x60] ss:$8 sps:$4 sm:$0x3f]  }
 0x247   :  { %v1073_v20 = vpop.permute.xlu1 %1072  ;;  %1250 = vrot.lane.b32.xlu0 %v1190_v14, %s8613_s22  ;;  %v1165_v12 = vadd.f32 %v9267_v21, %v1144_v8 }
 0x248   :  { %v1118_v23 = vsel %vm1114_vm2, %v1071_v16, %v1073_v20 }
 0x249   :  { %v1146_v24 = vmax.f32 %v9132_v3, %v1118_v23  ;;  %v1179_v25 = vmax.f32 %v1165_v12, 0.0  ;;  %v1575_v12 = vsel %vm1416_vm3, %v7982_v4, 0  ;;  %v7985_v23 = vld [vmem:[%s10667_s3 + $0xe4] ss:$8 sps:$4 sm:$0xff]   ;;  %v8016_v4 = vld [vmem:[%s10667_s3 + $0x190] ss:$8 sps:$4 sm:$0xff]  }
 0x24a   :  { %v1079_v11 = vpop.permute.xlu0 %1078 }
 0x24b   :  { %v1081_v18 = vpop.permute.xlu1 %1080  ;;  %1228 = vrot.lane.b32.xlu1 %v1179_v25, %s8613_s22  ;;  %v1167_v43 = vadd.f32 %v9267_v21, %v1146_v24 }
 0x24c   :  { %v1120_v44 = vsel %vm1114_vm2, %v1079_v11, %v1081_v18 }
 0x24d   :  { %v1148_v26 = vmax.f32 %v9147_v15, %v1120_v44  ;;  %v1181_v28 = vmax.f32 %v1167_v43, 0.0 }
 0x24e   :  { %v1087_v29 = vpop.permute.xlu0 %1086 }
 0x24f   :  { %v1089_v48 = vpop.permute.xlu1 %1088  ;;  %1232 = vrot.lane.b32.xlu0 %v1181_v28, %s8613_s22  ;;  %v1169_v30 = vadd.f32 %v9267_v21, %v1148_v26 }
 0x250   :  { %v1122_v3 = vsel %vm1114_vm2, %v1087_v29, %v1089_v48 }
 0x251   :  { %v1150_v31 = vmax.f32 %v9157_v27, %v1122_v3  ;;  %v1183_v32 = vmax.f32 %v1169_v30, 0.0  ;;  %v1285_v30 = vld [vmem:[#allocation2 + $0x8] sm:$0xff] }
 0x252   :  { %v1095_v47 = vpop.permute.xlu0 %1094 }
 0x253   :  { %v1097_v49 = vpop.permute.xlu1 %1096  ;;  %1236 = vrot.lane.b32.xlu1 %v1183_v32, %s8613_s22  ;;  %v1171_v34 = vadd.f32 %v9267_v21, %v1150_v31  ;;  %v7983_v32 = vld [vmem:[%s10667_s3 + $0xe0] ss:$8 sps:$4 sm:$0xff]  }
 0x254   :  { %v1124_v15 = vsel %vm1114_vm2, %v1095_v47, %v1097_v49  ;;  %v7988_v49 = vld [vmem:[%s10667_s3 + $0xf4] ss:$8 sps:$4 sm:$0xff]  }
 0x255   :  { %v1152_v51 = vmax.f32 %v9168_v56, %v1124_v15  ;;  %v1185_v53 = vmax.f32 %v1171_v34, 0.0  ;;  %v7986_v15 = vld [vmem:[%s10667_s3 + $0xf0] ss:$8 sps:$4 sm:$0xff]  }
 0x256   :  { %v1103_v57 = vpop.permute.xlu0 %1102 }
 0x257   :  { %v1105_v35 = vpop.permute.xlu1 %1104  ;;  %1240 = vrot.lane.b32.xlu0 %v1185_v53, %s8613_s22  ;;  %v1173_v36 = vadd.f32 %v9267_v21, %v1152_v51  ;;  %v7991_v51 = vld [vmem:[%s10667_s3 + $0x104] ss:$8 sps:$4 sm:$0xff]  }
 0x258   :  { %v1126_v27 = vsel %vm1114_vm2, %v1103_v57, %v1105_v35 }
 0x259   :  { %v1154_v58 = vmax.f32 %v9179_v6, %v1126_v27  ;;  %v1187_v60 = vmax.f32 %v1173_v36, 0.0  ;;  %v7989_v36 = vld [vmem:[%s10667_s3 + $0x100] ss:$8 sps:$4 sm:$0xff]  }
 0x25b   :  { %1244 = vrot.lane.b32.xlu1 %v1187_v60, %s8613_s22  ;;  %v1175_v61 = vadd.f32 %v9267_v21, %v1154_v58  ;;  %v7994_v58 = vld [vmem:[%s10667_s3 + $0x114] ss:$8 sps:$4 sm:$0xff]   ;;  %v7992_v60 = vld [vmem:[%s10667_s3 + $0x110] ss:$8 sps:$4 sm:$0xff]  }
 0x25d   :  { %v1189_v62 = vmax.f32 %v1175_v61, 0.0  ;;  %v7997_v61 = vld [vmem:[%s10667_s3 + $0x124] ss:$8 sps:$4 sm:$0xff]  }
 0x25f   :  { %1248 = vrot.lane.b32.xlu0 %v1189_v62, %s8613_s22 }
 0x28a   :  { %v1227_v56 = vpop.permute.xlu0 %1226 }
 0x28b   :  { %1270 = vst.msk [vmem:[#allocation2 + $0x10] sm:$0xff] %vm1269_vm4, %v1227_v56 }
 0x292   :  { %v1310_v0 = vld [vmem:[#allocation2 + $0x10] sm:$0xff] }
 0x294   :  { %v1231_v63 = vpop.permute.xlu1 %1230 }
 0x295   :  { %1272 = vst.msk [vmem:[#allocation2 + $0x20] sm:$0xff] %vm1269_vm4, %v1231_v63  ;;  %v7995_v63 = vld [vmem:[%s10667_s3 + $0x120] ss:$8 sps:$4 sm:$0xff]  }
 0x299   :  { %v1235_v38 = vpop.permute.xlu0 %1234 }
 0x29a   :  { %1274 = vst.msk [vmem:[#allocation2 + $0x30] sm:$0xff] %vm1269_vm4, %v1235_v38 }
 0x29c   :  { %v9346_v6 = vld [vmem:[#allocation2 + $0x20] sm:$0xff] }
 0x29d   :  { %v1317_v10 = vpack.c.bf16 %v9346_v6, %v1310_v0  ;;  %v8000_v0 = vld [vmem:[%s10667_s3 + $0x134] ss:$8 sps:$4 sm:$0xff]  }
 0x29f   :  { %6747 = vmatmul.mubr.msk.bf16.vlgmr.msra.gmra.mrb[28].mxu1 %vm1192_vm1, %v1317_v10  ;;  %v8001_v10 = vld [vmem:[%s10667_s3 + $0x144] ss:$8 sps:$4 sm:$0x3f]  }
 0x2a0   :  { %1465 = vmatprep.mubr.bf16.mxu1 %v8611_v1  ;;  %1581 = vmatpush1.bf16.msra.mxu1 %v7962_v5  ;;  %v7998_v5 = vld [vmem:[%s10667_s3 + $0x130] ss:$8 sps:$4 sm:$0xff]  }
 0x2a1   :  { %v1239_v40 = vpop.permute.xlu1 %1238  ;;  %v9360_v9 = vld [vmem:[#allocation2 + $0x30] sm:$0xff]  ;;  %1582 = vmatprep.subr.bf16.mxu1 %v7967_v7  ;;  %v8003_v7 = vld [vmem:[%s10667_s3 + $0x140] ss:$8 sps:$4 sm:$0x3f]  }
 0x2a2   :  { %1276 = vst.msk [vmem:[#allocation2 + $0x40] sm:$0xff] %vm1269_vm4, %v1239_v40  ;;  %v1857_v42 = vpack.c.bf16 %v9360_v9, %v9346_v6  ;;  %v8036_v6 = vld [vmem:[%s10667_s3 + $0x1f4] ss:$8 sps:$4 sm:$0xff]  }
 0x2a4   :  { %1583 = vmatpush1.bf16.msra.mxu1 %v7965_v39 }
 0x2a5   :  { %1584 = vmatprep.subr.bf16.mxu1 %v7970_v41  ;;  %v1759_v41 = vsel %vm1416_vm3, %v8003_v7, 0 }
 0x2a8   :  { %1585 = vmatpush1.bf16.msra.mxu1 %v7968_v22  ;;  %v8006_v22 = vld [vmem:[%s10667_s3 + $0x154] ss:$8 sps:$4 sm:$0xff]  }
 0x2a9   :  { %v1243_v17 = vpop.permute.xlu0 %1242  ;;  %v9374_v45 = vld [vmem:[#allocation2 + $0x40] sm:$0xff]  ;;  %1586 = vmatprep.subr.bf16.mxu1 %v7973_v13  ;;  %v8004_v13 = vld [vmem:[%s10667_s3 + $0x150] ss:$8 sps:$4 sm:$0xff]  }
 0x2aa   :  { %1278 = vst.msk [vmem:[#allocation2 + $0x50] sm:$0xff] %vm1269_vm4, %v1243_v17  ;;  %v1318_v50 = vpack.c.bf16 %v9374_v45, %v9360_v9  ;;  %v8034_v9 = vld [vmem:[%s10667_s3 + $0x1f0] ss:$8 sps:$4 sm:$0xff]  }
 0x2ac   :  { %6748 = vmatmul.mubr.msk.bf16.gmra.mrb[32].mxu1 %vm1192_vm1, %v1318_v50  ;;  %v8007_v50 = vld [vmem:[%s10667_s3 + $0x160] ss:$8 sps:$4 sm:$0xff]  }
 0x2ad   :  { %1475 = vmatprep.mubr.bf16.mxu1 %v8611_v1  ;;  %1587 = vmatpush1.bf16.msra.mxu1 %v7971_v46  ;;  %v1111_v14 = vpop.permute.xlu0 %1110  ;;  %v8009_v46 = vld [vmem:[%s10667_s3 + $0x164] ss:$8 sps:$4 sm:$0xff]  }
 0x2ae   :  { %1588 = vmatprep.subr.bf16.mxu1 %v7976_v52  ;;  %v8012_v52 = vld [vmem:[%s10667_s3 + $0x174] ss:$8 sps:$4 sm:$0xff]  }
 0x2b1   :  { %v1247_v55 = vpop.permute.xlu1 %1246  ;;  %v9393_v59 = vld [vmem:[#allocation2 + $0x50] sm:$0xff]  ;;  %1589 = vmatpush1.bf16.msra.mxu1 %v7974_v33 }
 0x2b2   :  { %1280 = vst.msk [vmem:[#allocation2 + $0x60] sm:$0xff] %vm1269_vm4, %v1247_v55  ;;  %1590 = vmatprep.subr.bf16.mxu1 %v7979_v54  ;;  %v1858_v8 = vpack.c.bf16 %v9393_v59, %v9374_v45  ;;  %v8010_v33 = vld [vmem:[%s10667_s3 + $0x170] ss:$8 sps:$4 sm:$0xff]   ;;  %v8015_v55 = vld [vmem:[%s10667_s3 + $0x184] ss:$8 sps:$4 sm:$0xff]  }
 0x2b3   :  { %v8042_v45 = vld [vmem:[%s10667_s3 + $0x214] ss:$8 sps:$4 sm:$0xff]  }
 0x2b5   :  { %v1113_v16 = vpop.permute.xlu1 %1112  ;;  %1591 = vmatpush1.bf16.msra.mxu1 %v7977_v2  ;;  %v8013_v2 = vld [vmem:[%s10667_s3 + $0x180] ss:$8 sps:$4 sm:$0xff]  }
 0x2b6   :  { %v1128_v20 = vsel %vm1114_vm2, %v1111_v14, %v1113_v16  ;;  %6765 = vmatprep.subr.msk.bf16.mxu1 %vm1416_vm3, %v7980_v37  ;;  %v8018_v37 = vld [vmem:[%s10667_s3 + $0x194] ss:$8 sps:$4 sm:$0xff]   ;;  %v8021_v16 = vld [vmem:[%s10667_s3 + $0x1a4] ss:$8 sps:$4 sm:$0xff]  }
 0x2b7   :  { %v1156_v24 = vmax.f32 %v9195_v19, %v1128_v20  ;;  %v8019_v20 = vld [vmem:[%s10667_s3 + $0x1a0] ss:$8 sps:$4 sm:$0xff]  }
 0x2b9   :  { %v1251_v25 = vpop.permute.xlu0 %1250  ;;  %v9414_v11 = vld [vmem:[#allocation2 + $0x60] sm:$0xff]  ;;  %v1177_v18 = vadd.f32 %v9267_v21, %v1156_v24  ;;  %1593 = vmatpush1.bf16.msra.mxu1 %v1575_v12  ;;  %v8022_v12 = vld [vmem:[%s10667_s3 + $0x1b4] ss:$8 sps:$4 sm:$0x3f]  }
 0x2ba   :  { %1282 = vst.msk [vmem:[#allocation2 + $0x70] sm:$0xff] %vm1269_vm4, %v1251_v25  ;;  %v1319_v43 = vpack.c.bf16 %v9414_v11, %v9393_v59  ;;  %1764 = vmatprep.subr.bf16.mxu1 %v7985_v23  ;;  %v8024_v23 = vld [vmem:[%s10667_s3 + $0x1b0] ss:$8 sps:$4 sm:$0x3f]   ;;  %v8027_v25 = vld [vmem:[%s10667_s3 + $0x1c4] ss:$8 sps:$4 sm:$0xff]  }
 0x2bb   :  { %v1191_v44 = vmax.f32 %v1177_v18, 0.0  ;;  %v1957_v24 = vsel %vm1416_vm3, %v8024_v23, 0  ;;  %v8040_v59 = vld [vmem:[%s10667_s3 + $0x210] ss:$8 sps:$4 sm:$0xff]   ;;  %v8058_v23 = vld [vmem:[%s10669_s5 + $0x168] ss:$12 sps:$4 sm:$0xff]  }
 0x2bc   :  { %6749 = vmatmul.mubr.msk.bf16.gmra.mrb[36].mxu1 %vm1192_vm1, %v1319_v43 }
 0x2bd   :  { %1252 = vrot.lane.b32.xlu1 %v1191_v44, %s8613_s22  ;;  %v1229_v26 = vpop.permute.xlu1 %1228  ;;  %1485 = vmatprep.mubr.bf16.mxu1 %v8611_v1 }
 0x2be   :  { %1271 = vst.msk [vmem:[#allocation2 + $0x18] sm:$0xff] %vm1269_vm4, %v1229_v26  ;;  %v8025_v26 = vld [vmem:[%s10667_s3 + $0x1c0] ss:$8 sps:$4 sm:$0xff]  }
 0x2c1   :  { %v1233_v19 = vpop.permute.xlu0 %1232  ;;  %v9424_v28 = vld [vmem:[#allocation2 + $0x70] sm:$0xff] }
 0x2c2   :  { %1273 = vst.msk [vmem:[#allocation2 + $0x28] sm:$0xff] %vm1269_vm4, %v1233_v19  ;;  %v1320_v21 = vpack.c.bf16 %v9424_v28, %v9424_v28  ;;  %v1859_v29 = vpack.c.bf16 %v9424_v28, %v9414_v11  ;;  %v8030_v19 = vld [vmem:[%s10667_s3 + $0x1d4] ss:$8 sps:$4 sm:$0xff]  }
 0x2c4   :  { %6750 = vmatmul.mubr.msk.bf16.gmra.mrb[40].mxu1 %vm1192_vm1, %v1320_v21  ;;  %v8028_v21 = vld [vmem:[%s10667_s3 + $0x1d0] ss:$8 sps:$4 sm:$0xff]  }
 0x2c5   :  { %v1237_v48 = vpop.permute.xlu1 %1236  ;;  %1612 = vmatprep.mubr.bf16.mxu1 %v8611_v1  ;;  %v1286_v3 = vld [vmem:[#allocation2 + $0x18] sm:$0xff] }
 0x2c6   :  { %1275 = vst.msk [vmem:[#allocation2 + $0x38] sm:$0xff] %vm1269_vm4, %v1237_v48  ;;  %v1292_v47 = vpack.c.bf16 %v1286_v3, %v1285_v30  ;;  %v8033_v48 = vld [vmem:[%s10667_s3 + $0x1e4] ss:$8 sps:$4 sm:$0xff]   ;;  %v8031_v30 = vld [vmem:[%s10667_s3 + $0x1e0] ss:$8 sps:$4 sm:$0xff]  }
 0x2c9   :  { %v1241_v31 = vpop.permute.xlu0 %1240  ;;  %v1287_v35 = vld [vmem:[#allocation2 + $0x28] sm:$0xff] }
 0x2ca   :  { %1277 = vst.msk [vmem:[#allocation2 + $0x48] sm:$0xff] %vm1269_vm4, %v1241_v31  ;;  %v1659_v17 = vpack.c.bf16 %v1287_v35, %v1286_v3  ;;  %v8037_v3 = vld [vmem:[%s10667_s3 + $0x200] ss:$8 sps:$4 sm:$0xff]   ;;  %v8043_v31 = vld [vmem:[%s10667_s3 + $0x224] ss:$8 sps:$4 sm:$0x3f]  }
 0x2cc   :  { %6766 = vmatmul.mubr.msk.bf16.vlgmr.msra.gmra.mrb[28].mxu1 %vm1192_vm1, %v1292_v47  ;;  %v2054_v47 = vld [vmem:[#allocation2 + $0x88] sm:$0xff] }
 0x2cd   :  { %v1245_v34 = vpop.permute.xlu1 %1244  ;;  %1765 = vmatpush1.bf16.msra.mxu1 %v7983_v32  ;;  %1622 = vmatprep.mubr.bf16.mxu1 %v8611_v1  ;;  %v1288_v53 = vld [vmem:[#allocation2 + $0x38] sm:$0xff]  ;;  %v8045_v32 = vld [vmem:[%s10667_s3 + $0x220] ss:$8 sps:$4 sm:$0x3f]  }
 0x2ce   :  { %1279 = vst.msk [vmem:[#allocation2 + $0x58] sm:$0xff] %vm1269_vm4, %v1245_v34  ;;  %1766 = vmatprep.subr.bf16.mxu1 %v7988_v49  ;;  %v9454_v27 = vpack.c.bf16 %v1288_v53, %v1287_v35  ;;  %v2155_v28 = vsel %vm1416_vm3, %v8045_v32, 0  ;;  %v2058_v49 = vpack.c.bf16 %v2054_v47, %v2054_v47  ;;  %v8078_v32 = vld [vmem:[%s10669_s5 + $0x1fc] ss:$12 sps:$4 sm:$0xff]  }
 0x2d1   :  { %v1249_v57 = vpop.permute.xlu0 %1248  ;;  %1767 = vmatpush1.bf16.msra.mxu1 %v7986_v15  ;;  %v1289_v56 = vld [vmem:[#allocation2 + $0x48] sm:$0xff] }
 0x2d2   :  { %1281 = vst.msk [vmem:[#allocation2 + $0x68] sm:$0xff] %vm1269_vm4, %v1249_v57  ;;  %1768 = vmatprep.subr.bf16.mxu1 %v7991_v51  ;;  %v1660_v54 = vpack.c.bf16 %v1289_v56, %v1288_v53 }
 0x2d4   :  { %6767 = vmatmul.mubr.msk.bf16.gmra.mrb[32].mxu1 %vm1192_vm1, %v9454_v27 }
 0x2d5   :  { %1769 = vmatpush1.bf16.msra.mxu1 %v7989_v36  ;;  %1632 = vmatprep.mubr.bf16.mxu1 %v8611_v1  ;;  %v1290_v62 = vld [vmem:[#allocation2 + $0x58] sm:$0xff] }
 0x2d6   :  { %1770 = vmatprep.subr.bf16.mxu1 %v7994_v58  ;;  %v9471_v38 = vpack.c.bf16 %v1290_v62, %v1289_v56 }
 0x2d9   :  { %1771 = vmatpush1.bf16.msra.mxu1 %v7992_v60  ;;  %v9488_v39 = vld [vmem:[#allocation2 + $0x68] sm:$0xff] }
 0x2da   :  { %1772 = vmatprep.subr.bf16.mxu1 %v7997_v61  ;;  %v1295_v40 = vpack.c.bf16 %v9488_v39, %v9488_v39  ;;  %v1661_v14 = vpack.c.bf16 %v9488_v39, %v1290_v62 }
 0x2dc   :  { %6768 = vmatmul.mubr.msk.bf16.gmra.mrb[36].mxu1 %vm1192_vm1, %v9471_v38 }
 0x2dd   :  { %1773 = vmatpush1.bf16.msra.mxu1 %v7995_v63  ;;  %1642 = vmatprep.mubr.bf16.mxu1 %v8611_v1 }
 0x2de   :  { %1774 = vmatprep.subr.bf16.mxu1 %v8000_v0 }
 0x2e1   :  { %1775 = vmatpush1.bf16.msra.mxu1 %v7998_v5 }
 0x2e2   :  { %6798 = vmatprep.subr.msk.bf16.mxu1 %vm1416_vm3, %v8001_v10 }
 0x2e4   :  { %6769 = vmatmul.mubr.msk.bf16.gmra.mrb[40].mxu1 %vm1192_vm1, %v1295_v40 }
 0x2e5   :  { %1777 = vmatpush1.bf16.msra.mxu1 %v1759_v41  ;;  %1796 = vmatprep.mubr.bf16.mxu1 %v8611_v1 }
 0x2e6   :  { %1962 = vmatprep.subr.bf16.mxu1 %v8006_v22 }
 0x2ec   :  { %6799 = vmatmul.mubr.msk.bf16.vlgmr.msra.gmra.mrb[28].mxu1 %vm1192_vm1, %v1659_v17 }
 0x2ed   :  { %1806 = vmatprep.mubr.bf16.mxu1 %v8611_v1  ;;  %1963 = vmatpush1.bf16.msra.mxu1 %v8004_v13 }
 0x2ee   :  { %1964 = vmatprep.subr.bf16.mxu1 %v8009_v46 }
 0x2f1   :  { %1965 = vmatpush1.bf16.msra.mxu1 %v8007_v50 }
 0x2f2   :  { %1966 = vmatprep.subr.bf16.mxu1 %v8012_v52 }
 0x2f4   :  { %6800 = vmatmul.mubr.msk.bf16.gmra.mrb[32].mxu1 %vm1192_vm1, %v1660_v54  ;;  %v8048_v54 = vld [vmem:[%s10669_s5 + $0x10c] ss:$12 sps:$4 sm:$0xff]  }
 0x2f5   :  { %1816 = vmatprep.mubr.bf16.mxu1 %v8611_v1  ;;  %1967 = vmatpush1.bf16.msra.mxu1 %v8010_v33  ;;  %v8046_v33 = vld [vmem:[%s10669_s5 + $0x108] ss:$12 sps:$4 sm:$0xff]  }
 0x2f6   :  { %1968 = vmatprep.subr.bf16.mxu1 %v8015_v55  ;;  %v8051_v55 = vld [vmem:[%s10669_s5 + $0x124] ss:$12 sps:$4 sm:$0xff]  }
 0x2f9   :  { %1969 = vmatpush1.bf16.msra.mxu1 %v8013_v2  ;;  %v8049_v2 = vld [vmem:[%s10669_s5 + $0x120] ss:$12 sps:$4 sm:$0xff]  }
 0x2fa   :  { %1970 = vmatprep.subr.bf16.mxu1 %v8018_v37  ;;  %v8054_v37 = vld [vmem:[%s10669_s5 + $0x13c] ss:$12 sps:$4 sm:$0xff]  }
 0x2fc   :  { %6801 = vmatmul.mubr.msk.bf16.gmra.mrb[36].mxu1 %vm1192_vm1, %v1661_v14  ;;  %v8052_v14 = vld [vmem:[%s10669_s5 + $0x138] ss:$12 sps:$4 sm:$0xff]  }
 0x2fd   :  { %1971 = vmatpush1.bf16.msra.mxu1 %v8016_v4  ;;  %1826 = vmatprep.mubr.bf16.mxu1 %v8611_v1  ;;  %v9687_v4 = vld [vmem:[#allocation3] sm:$0xff] }
 0x2fe   :  { %1972 = vmatprep.subr.bf16.mxu1 %v8021_v16  ;;  %2348 = vst.msk [vmem:[#allocation3 + $0x28] sm:$0xff] %vm2343_vm5, %v9687_v4  ;;  %2346 = vst.msk [vmem:[#allocation3 + $0x18] sm:$0xff] %vm2343_vm5, %v9687_v4  ;;  %v8057_v16 = vld [vmem:[%s10669_s5 + $0x154] ss:$12 sps:$4 sm:$0xff]  }
 0x2ff   :  { %2350 = vst.msk [vmem:[#allocation3 + $0x38] sm:$0xff] %vm2343_vm5, %v9687_v4  ;;  %2352 = vst.msk [vmem:[#allocation3 + $0x48] sm:$0xff] %vm2343_vm5, %v9687_v4 }
 0x300   :  { %2354 = vst.msk [vmem:[#allocation3 + $0x58] sm:$0xff] %vm2343_vm5, %v9687_v4  ;;  %2356 = vst.msk [vmem:[#allocation3 + $0x68] sm:$0xff] %vm2343_vm5, %v9687_v4 }
 0x301   :  { %1973 = vmatpush1.bf16.msra.mxu1 %v8019_v20  ;;  %2358 = vst.msk [vmem:[#allocation3 + $0x78] sm:$0xff] %vm2343_vm5, %v9687_v4  ;;  %2360 = vst.msk [vmem:[#allocation3 + $0x88] sm:$0xff] %vm2343_vm5, %v9687_v4  ;;  %v8055_v20 = vld [vmem:[%s10669_s5 + $0x150] ss:$12 sps:$4 sm:$0xff]  }
 0x302   :  { %6831 = vmatprep.subr.msk.bf16.mxu1 %vm1416_vm3, %v8022_v12  ;;  %2362 = vst.msk [vmem:[#allocation3 + $0x98] sm:$0xff] %vm2343_vm5, %v9687_v4  ;;  %v8060_v12 = vld [vmem:[%s10669_s5 + $0x16c] ss:$12 sps:$4 sm:$0xff]  }
 0x305   :  { %1975 = vmatpush1.bf16.msra.mxu1 %v1957_v24  ;;  %v8063_v24 = vld [vmem:[%s10669_s5 + $0x184] ss:$12 sps:$4 sm:$0xff]  }
 0x306   :  { %2160 = vmatprep.subr.bf16.mxu1 %v8027_v25  ;;  %v8061_v25 = vld [vmem:[%s10669_s5 + $0x180] ss:$12 sps:$4 sm:$0xff]  }
 0x32f   :  { %v1253_v18 = vpop.permute.xlu1 %1252 }
 0x330   :  { %1283 = vst.msk [vmem:[#allocation2 + $0x78] sm:$0xff] %vm1269_vm4, %v1253_v18  ;;  %v8066_v18 = vld [vmem:[%s10669_s5 + $0x19c] ss:$12 sps:$4 sm:$0xff]  }
 0x337   :  { %v1658_v43 = vld [vmem:[#allocation2 + $0x78] sm:$0xff] }
 0x338   :  { %v1662_v44 = vpack.c.bf16 %v1658_v43, %v1658_v43 }
 0x33a   :  { %6802 = vmatmul.mubr.msk.bf16.gmra.mrb[40].mxu1 %vm1192_vm1, %v1662_v44  ;;  %v8069_v44 = vld [vmem:[%s10669_s5 + $0x1b4] ss:$12 sps:$4 sm:$0xff]  }
 0x33b   :  { %1994 = vmatprep.mubr.bf16.mxu1 %v8611_v1 }
 0x342   :  { %6832 = vmatmul.mubr.msk.bf16.vlgmr.msra.gmra.mrb[28].mxu1 %vm1192_vm1, %v1857_v42  ;;  %v8039_v42 = vld [vmem:[%s10667_s3 + $0x204] ss:$8 sps:$4 sm:$0xff]  }
 0x343   :  { %2161 = vmatpush1.bf16.msra.mxu1 %v8025_v26  ;;  %2004 = vmatprep.mubr.bf16.mxu1 %v8611_v1  ;;  %v8067_v26 = vld [vmem:[%s10669_s5 + $0x1b0] ss:$12 sps:$4 sm:$0xff]  }
 0x344   :  { %2162 = vmatprep.subr.bf16.mxu1 %v8030_v19  ;;  %v8072_v19 = vld [vmem:[%s10669_s5 + $0x1cc] ss:$12 sps:$4 sm:$0xff]  }
 0x347   :  { %2163 = vmatpush1.bf16.msra.mxu1 %v8028_v21 }
 0x348   :  { %2164 = vmatprep.subr.bf16.mxu1 %v8033_v48 }
 0x34a   :  { %6833 = vmatmul.mubr.msk.bf16.gmra.mrb[32].mxu1 %vm1192_vm1, %v1858_v8  ;;  %v1856_v8 = vld [vmem:[#allocation2 + $0x80] sm:$0xff] }
 0x34b   :  { %2165 = vmatpush1.bf16.msra.mxu1 %v8031_v30  ;;  %2014 = vmatprep.mubr.bf16.mxu1 %v8611_v1  ;;  %v1860_v11 = vpack.c.bf16 %v1856_v8, %v1856_v8  ;;  %v8070_v30 = vld [vmem:[%s10669_s5 + $0x1c8] ss:$12 sps:$4 sm:$0xff]  }
 0x34c   :  { %2166 = vmatprep.subr.bf16.mxu1 %v8036_v6 }
 0x34f   :  { %2167 = vmatpush1.bf16.msra.mxu1 %v8034_v9  ;;  %v9750_v9 = vld [vmem:[%s10668_s4] ss:$0 sm:$0xff] }
 0x350   :  { %2168 = vmatprep.subr.bf16.mxu1 %v8039_v42 }
 0x352   :  { %6834 = vmatmul.mubr.msk.bf16.gmra.mrb[36].mxu1 %vm1192_vm1, %v1859_v29  ;;  %v2057_v29 = vpack.c.bf16 %v1658_v43, %v9488_v39  ;;  %v8064_v43 = vld [vmem:[%s10669_s5 + $0x198] ss:$12 sps:$4 sm:$0xff]  }
 0x353   :  { %2169 = vmatpush1.bf16.msra.mxu1 %v8037_v3  ;;  %2024 = vmatprep.mubr.bf16.mxu1 %v8611_v1 }
 0x354   :  { %2170 = vmatprep.subr.bf16.mxu1 %v8042_v45  ;;  %v8073_v45 = vld [vmem:[%s10669_s5 + $0x1e0] ss:$12 sps:$4 sm:$0xff]  }
 0x357   :  { %2171 = vmatpush1.bf16.msra.mxu1 %v8040_v59  ;;  %v8075_v59 = vld [vmem:[%s10669_s5 + $0x1e4] ss:$12 sps:$4 sm:$0xff]  }
 0x358   :  { %6864 = vmatprep.subr.msk.bf16.mxu1 %vm1416_vm3, %v8043_v31 }
 0x35a   :  { %6835 = vmatmul.mubr.msk.bf16.gmra.mrb[40].mxu1 %vm1192_vm1, %v1860_v11 }
 0x35b   :  { %2173 = vmatpush1.bf16.msra.mxu1 %v2155_v28  ;;  %2192 = vmatprep.mubr.bf16.mxu1 %v8611_v1  ;;  %v8076_v28 = vld [vmem:[%s10669_s5 + $0x1f8] ss:$12 sps:$4 sm:$0xff]  }
 0x35c   :  { %2705 = vmatprep.subr.bf16.mxu1 %v8048_v54 }
 0x362   :  { %6865 = vmatmul.mubr.msk.bf16.vlgmr.msra.gmra.mrb[28].mxu1 %vm1192_vm1, %v9454_v27 }
 0x363   :  { %2202 = vmatprep.mubr.bf16.mxu1 %v8611_v1  ;;  %2706 = vmatpush1.bf16.msra.mxu1 %v8046_v33 }
 0x364   :  { %2707 = vmatprep.subr.bf16.mxu1 %v8051_v55  ;;  %v8079_v55 = vld [vmem:[%s10669_s5 + $0x110] ss:$12 sps:$4 sm:$0xff]  }
 0x367   :  { %2708 = vmatpush1.bf16.msra.mxu1 %v8049_v2 }
 0x368   :  { %2709 = vmatprep.subr.bf16.mxu1 %v8054_v37 }
 0x36a   :  { %6866 = vmatmul.mubr.msk.bf16.gmra.mrb[32].mxu1 %vm1192_vm1, %v9471_v38 }
 0x36b   :  { %2212 = vmatprep.mubr.bf16.mxu1 %v8611_v1  ;;  %2710 = vmatpush1.bf16.msra.mxu1 %v8052_v14  ;;  %v8081_v14 = vld [vmem:[%s10669_s5 + $0x140] ss:$12 sps:$4 sm:$0xff]  }
 0x36c   :  { %2711 = vmatprep.subr.bf16.mxu1 %v8057_v16 }
 0x36f   :  { %2712 = vmatpush1.bf16.msra.mxu1 %v8055_v20 }
 0x370   :  { %2713 = vmatprep.subr.bf16.mxu1 %v8060_v12 }
 0x372   :  { %6867 = vmatmul.mubr.msk.bf16.gmra.mrb[36].mxu1 %vm1192_vm1, %v2057_v29 }
 0x373   :  { %2222 = vmatprep.mubr.bf16.mxu1 %v8611_v1  ;;  %2714 = vmatpush1.bf16.msra.mxu1 %v8058_v23  ;;  %v8082_v23 = vld [vmem:[%s10669_s5 + $0x158] ss:$12 sps:$4 sm:$0xff]  }
 0x374   :  { %2715 = vmatprep.subr.bf16.mxu1 %v8063_v24 }
 0x377   :  { %2716 = vmatpush1.bf16.msra.mxu1 %v8061_v25 }
 0x378   :  { %2717 = vmatprep.subr.bf16.mxu1 %v8066_v18 }
 0x37a   :  { %6868 = vmatmul.mubr.msk.bf16.gmra.mrb[40].mxu1 %vm1192_vm1, %v2058_v49 }
 0x37b   :  { %2718 = vmatpush1.bf16.msra.mxu1 %v8064_v43 }
 0x37c   :  { %2719 = vmatprep.subr.bf16.mxu1 %v8069_v44 }
 0x37f   :  { %2720 = vmatpush1.bf16.msra.mxu1 %v8067_v26 }
 0x380   :  { %2721 = vmatprep.subr.bf16.mxu1 %v8072_v19 }
 0x383   :  { %2722 = vmatpush1.bf16.msra.mxu1 %v8070_v30 }
 0x384   :  { %2723 = vmatprep.subr.bf16.mxu1 %v8075_v59  ;;  %v8084_v59 = vld [vmem:[%s10669_s5 + $0x188] ss:$12 sps:$4 sm:$0xff]  }
 0x387   :  { %2724 = vmatpush1.bf16.msra.mxu1 %v8073_v45 }
 0x388   :  { %2725 = vmatprep.subr.bf16.mxu1 %v8078_v32  ;;  %v8088_v32 = vld [vmem:[%s10669_s5 + $0x1e8] ss:$12 sps:$4 sm:$0xff]  }
 0x38b   :  { %2726 = vmatpush1.bf16.msra.mxu1 %v8076_v28  ;;  %v8092_v28 = vld [vmem:[%s10669_s5 + $0x4] ss:$12 sps:$4 sm:$0xff]  }
 0x38c   :  { %2758 = vmatprep.subr.bf16.mxu1 %v8611_v1 }
 0x435   :  { %v9621_v34 = vpop.f32.mrb[28].mxu1 }
 0x436   :  { %2271 = vrot.lane.b32.xlu0 %v9621_v34, %s8609_s29  ;;  %v9625_v15 = vpop.f32.mrb[29].mxu1 }
 0x437   :  { %2273 = vrot.lane.b32.xlu1 %v9625_v15, %s8609_s29  ;;  %v2198_v51 = vpop.f32.mrb[30].mxu1 }
 0x438   :  { %v9629_v53 = vpop.f32.mrb[31].mxu1  ;;  %v9632_v57 = vmax.f32 %v9621_v34, %v2198_v51 }
 0x439   :  { %v2246_v35 = vmax.f32 %v9625_v15, %v9629_v53 }
 0x43d   :  { %v2204_v36 = vpop.f32.mrb[32].mxu1 }
 0x43e   :  { %v9636_v27 = vpop.f32.mrb[33].mxu1  ;;  %v9638_v58 = vmax.f32 %v2198_v51, %v2204_v36 }
 0x43f   :  { %v2208_v60 = vpop.f32.mrb[34].mxu1  ;;  %v2248_v61 = vmax.f32 %v9629_v53, %v9636_v27 }
 0x440   :  { %2279 = vrot.lane.b32.xlu0 %v9638_v58, %s8609_s29  ;;  %v9644_v62 = vpop.f32.mrb[35].mxu1  ;;  %v9646_v56 = vmax.f32 %v2204_v36, %v2208_v60 }
 0x441   :  { %2281 = vrot.lane.b32.xlu1 %v2248_v61, %s8609_s29  ;;  %v2250_v63 = vmax.f32 %v9636_v27, %v9644_v62 }
 0x445   :  { %v2214_v38 = vpop.f32.mrb[36].mxu1 }
 0x446   :  { %v9651_v0 = vpop.f32.mrb[37].mxu1  ;;  %v9653_v5 = vmax.f32 %v2208_v60, %v2214_v38 }
 0x447   :  { %v2218_v10 = vpop.f32.mrb[38].mxu1  ;;  %v2252_v7 = vmax.f32 %v9644_v62, %v9651_v0 }
 0x448   :  { %2287 = vrot.lane.b32.xlu0 %v9653_v5, %s8609_s29  ;;  %v9659_v39 = vpop.f32.mrb[39].mxu1  ;;  %v9661_v40 = vmax.f32 %v2214_v38, %v2218_v10 }
 0x449   :  { %2289 = vrot.lane.b32.xlu1 %v2252_v7, %s8609_s29  ;;  %v2254_v41 = vmax.f32 %v9651_v0, %v9659_v39 }
 0x44d   :  { %v2224_v22 = vpop.f32.mrb[40].mxu1 }
 0x44e   :  { %v9666_v13 = vmax.f32 %v2218_v10, %v2224_v22  ;;  %v2226_v17 = vpop.f32.mrb[41].mxu1 }
 0x44f   :  { %v2256_v46 = vmax.f32 %v9659_v39, %v2226_v17  ;;  %v2228_v50 = vpop.f32.mrb[42].mxu1 }
 0x450   :  { %2295 = vrot.lane.b32.xlu0 %v9666_v13, %s8609_s29  ;;  %v2229_v52 = vpop.f32.mrb[43].mxu1 }
 0x451   :  { %2297 = vrot.lane.b32.xlu1 %v2256_v46, %s8609_s29 }
 0x4a8   :  { %v2272_v21 = vpop.permute.xlu0 %2271 }
 0x4a9   :  { %v2274_v48 = vpop.permute.xlu1 %2273 }
 0x4aa   :  { %v2300_v6 = vsel %vm2299_vm6, %v2272_v21, %v2274_v48 }
 0x4ab   :  { %v2314_v42 = vmax.f32 %v9621_v34, %v2300_v6 }
 0x4ad   :  { %v2328_v3 = vadd.f32 %v9750_v9, %v2314_v42  ;;  %v8083_v42 = vld [vmem:[%s10669_s5 + $0x170] ss:$12 sps:$4 sm:$0xff]  }
 0x4af   :  { %v2335_v8 = vmax.f32 %v2328_v3, 0.0 }
 0x4b1   :  { %2372 = vrot.lane.b32.xlu0 %v2335_v8, %s8614_s17  ;;  %v8085_v8 = vld [vmem:[%s10669_s5 + $0x1a0] ss:$12 sps:$4 sm:$0xff]  }
 0x4b2   :  { %v2280_v31 = vpop.permute.xlu0 %2279 }
 0x4b3   :  { %v2282_v11 = vpop.permute.xlu1 %2281 }
 0x4b4   :  { %v2302_v29 = vsel %vm2299_vm6, %v2280_v31, %v2282_v11  ;;  %v8087_v31 = vld [vmem:[%s10669_s5 + $0x1d0] ss:$12 sps:$4 sm:$0xff]   ;;  %v8089_v11 = vld [vmem:[%s10669_s5 + $0x200] ss:$12 sps:$4 sm:$0xff]  }
 0x4b5   :  { %v2316_v47 = vmax.f32 %v9638_v58, %v2302_v29  ;;  %2275 = vrot.lane.b32.xlu0 %v9632_v57, %s8609_s29  ;;  %v8090_v29 = vld [vmem:[%s10669_s5] ss:$12 sps:$4 sm:$0xff]  }
 0x4b7   :  { %v2330_v49 = vadd.f32 %v9750_v9, %v2316_v47  ;;  %v8095_v47 = vld [vmem:[%s10669_s5 + $0x1c] ss:$12 sps:$4 sm:$0xff]  }
 0x4b9   :  { %v2337_v34 = vmax.f32 %v2330_v49, 0.0  ;;  %v8093_v49 = vld [vmem:[%s10669_s5 + $0x18] ss:$12 sps:$4 sm:$0xff]  }
 0x4ba   :  { %v2288_v51 = vpop.permute.xlu0 %2287 }
 0x4bb   :  { %v2290_v36 = vpop.permute.xlu1 %2289  ;;  %2376 = vrot.lane.b32.xlu1 %v2337_v34, %s8614_s17  ;;  %v8098_v34 = vld [vmem:[%s10669_s5 + $0x34] ss:$12 sps:$4 sm:$0xff]  }
 0x4bc   :  { %v2304_v60 = vsel %vm2299_vm6, %v2288_v51, %v2290_v36  ;;  %v8096_v51 = vld [vmem:[%s10669_s5 + $0x30] ss:$12 sps:$4 sm:$0xff]   ;;  %v8101_v36 = vld [vmem:[%s10669_s5 + $0x4c] ss:$12 sps:$4 sm:$0xff]  }
 0x4bd   :  { %v2318_v61 = vmax.f32 %v9653_v5, %v2304_v60  ;;  %v8099_v60 = vld [vmem:[%s10669_s5 + $0x48] ss:$12 sps:$4 sm:$0xff]  }
 0x4bf   :  { %2277 = vrot.lane.b32.xlu1 %v2246_v35, %s8609_s29  ;;  %v2332_v58 = vadd.f32 %v9750_v9, %v2318_v61  ;;  %v8104_v61 = vld [vmem:[%s10669_s5 + $0x64] ss:$12 sps:$4 sm:$0xff]  }
 0x4c1   :  { %v2339_v38 = vmax.f32 %v2332_v58, 0.0  ;;  %v8102_v58 = vld [vmem:[%s10669_s5 + $0x60] ss:$12 sps:$4 sm:$0xff]  }
 0x4c2   :  { %v2296_v10 = vpop.permute.xlu0 %2295 }
 0x4c3   :  { %2380 = vrot.lane.b32.xlu0 %v2339_v38, %s8614_s17  ;;  %v2298_v7 = vpop.permute.xlu1 %2297  ;;  %v8107_v38 = vld [vmem:[%s10669_s5 + $0x7c] ss:$12 sps:$4 sm:$0xff]  }
 0x4c4   :  { %v2306_v22 = vsel %vm2299_vm6, %v2296_v10, %v2298_v7  ;;  %v8105_v10 = vld [vmem:[%s10669_s5 + $0x78] ss:$12 sps:$4 sm:$0xff]   ;;  %v8110_v7 = vld [vmem:[%s10669_s5 + $0x94] ss:$12 sps:$4 sm:$0xff]  }
 0x4c5   :  { %v2320_v17 = vmax.f32 %v9666_v13, %v2306_v22  ;;  %v8108_v22 = vld [vmem:[%s10669_s5 + $0x90] ss:$12 sps:$4 sm:$0xff]  }
 0x4c7   :  { %2283 = vrot.lane.b32.xlu0 %v9646_v56, %s8609_s29  ;;  %v2334_v5 = vadd.f32 %v9750_v9, %v2320_v17  ;;  %v8113_v17 = vld [vmem:[%s10669_s5 + $0xac] ss:$12 sps:$4 sm:$0xff]  }
 0x4c9   :  { %v2341_v46 = vmax.f32 %v2334_v5, 0.0  ;;  %v8111_v5 = vld [vmem:[%s10669_s5 + $0xa8] ss:$12 sps:$4 sm:$0xff]  }
 0x4cb   :  { %2291 = vrot.lane.b32.xlu0 %v9661_v40, %s8609_s29  ;;  %2384 = vrot.lane.b32.xlu1 %v2341_v46, %s8614_s17  ;;  %v8116_v46 = vld [vmem:[%s10669_s5 + $0xc4] ss:$12 sps:$4 sm:$0xff]  }
 0x4cf   :  { %2285 = vrot.lane.b32.xlu1 %v2250_v63, %s8609_s29 }
 0x4d3   :  { %2293 = vrot.lane.b32.xlu1 %v2254_v41, %s8609_s29 }
 0x523   :  { %v2373_v15 = vpop.permute.xlu0 %2372 }
 0x524   :  { %2395 = vst.msk [vmem:[#allocation3 + $0x20] sm:$0xff] %vm2394_vm7, %v2373_v15 }
 0x525   :  { %2396 = vst.msk [vmem:[#allocation3 + $0x28] sm:$0xff] %vm2299_vm6, %v2373_v15  ;;  %v8114_v15 = vld [vmem:[%s10669_s5 + $0xc0] ss:$12 sps:$4 sm:$0xff]  }
 0x527   :  { %v2276_v35 = vpop.permute.xlu0 %2275 }
 0x52b   :  { %v2466_v41 = vld [vmem:[#allocation3 + $0x20] sm:$0xff] }
 0x52c   :  { %v2467_v63 = vld [vmem:[#allocation3 + $0x28] sm:$0xff] }
 0x52d   :  { %v2377_v53 = vpop.permute.xlu1 %2376 }
 0x52e   :  { %2399 = vst.msk [vmem:[#allocation3 + $0x40] sm:$0xff] %vm2394_vm7, %v2377_v53 }
 0x52f   :  { %2400 = vst.msk [vmem:[#allocation3 + $0x48] sm:$0xff] %vm2299_vm6, %v2377_v53  ;;  %v8119_v53 = vld [vmem:[%s10669_s5 + $0xdc] ss:$12 sps:$4 sm:$0xff]  }
 0x531   :  { %v2278_v13 = vpop.permute.xlu1 %2277 }
 0x532   :  { %v2301_v27 = vsel %vm2299_vm6, %v2276_v35, %v2278_v13  ;;  %v8117_v35 = vld [vmem:[%s10669_s5 + $0xd8] ss:$12 sps:$4 sm:$0xff]   ;;  %v8122_v13 = vld [vmem:[%s10669_s5 + $0xf4] ss:$12 sps:$4 sm:$0xff]  }
 0x533   :  { %v2315_v62 = vmax.f32 %v9632_v57, %v2301_v27  ;;  %v8080_v57 = vld [vmem:[%s10669_s5 + $0x128] ss:$12 sps:$4 sm:$0xff]   ;;  %v8120_v27 = vld [vmem:[%s10669_s5 + $0xf0] ss:$12 sps:$4 sm:$0xff]  }
 0x535   :  { %v2381_v0 = vpop.permute.xlu0 %2380  ;;  %v2468_v50 = vld [vmem:[#allocation3 + $0x40] sm:$0xff]  ;;  %v2329_v52 = vadd.f32 %v9750_v9, %v2315_v62 }
 0x536   :  { %v2469_v39 = vld [vmem:[#allocation3 + $0x48] sm:$0xff]  ;;  %2403 = vst.msk [vmem:[#allocation3 + $0x60] sm:$0xff] %vm2394_vm7, %v2381_v0  ;;  %v9807_v54 = vpack.c.bf16 %v2468_v50, %v2466_v41 }
 0x537   :  { %2404 = vst.msk [vmem:[#allocation3 + $0x68] sm:$0xff] %vm2299_vm6, %v2381_v0  ;;  %v2475_v33 = vpack.c.bf16 %v2469_v39, %v2467_v63  ;;  %v2336_v2 = vmax.f32 %v2329_v52, 0.0  ;;  %v2411_v63 = vld [vmem:[#allocation3 + $0x18] sm:$0xff] }
 0x538   :  { %v8123_v52 = vld [vmem:[%s10669_s5 + $0x8] ss:$12 sps:$4 sm:$0xff]  }
 0x539   :  { %6947 = vmatprep.mubr.msk.bf16.mxu1 %vm2343_vm5, %v2475_v33  ;;  %2374 = vrot.lane.b32.xlu0 %v2336_v2, %s8614_s17  ;;  %v2284_v16 = vpop.permute.xlu0 %2283 }
 0x53a   :  { %2738 = vmatmul.mubr.bf16.vlgmr.msra.gmra.mrb[44].mxu1 %v9807_v54 }
 0x53b   :  { %2759 = vmatpush1.bf16.msra.mxu1 %v8079_v55  ;;  %v8125_v55 = vld [vmem:[%s10669_s5 + $0x38] ss:$12 sps:$4 sm:$0xff]  }
 0x53c   :  { %2760 = vmatprep.subr.bf16.mxu1 %v8611_v1 }
 0x53d   :  { %v2385_v37 = vpop.permute.xlu1 %2384  ;;  %v2292_v18 = vpop.permute.xlu0 %2291  ;;  %v2470_v26 = vld [vmem:[#allocation3 + $0x60] sm:$0xff] }
 0x53e   :  { %2407 = vst.msk [vmem:[#allocation3 + $0x80] sm:$0xff] %vm2394_vm7, %v2385_v37  ;;  %v2471_v25 = vld [vmem:[#allocation3 + $0x68] sm:$0xff] }
 0x53f   :  { %2761 = vmatpush1.bf16.msra.mxu1 %v8080_v57  ;;  %2408 = vst.msk [vmem:[#allocation3 + $0x88] sm:$0xff] %vm2299_vm6, %v2385_v37  ;;  %v8126_v57 = vld [vmem:[%s10669_s5 + $0x50] ss:$12 sps:$4 sm:$0xff]  }
 0x540   :  { %2762 = vmatprep.subr.bf16.mxu1 %v8611_v1 }
 0x541   :  { %v2286_v20 = vpop.permute.xlu1 %2285 }
 0x542   :  { %v2303_v12 = vsel %vm2299_vm6, %v2284_v16, %v2286_v20 }
 0x543   :  { %2763 = vmatpush1.bf16.msra.mxu1 %v8081_v14  ;;  %v2317_v24 = vmax.f32 %v9646_v56, %v2303_v12  ;;  %v8127_v14 = vld [vmem:[%s10669_s5 + $0x68] ss:$12 sps:$4 sm:$0xff]  }
 0x544   :  { %2764 = vmatprep.subr.bf16.mxu1 %v8611_v1 }
 0x545   :  { %v2294_v43 = vpop.permute.xlu1 %2293  ;;  %v2472_v19 = vld [vmem:[#allocation3 + $0x80] sm:$0xff]  ;;  %v2331_v21 = vadd.f32 %v9750_v9, %v2317_v24 }
 0x546   :  { %v2473_v44 = vld [vmem:[#allocation3 + $0x88] sm:$0xff]  ;;  %v2305_v48 = vsel %vm2299_vm6, %v2292_v18, %v2294_v43  ;;  %v2476_v6 = vpack.c.bf16 %v2472_v19, %v2470_v26  ;;  %v8131_v26 = vld [vmem:[%s10669_s5 + $0xc8] ss:$12 sps:$4 sm:$0xff]  }
 0x547   :  { %2765 = vmatpush1.bf16.msra.mxu1 %v8082_v23  ;;  %v2477_v30 = vpack.c.bf16 %v2473_v44, %v2471_v25  ;;  %v2319_v56 = vmax.f32 %v9661_v40, %v2305_v48  ;;  %v2338_v3 = vmax.f32 %v2331_v21, 0.0  ;;  %v8128_v18 = vld [vmem:[%s10669_s5 + $0x80] ss:$12 sps:$4 sm:$0xff]   ;;  %v8129_v43 = vld [vmem:[%s10669_s5 + $0x98] ss:$12 sps:$4 sm:$0xff]  }
 0x548   :  { %2766 = vmatprep.subr.bf16.mxu1 %v8611_v1  ;;  %v8130_v44 = vld [vmem:[%s10669_s5 + $0xb0] ss:$12 sps:$4 sm:$0xff]   ;;  %v8132_v19 = vld [vmem:[%s10669_s5 + $0xe0] ss:$12 sps:$4 sm:$0xff]   ;;  %v8133_v21 = vld [vmem:[%s10669_s5 + $0xf8] ss:$12 sps:$4 sm:$0xff]  }
 0x549   :  { %6948 = vmatprep.mubr.msk.bf16.mxu1 %vm2343_vm5, %v2477_v30  ;;  %2378 = vrot.lane.b32.xlu1 %v2338_v3, %s8614_s17  ;;  %v2333_v45 = vadd.f32 %v9750_v9, %v2319_v56  ;;  %v8086_v9 = vld [vmem:[%s10669_s5 + $0x1b8] ss:$12 sps:$4 sm:$0xff]   ;;  %v8136_v48 = vld [vmem:[%s10669_s5 + $0x214] ss:$12 sps:$4 sm:$0xff]  }
 0x54a   :  { %2748 = vmatmul.mubr.bf16.gmra.mrb[48].mxu1 %v2476_v6  ;;  %v8142_v56 = vld [vmem:[%s10669_s5 + $0x244] ss:$12 sps:$4 sm:$0xff]   ;;  %v8140_v3 = vld [vmem:[%s10669_s5 + $0x240] ss:$12 sps:$4 sm:$0xff]  }
 0x54b   :  { %2767 = vmatpush1.bf16.msra.mxu1 %v8083_v42  ;;  %6949 = vmatprep.mubr.msk.bf16.mxu1 %vm2343_vm5, %v2475_v33  ;;  %v2340_v40 = vmax.f32 %v2333_v45, 0.0  ;;  %v8124_v33 = vld [vmem:[%s10669_s5 + $0x20] ss:$12 sps:$4 sm:$0xff]   ;;  %v8137_v42 = vld [vmem:[%s10669_s5 + $0x228] ss:$12 sps:$4 sm:$0xff]  }
 0x54c   :  { %2768 = vmatprep.subr.bf16.mxu1 %v8611_v1  ;;  %v8145_v45 = vld [vmem:[%s10669_s5 + $0x25c] ss:$12 sps:$4 sm:$0xff]  }
 0x54d   :  { %2382 = vrot.lane.b32.xlu0 %v2340_v40, %s8614_s17  ;;  %v8143_v40 = vld [vmem:[%s10669_s5 + $0x258] ss:$12 sps:$4 sm:$0xff]  }
 0x54f   :  { %2769 = vmatpush1.bf16.msra.mxu1 %v8084_v59 }
 0x550   :  { %2770 = vmatprep.subr.bf16.mxu1 %v8611_v1 }
 0x553   :  { %2771 = vmatpush1.bf16.msra.mxu1 %v8085_v8  ;;  %v8148_v8 = vld [vmem:[%s10669_s5 + $0x274] ss:$12 sps:$4 sm:$0xff]  }
 0x554   :  { %2772 = vmatprep.subr.bf16.mxu1 %v8611_v1 }
 0x557   :  { %2773 = vmatpush1.bf16.msra.mxu1 %v8086_v9  ;;  %v8146_v9 = vld [vmem:[%s10669_s5 + $0x270] ss:$12 sps:$4 sm:$0xff]  }
 0x558   :  { %2774 = vmatprep.subr.bf16.mxu1 %v8611_v1 }
 0x55b   :  { %2775 = vmatpush1.bf16.msra.mxu1 %v8087_v31  ;;  %v8151_v31 = vld [vmem:[%s10669_s5 + $0x28c] ss:$12 sps:$4 sm:$0xff]  }
 0x55c   :  { %2776 = vmatprep.subr.bf16.mxu1 %v8611_v1 }
 0x55f   :  { %2777 = vmatpush1.bf16.msra.mxu1 %v8088_v32  ;;  %v8149_v32 = vld [vmem:[%s10669_s5 + $0x288] ss:$12 sps:$4 sm:$0xff]  }
 0x560   :  { %2778 = vmatprep.subr.bf16.mxu1 %v8611_v1 }
 0x563   :  { %2779 = vmatpush1.bf16.msra.mxu1 %v8089_v11  ;;  %v8154_v11 = vld [vmem:[%s10669_s5 + $0x2a4] ss:$12 sps:$4 sm:$0xff]  }
 0x564   :  { %2989 = vmatprep.subr.bf16.mxu1 %v8092_v28  ;;  %v8152_v28 = vld [vmem:[%s10669_s5 + $0x2a0] ss:$12 sps:$4 sm:$0xff]  }
 0x566   :  { %2791 = vmatmul.mubr.bf16.vlgmr.msra.gmra.mrb[52].mxu1 %v9807_v54 }
 0x567   :  { %6950 = vmatprep.mubr.msk.bf16.mxu1 %vm2343_vm5, %v2477_v30  ;;  %2990 = vmatpush1.bf16.msra.mxu1 %v8090_v29  ;;  %v8134_v30 = vld [vmem:[%s10669_s5 + $0x210] ss:$12 sps:$4 sm:$0xff]  }
 0x568   :  { %2991 = vmatprep.subr.bf16.mxu1 %v8095_v47  ;;  %v8157_v29 = vld [vmem:[%s10669_s5 + $0x2bc] ss:$12 sps:$4 sm:$0xff]   ;;  %v8155_v47 = vld [vmem:[%s10669_s5 + $0x2b8] ss:$12 sps:$4 sm:$0xff]  }
 0x56b   :  { %2992 = vmatpush1.bf16.msra.mxu1 %v8093_v49  ;;  %v8160_v49 = vld [vmem:[%s10669_s5 + $0x2d4] ss:$12 sps:$4 sm:$0xff]  }
 0x56c   :  { %2993 = vmatprep.subr.bf16.mxu1 %v8098_v34  ;;  %v8158_v34 = vld [vmem:[%s10669_s5 + $0x2d0] ss:$12 sps:$4 sm:$0xff]  }
 0x56e   :  { %2799 = vmatmul.mubr.bf16.gmra.mrb[56].mxu1 %v2476_v6  ;;  %v8139_v6 = vld [vmem:[%s10669_s5 + $0x22c] ss:$12 sps:$4 sm:$0xff]  }
 0x56f   :  { %2994 = vmatpush1.bf16.msra.mxu1 %v8096_v51  ;;  %v8163_v51 = vld [vmem:[%s10669_s5 + $0x2ec] ss:$12 sps:$4 sm:$0xff]  }
 0x570   :  { %2995 = vmatprep.subr.bf16.mxu1 %v8101_v36  ;;  %v8161_v36 = vld [vmem:[%s10669_s5 + $0x2e8] ss:$12 sps:$4 sm:$0xff]  }
 0x573   :  { %2996 = vmatpush1.bf16.msra.mxu1 %v8099_v60  ;;  %v8166_v60 = vld [vmem:[%s10669_s5 + $0x304] ss:$12 sps:$4 sm:$0xff]  }
 0x574   :  { %2997 = vmatprep.subr.bf16.mxu1 %v8104_v61  ;;  %v8164_v61 = vld [vmem:[%s10669_s5 + $0x300] ss:$12 sps:$4 sm:$0xff]  }
 0x577   :  { %2998 = vmatpush1.bf16.msra.mxu1 %v8102_v58  ;;  %v3099_v58 = vld [vmem:[#allocation3 + $0x98] sm:$0xff] }
 0x578   :  { %2999 = vmatprep.subr.bf16.mxu1 %v8107_v38  ;;  %v8167_v38 = vld [vmem:[%s10669_s5 + $0x218] ss:$12 sps:$4 sm:$0xff]  }
 0x57b   :  { %3000 = vmatpush1.bf16.msra.mxu1 %v8105_v10 }
 0x57c   :  { %3001 = vmatprep.subr.bf16.mxu1 %v8110_v7  ;;  %v8168_v7 = vld [vmem:[%s10669_s5 + $0x230] ss:$12 sps:$4 sm:$0xff]  }
 0x57f   :  { %3002 = vmatpush1.bf16.msra.mxu1 %v8108_v22  ;;  %v8169_v22 = vld [vmem:[%s10669_s5 + $0x248] ss:$12 sps:$4 sm:$0xff]  }
 0x580   :  { %3003 = vmatprep.subr.bf16.mxu1 %v8113_v17 }
 0x583   :  { %3004 = vmatpush1.bf16.msra.mxu1 %v8111_v5  ;;  %v8170_v5 = vld [vmem:[%s10669_s5 + $0x260] ss:$12 sps:$4 sm:$0xff]  }
 0x584   :  { %3005 = vmatprep.subr.bf16.mxu1 %v8116_v46  ;;  %v8171_v46 = vld [vmem:[%s10669_s5 + $0x278] ss:$12 sps:$4 sm:$0xff]  }
 0x587   :  { %3006 = vmatpush1.bf16.msra.mxu1 %v8114_v15  ;;  %v8173_v15 = vld [vmem:[%s10669_s5 + $0x2a8] ss:$12 sps:$4 sm:$0xff]  }
 0x588   :  { %3007 = vmatprep.subr.bf16.mxu1 %v8119_v53  ;;  %v8174_v53 = vld [vmem:[%s10669_s5 + $0x2c0] ss:$12 sps:$4 sm:$0xff]  }
 0x58b   :  { %3008 = vmatpush1.bf16.msra.mxu1 %v8117_v35  ;;  %v8175_v35 = vld [vmem:[%s10669_s5 + $0x2d8] ss:$12 sps:$4 sm:$0xff]  }
 0x58c   :  { %3009 = vmatprep.subr.bf16.mxu1 %v8122_v13  ;;  %v8176_v13 = vld [vmem:[%s10669_s5 + $0x2f0] ss:$12 sps:$4 sm:$0xff]  }
 0x58f   :  { %3010 = vmatpush1.bf16.msra.mxu1 %v8120_v27  ;;  %v8177_v27 = vld [vmem:[%s10669_s5 + $0x308] ss:$12 sps:$4 sm:$0xff]  }
 0x590   :  { %3042 = vmatprep.subr.bf16.mxu1 %v8611_v1 }
 0x5ab   :  { %v2375_v62 = vpop.permute.xlu0 %2374 }
 0x5ac   :  { %2397 = vst.msk [vmem:[#allocation3 + $0x30] sm:$0xff] %vm2394_vm7, %v2375_v62 }
 0x5ad   :  { %2398 = vst.msk [vmem:[#allocation3 + $0x38] sm:$0xff] %vm2299_vm6, %v2375_v62 }
 0x5b3   :  { %v2412_v39 = vld [vmem:[#allocation3 + $0x30] sm:$0xff] }
 0x5b4   :  { %v9938_v0 = vld [vmem:[#allocation3 + $0x38] sm:$0xff]  ;;  %v2418_v50 = vpack.c.bf16 %v2412_v39, %v9687_v4 }
 0x5b5   :  { %v2419_v41 = vpack.c.bf16 %v9938_v0, %v2411_v63 }
 0x5b7   :  { %6984 = vmatprep.mubr.msk.bf16.mxu1 %vm2343_vm5, %v2419_v41 }
 0x5b8   :  { %3022 = vmatmul.mubr.bf16.vlgmr.msra.gmra.mrb[44].mxu1 %v2418_v50 }
 0x5b9   :  { %3043 = vmatpush1.bf16.msra.mxu1 %v8123_v52 }
 0x5ba   :  { %3044 = vmatprep.subr.bf16.mxu1 %v8611_v1 }
 0x5bb   :  { %v2379_v54 = vpop.permute.xlu1 %2378 }
 0x5bc   :  { %2401 = vst.msk [vmem:[#allocation3 + $0x50] sm:$0xff] %vm2394_vm7, %v2379_v54 }
 0x5bd   :  { %3045 = vmatpush1.bf16.msra.mxu1 %v8124_v33  ;;  %2402 = vst.msk [vmem:[#allocation3 + $0x58] sm:$0xff] %vm2299_vm6, %v2379_v54 }
 0x5be   :  { %3046 = vmatprep.subr.bf16.mxu1 %v8611_v1 }
 0x5bf   :  { %v2383_v2 = vpop.permute.xlu0 %2382 }
 0x5c0   :  { %2405 = vst.msk [vmem:[#allocation3 + $0x70] sm:$0xff] %vm2394_vm7, %v2383_v2 }
 0x5c1   :  { %3047 = vmatpush1.bf16.msra.mxu1 %v8125_v55  ;;  %2406 = vst.msk [vmem:[#allocation3 + $0x78] sm:$0xff] %vm2299_vm6, %v2383_v2 }
 0x5c2   :  { %3048 = vmatprep.subr.bf16.mxu1 %v8611_v1 }
 0x5c3   :  { %v2414_v37 = vld [vmem:[#allocation3 + $0x50] sm:$0xff] }
 0x5c4   :  { %v9965_v16 = vpack.c.bf16 %v2414_v37, %v2412_v39  ;;  %v2415_v20 = vld [vmem:[#allocation3 + $0x58] sm:$0xff] }
 0x5c5   :  { %3049 = vmatpush1.bf16.msra.mxu1 %v8126_v57  ;;  %v3101_v59 = vpack.c.bf16 %v2415_v20, %v9938_v0 }
 0x5c6   :  { %3050 = vmatprep.subr.bf16.mxu1 %v8611_v1 }
 0x5c7   :  { %v9970_v23 = vld [vmem:[#allocation3 + $0x70] sm:$0xff] }
 0x5c8   :  { %v9968_v12 = vld [vmem:[#allocation3 + $0x78] sm:$0xff]  ;;  %v2420_v25 = vpack.c.bf16 %v9970_v23, %v2414_v37  ;;  %v3102_v17 = vpack.c.bf16 %v9687_v4, %v9970_v23 }
 0x5c9   :  { %3051 = vmatpush1.bf16.msra.mxu1 %v8127_v14  ;;  %v2421_v24 = vpack.c.bf16 %v9968_v12, %v2415_v20  ;;  %v3103_v10 = vpack.c.bf16 %v3099_v58, %v9968_v12  ;;  %v8172_v4 = vld [vmem:[%s10669_s5 + $0x290] ss:$12 sps:$4 sm:$0xff]   ;;  %v8213_v58 = vld [vmem:[#allocation5 + $0x3a4] ss:$16 sps:$4 sm:$0xff]  }
 0x5ca   :  { %3052 = vmatprep.subr.bf16.mxu1 %v8611_v1 }
 0x5cb   :  { %6985 = vmatprep.mubr.msk.bf16.mxu1 %vm2343_vm5, %v2421_v24 }
 0x5cc   :  { %3032 = vmatmul.mubr.bf16.gmra.mrb[48].mxu1 %v2420_v25 }
 0x5cd   :  { %3053 = vmatpush1.bf16.msra.mxu1 %v8128_v18  ;;  %6986 = vmatprep.mubr.msk.bf16.mxu1 %vm2343_vm5, %v2419_v41 }
 0x5ce   :  { %3054 = vmatprep.subr.bf16.mxu1 %v8611_v1 }
 0x5d1   :  { %3055 = vmatpush1.bf16.msra.mxu1 %v8129_v43 }
 0x5d2   :  { %3056 = vmatprep.subr.bf16.mxu1 %v8611_v1 }
 0x5d5   :  { %3057 = vmatpush1.bf16.msra.mxu1 %v8130_v44 }
 0x5d6   :  { %3058 = vmatprep.subr.bf16.mxu1 %v8611_v1 }
 0x5d9   :  { %3059 = vmatpush1.bf16.msra.mxu1 %v8131_v26 }
 0x5da   :  { %3060 = vmatprep.subr.bf16.mxu1 %v8611_v1 }
 0x5dd   :  { %3061 = vmatpush1.bf16.msra.mxu1 %v8132_v19 }
 0x5de   :  { %3062 = vmatprep.subr.bf16.mxu1 %v8611_v1 }
 0x5e1   :  { %3063 = vmatpush1.bf16.msra.mxu1 %v8133_v21  ;;  %v8178_v21 = vld [vmem:[#allocation5 + $0x240] ss:$16 sps:$4 sm:$0xff]  }
 0x5e2   :  { %3331 = vmatprep.subr.bf16.mxu1 %v8136_v48  ;;  %v8180_v48 = vld [vmem:[#allocation5 + $0x244] ss:$16 sps:$4 sm:$0xff]  }
 0x5e3   :  { %4169 = vmatprep.subr.bf16.mxu0 %v8180_v48  ;;  %v8225_v48 = vld [vmem:[#allocation5 + $0x444] ss:$16 sps:$4 sm:$0xff]  }
 0x5e4   :  { %3075 = vmatmul.mubr.bf16.vlgmr.msra.gmra.mrb[52].mxu1 %v2418_v50  ;;  %4170 = vmatpush1.bf16.msra.mxu0 %v8178_v21  ;;  %v8220_v21 = vld [vmem:[#allocation5 + $0x400] ss:$16 sps:$4 sm:$0xff]  }
 0x5e5   :  { %6987 = vmatprep.mubr.msk.bf16.mxu1 %vm2343_vm5, %v2421_v24  ;;  %3332 = vmatpush1.bf16.msra.mxu1 %v8134_v30  ;;  %v8183_v30 = vld [vmem:[#allocation5 + $0x264] ss:$16 sps:$4 sm:$0xff]  }
 0x5e6   :  { %3333 = vmatprep.subr.bf16.mxu1 %v8139_v6  ;;  %v8181_v6 = vld [vmem:[#allocation5 + $0x260] ss:$16 sps:$4 sm:$0xff]   ;;  %4171 = vmatprep.subr.bf16.mxu0 %v8183_v30 }
 0x5e7   :  { %v8223_v30 = vld [vmem:[#allocation5 + $0x440] ss:$16 sps:$4 sm:$0xff]  }
 0x5e8   :  { %4172 = vmatpush1.bf16.msra.mxu0 %v8181_v6 }
 0x5e9   :  { %3334 = vmatpush1.bf16.msra.mxu1 %v8137_v42  ;;  %v8186_v42 = vld [vmem:[#allocation5 + $0x284] ss:$16 sps:$4 sm:$0xff]  }
 0x5ea   :  { %3335 = vmatprep.subr.bf16.mxu1 %v8142_v56  ;;  %v8184_v56 = vld [vmem:[#allocation5 + $0x280] ss:$16 sps:$4 sm:$0xff]   ;;  %4173 = vmatprep.subr.bf16.mxu0 %v8186_v42  ;;  %v8228_v42 = vld [vmem:[#allocation5 + $0x424] ss:$16 sps:$4 sm:$0xff]  }
 0x5ec   :  { %3083 = vmatmul.mubr.bf16.gmra.mrb[56].mxu1 %v2420_v25  ;;  %4174 = vmatpush1.bf16.msra.mxu0 %v8184_v56 }
 0x5ed   :  { %3336 = vmatpush1.bf16.msra.mxu1 %v8140_v3  ;;  %7065 = vmatprep.mubr.msk.bf16.mxu1 %vm2343_vm5, %v3101_v59  ;;  %v8189_v3 = vld [vmem:[#allocation5 + $0x2a4] ss:$16 sps:$4 sm:$0xff]  }
 0x5ee   :  { %3337 = vmatprep.subr.bf16.mxu1 %v8145_v45  ;;  %v8187_v45 = vld [vmem:[#allocation5 + $0x2a0] ss:$16 sps:$4 sm:$0xff]   ;;  %4175 = vmatprep.subr.bf16.mxu0 %v8189_v3 }
 0x5f0   :  { %4176 = vmatpush1.bf16.msra.mxu0 %v8187_v45  ;;  %v8226_v45 = vld [vmem:[#allocation5 + $0x420] ss:$16 sps:$4 sm:$0xff]  }
 0x5f1   :  { %3338 = vmatpush1.bf16.msra.mxu1 %v8143_v40  ;;  %v8190_v40 = vld [vmem:[#allocation5 + $0x2c0] ss:$16 sps:$4 sm:$0xff]  }
 0x5f2   :  { %3339 = vmatprep.subr.bf16.mxu1 %v8148_v8  ;;  %v8195_v8 = vld [vmem:[#allocation5 + $0x2e4] ss:$16 sps:$4 sm:$0xff]  }
 0x5f5   :  { %3340 = vmatpush1.bf16.msra.mxu1 %v8146_v9  ;;  %v8193_v9 = vld [vmem:[#allocation5 + $0x2e0] ss:$16 sps:$4 sm:$0xff]  }
 0x5f6   :  { %3341 = vmatprep.subr.bf16.mxu1 %v8151_v31  ;;  %v8198_v31 = vld [vmem:[#allocation5 + $0x304] ss:$16 sps:$4 sm:$0xff]  }
 0x5f9   :  { %3342 = vmatpush1.bf16.msra.mxu1 %v8149_v32  ;;  %v8196_v32 = vld [vmem:[#allocation5 + $0x300] ss:$16 sps:$4 sm:$0xff]  }
 0x5fa   :  { %3343 = vmatprep.subr.bf16.mxu1 %v8154_v11  ;;  %v8201_v11 = vld [vmem:[#allocation5 + $0x324] ss:$16 sps:$4 sm:$0xff]  }
 0x5fd   :  { %3344 = vmatpush1.bf16.msra.mxu1 %v8152_v28  ;;  %v8199_v28 = vld [vmem:[#allocation5 + $0x320] ss:$16 sps:$4 sm:$0xff]  }
 0x5fe   :  { %3345 = vmatprep.subr.bf16.mxu1 %v8157_v29  ;;  %v8204_v29 = vld [vmem:[#allocation5 + $0x344] ss:$16 sps:$4 sm:$0xff]  }
 0x601   :  { %3346 = vmatpush1.bf16.msra.mxu1 %v8155_v47  ;;  %v8202_v47 = vld [vmem:[#allocation5 + $0x340] ss:$16 sps:$4 sm:$0xff]  }
 0x602   :  { %3347 = vmatprep.subr.bf16.mxu1 %v8160_v49  ;;  %v8207_v49 = vld [vmem:[#allocation5 + $0x364] ss:$16 sps:$4 sm:$0xff]  }
 0x605   :  { %3348 = vmatpush1.bf16.msra.mxu1 %v8158_v34  ;;  %v8205_v34 = vld [vmem:[#allocation5 + $0x360] ss:$16 sps:$4 sm:$0xff]  }
 0x606   :  { %3349 = vmatprep.subr.bf16.mxu1 %v8163_v51  ;;  %v8210_v51 = vld [vmem:[#allocation5 + $0x384] ss:$16 sps:$4 sm:$0xff]  }
 0x609   :  { %3350 = vmatpush1.bf16.msra.mxu1 %v8161_v36  ;;  %v8208_v36 = vld [vmem:[#allocation5 + $0x380] ss:$16 sps:$4 sm:$0xff]  }
 0x60a   :  { %3351 = vmatprep.subr.bf16.mxu1 %v8166_v60  ;;  %v3512_v60 = vlaneseq }
 0x60d   :  { %3352 = vmatpush1.bf16.msra.mxu1 %v8164_v61  ;;  %v10173_v61 = vshrl.u32 %v3512_v60, 7 }
 0x60e   :  { %3384 = vmatprep.subr.bf16.mxu1 %v8611_v1 }
 0x610   :  { %3364 = vmatmul.mubr.bf16.vlgmr.msra.gmra.mrb[44].mxu1 %v9965_v16 }
 0x611   :  { %7066 = vmatprep.mubr.msk.bf16.mxu1 %vm2343_vm5, %v3103_v10  ;;  %3385 = vmatpush1.bf16.msra.mxu1 %v8167_v38  ;;  %v3518_v38 = vsub.s32 1, %v10173_v61 }
 0x612   :  { %3386 = vmatprep.subr.bf16.mxu1 %v8611_v1 }
 0x615   :  { %3387 = vmatpush1.bf16.msra.mxu1 %v8168_v7  ;;  %v3510_v7 = vld [vmem:[%s10670_s6] sm:$0x3]  ;;  %s8616_s6 = smov 64  }
 0x616   :  { %3388 = vmatprep.subr.bf16.mxu1 %v8611_v1 }
 0x618   :  { %3374 = vmatmul.mubr.bf16.gmra.mrb[48].mxu1 %v3102_v17 }
 0x619   :  { %3389 = vmatpush1.bf16.msra.mxu1 %v8169_v22  ;;  %7067 = vmatprep.mubr.msk.bf16.mxu1 %vm2343_vm5, %v3101_v59  ;;  %v8192_v59 = vld [vmem:[#allocation5 + $0x2c4] ss:$16 sps:$4 sm:$0xff]   ;;  %v3514_v22 = vsub.s32 0, %v10173_v61 }
 0x61a   :  { %3390 = vmatprep.subr.bf16.mxu1 %v8611_v1  ;;  %4177 = vmatprep.subr.bf16.mxu0 %v8192_v59  ;;  %v8231_v59 = vld [vmem:[#allocation5 + $0x464] ss:$16 sps:$4 sm:$0xff]  }
 0x61b   :  { %4178 = vmatpush1.bf16.msra.mxu0 %v8190_v40 }
 0x61c   :  { %4179 = vmatprep.subr.bf16.mxu0 %v8195_v8  ;;  %v8229_v8 = vld [vmem:[#allocation5 + $0x460] ss:$16 sps:$4 sm:$0xff]  }
 0x61d   :  { %3391 = vmatpush1.bf16.msra.mxu1 %v8170_v5  ;;  %v8214_v5 = vld [vmem:[#allocation5 + $0x3c0] ss:$16 sps:$4 sm:$0xff]  }
 0x61e   :  { %3392 = vmatprep.subr.bf16.mxu1 %v8611_v1 }
 0x61f   :  { %4180 = vmatpush1.bf16.msra.mxu0 %v8193_v9 }
 0x620   :  { %4181 = vmatprep.subr.bf16.mxu0 %v8198_v31 }
 0x621   :  { %3393 = vmatpush1.bf16.msra.mxu1 %v8171_v46  ;;  %v10182_v46 = vrot.slane %v3510_v7, %v3518_v38 }
 0x622   :  { %3394 = vmatprep.subr.bf16.mxu1 %v8611_v1 }
 0x623   :  { %4182 = vmatpush1.bf16.msra.mxu0 %v8196_v32 }
 0x624   :  { %4183 = vmatprep.subr.bf16.mxu0 %v8201_v11 }
 0x625   :  { %3395 = vmatpush1.bf16.msra.mxu1 %v8172_v4 }
 0x626   :  { %3396 = vmatprep.subr.bf16.mxu1 %v8611_v1 }
 0x627   :  { %4184 = vmatpush1.bf16.msra.mxu0 %v8199_v28  ;;  %v8234_v28 = vld [vmem:[#allocation5 + $0x24c] ss:$16 sps:$4 sm:$0xff]  }
 0x628   :  { %4185 = vmatprep.subr.bf16.mxu0 %v8204_v29  ;;  %v3717_v29 = vld [vmem:[#allocation4 + $0x40] sm:$0xff] }
 0x629   :  { %3397 = vmatpush1.bf16.msra.mxu1 %v8173_v15 }
 0x62a   :  { %3398 = vmatprep.subr.bf16.mxu1 %v8611_v1 }
 0x62b   :  { %4186 = vmatpush1.bf16.msra.mxu0 %v8202_v47 }
 0x62c   :  { %4187 = vmatprep.subr.bf16.mxu0 %v8207_v49 }
 0x62d   :  { %3399 = vmatpush1.bf16.msra.mxu1 %v8174_v53  ;;  %v10186_v53 = vrot.slane %v3510_v7, %v3514_v22  ;;  %v3723_v7 = vld [vmem:[#allocation4 + $0xa0] sm:$0xff] }
 0x62e   :  { %3400 = vmatprep.subr.bf16.mxu1 %v8611_v1 }
 0x62f   :  { %4188 = vmatpush1.bf16.msra.mxu0 %v8205_v34 }
 0x630   :  { %4189 = vmatprep.subr.bf16.mxu0 %v8210_v51 }
 0x631   :  { %3401 = vmatpush1.bf16.msra.mxu1 %v8175_v35 }
 0x632   :  { %3402 = vmatprep.subr.bf16.mxu1 %v8611_v1 }
 0x633   :  { %4190 = vmatpush1.bf16.msra.mxu0 %v8208_v36 }
 0x634   :  { %4191 = vmatprep.subr.bf16.mxu0 %v8213_v58 }
 0x635   :  { %3403 = vmatpush1.bf16.msra.mxu1 %v8176_v13 }
 0x636   :  { %3404 = vmatprep.subr.bf16.mxu1 %v8611_v1 }
 0x639   :  { %3405 = vmatpush1.bf16.msra.mxu1 %v8177_v27 }
 0x63a   :  { %4220 = vmatprep.subr.bf16.mxu1 %v8225_v48 }
 0x63c   :  { %3417 = vmatmul.mubr.bf16.vlgmr.msra.gmra.mrb[52].mxu1 %v9965_v16 }
 0x63d   :  { %7068 = vmatprep.mubr.msk.bf16.mxu1 %vm2343_vm5, %v3103_v10  ;;  %v8211_v10 = vld [vmem:[#allocation5 + $0x3a0] ss:$16 sps:$4 sm:$0xff]   ;;  %4221 = vmatpush1.bf16.msra.mxu1 %v8223_v30 }
 0x63e   :  { %4192 = vmatpush1.bf16.msra.mxu0 %v8211_v10  ;;  %4222 = vmatprep.subr.bf16.mxu1 %v8231_v59  ;;  %v8235_v59 = vld [vmem:[#allocation5 + $0x268] ss:$16 sps:$4 sm:$0xff]  }
 0x641   :  { %4223 = vmatpush1.bf16.msra.mxu1 %v8229_v8  ;;  %v8240_v8 = vld [vmem:[#allocation5 + $0x28c] ss:$16 sps:$4 sm:$0xff]  }
 0x644   :  { %3425 = vmatmul.mubr.bf16.gmra.mrb[56].mxu1 %v3102_v17  ;;  %v8216_v17 = vld [vmem:[#allocation5 + $0x3c4] ss:$16 sps:$4 sm:$0xff]  }
 0x645   :  { %4252 = vmatprep.mubr.bf16.mxu1 %v8611_v1  ;;  %4193 = vmatprep.subr.bf16.mxu0 %v8216_v17  ;;  %v10216_v17 = vpack.c.bf16 %v3723_v7, %v3723_v7  ;;  %v8262_v7 = vld [vmem:[#allocation5 + $0x388] ss:$16 sps:$4 sm:$0xff]  }
 0x646   :  { %4194 = vmatpush1.bf16.msra.mxu0 %v8214_v5 }
 0x6e3   :  { %v10122_v62 = vpop.f32.mrb[44].mxu1 }
 0x6e4   :  { %v10124_v63 = vpop.f32.mrb[45].mxu1 }
 0x6e5   :  { %3464 = vrot.lane.b32.xlu1 %v10124_v63, %s8615_s25  ;;  %v10128_v0 = vpop.f32.mrb[46].mxu1 }
 0x6e6   :  { %v3445_v39 = vmax.f32 %v10122_v62, %v10128_v0  ;;  %v3371_v41 = vpop.f32.mrb[47].mxu1 }
 0x6e7   :  { %v10133_v50 = vmax.f32 %v10124_v63, %v3371_v41 }
 0x6eb   :  { %v10135_v52 = vpop.f32.mrb[48].mxu1 }
 0x6ec   :  { %v3448_v33 = vmax.f32 %v10128_v0, %v10135_v52  ;;  %v3377_v54 = vpop.f32.mrb[49].mxu1 }
 0x6ed   :  { %v10139_v55 = vmax.f32 %v3371_v41, %v3377_v54  ;;  %v10141_v2 = vpop.f32.mrb[50].mxu1  ;;  %v8219_v41 = vld [vmem:[#allocation5 + $0x3e4] ss:$16 sps:$4 sm:$0xff]  }
 0x6ee   :  { %v3451_v57 = vmax.f32 %v10135_v52, %v10141_v2  ;;  %v10145_v37 = vpop.f32.mrb[51].mxu1  ;;  %4195 = vmatprep.subr.bf16.mxu0 %v8219_v41  ;;  %v8238_v52 = vld [vmem:[#allocation5 + $0x288] ss:$16 sps:$4 sm:$0xff]  }
 0x6ef   :  { %v10148_v14 = vmax.f32 %v3377_v54, %v10145_v37  ;;  %3472 = vrot.lane.b32.xlu1 %v10139_v55, %s8615_s25 }
 0x6f3   :  { %3480 = vrot.lane.b32.xlu1 %v10145_v37, %s8615_s25 }
 0x70f   :  { %v10154_v16 = vpop.f32.mrb[52].mxu1 }
 0x710   :  { %3466 = vrot.lane.b32.xlu0 %v10154_v16, %s8615_s25  ;;  %v3420_v20 = vpop.f32.mrb[53].mxu1 }
 0x711   :  { %v10158_v12 = vpop.f32.mrb[54].mxu1  ;;  %v8217_v20 = vld [vmem:[#allocation5 + $0x3e0] ss:$16 sps:$4 sm:$0xff]  }
 0x712   :  { %v3447_v23 = vmax.f32 %v10154_v16, %v10158_v12  ;;  %v3423_v24 = vpop.f32.mrb[55].mxu1  ;;  %4196 = vmatpush1.bf16.msra.mxu0 %v8217_v20 }
 0x717   :  { %v10162_v25 = vpop.f32.mrb[56].mxu1 }
 0x718   :  { %v3450_v18 = vmax.f32 %v10158_v12, %v10162_v25  ;;  %v3428_v43 = vpop.f32.mrb[57].mxu1 }
 0x719   :  { %v10166_v44 = vpop.f32.mrb[58].mxu1 }
 0x71a   :  { %v3453_v26 = vmax.f32 %v10162_v25, %v10166_v44  ;;  %3474 = vrot.lane.b32.xlu0 %v3450_v18, %s8615_s25  ;;  %v3431_v19 = vpop.f32.mrb[59].mxu1 }
 0x71b   :  { %v8222_v19 = vld [vmem:[#allocation5 + $0x404] ss:$16 sps:$4 sm:$0xff]  }
 0x71c   :  { %4197 = vmatprep.subr.bf16.mxu0 %v8222_v19  ;;  %v8232_v19 = vld [vmem:[#allocation5 + $0x248] ss:$16 sps:$4 sm:$0xff]  }
 0x71d   :  { %4198 = vmatpush1.bf16.msra.mxu0 %v8220_v21 }
 0x71e   :  { %3482 = vrot.lane.b32.xlu0 %v10166_v44, %s8615_s25  ;;  %4199 = vmatprep.subr.bf16.mxu0 %v8228_v42 }
 0x721   :  { %4200 = vmatpush1.bf16.msra.mxu0 %v8226_v45 }
 0x722   :  { %4271 = vmatprep.subr.bf16.mxu0 %v8234_v28  ;;  %v8246_v28 = vld [vmem:[#allocation5 + $0x2cc] ss:$16 sps:$4 sm:$0xff]  }
 0x757   :  { %v3465_v4 = vpop.permute.xlu1 %3464 }
 0x782   :  { %v3467_v15 = vpop.permute.xlu0 %3466 }
 0x783   :  { %v3485_v35 = vsel %vm3484_vm8, %v3465_v4, %v3467_v15  ;;  %v3501_v13 = vmax.f32 %v10124_v63, %v3467_v15  ;;  %v3473_v63 = vpop.permute.xlu1 %3472 }
 0x784   :  { %v3500_v27 = vmax.f32 %v10122_v62, %v3485_v35 }
 0x785   :  { %v3523_v54 = vadd.f32 %v10182_v46, %v3501_v13 }
 0x786   :  { %v3522_v24 = vadd.f32 %v10186_v53, %v3500_v27 }
 0x787   :  { %v3533_v18 = vmax.f32 %v3523_v54, 0.0  ;;  %v3481_v31 = vpop.permute.xlu1 %3480 }
 0x788   :  { %v3532_v43 = vmax.f32 %v3522_v24, 0.0 }
 0x789   :  { %3581 = vrot.lane.b32.xlu0 %v3533_v18, %s8616_s6 }
 0x78a   :  { %3579 = vrot.lane.b32.xlu1 %v3532_v43, %s8616_s6 }
 0x78c   :  { %v3475_v6 = vpop.permute.xlu0 %3474 }
 0x78d   :  { %v3487_v56 = vsel %vm3484_vm8, %v3473_v63, %v3475_v6  ;;  %v3505_v3 = vmax.f32 %v10139_v55, %v3475_v6  ;;  %v3720_v55 = vld [vmem:[#allocation4 + $0x70] sm:$0xff] }
 0x78e   :  { %v3504_v40 = vmax.f32 %v3448_v33, %v3487_v56  ;;  %v10204_v33 = vpack.c.bf16 %v3720_v55, %v3717_v29  ;;  %v8237_v6 = vld [vmem:[#allocation5 + $0x26c] ss:$16 sps:$4 sm:$0xff]   ;;  %v8247_v55 = vld [vmem:[#allocation5 + $0x2e8] ss:$16 sps:$4 sm:$0xff]  }
 0x78f   :  { %v3527_v9 = vadd.f32 %v10182_v46, %v3505_v3  ;;  %v8249_v29 = vld [vmem:[#allocation5 + $0x2ec] ss:$16 sps:$4 sm:$0xff]  }
 0x790   :  { %v3483_v32 = vpop.permute.xlu0 %3482  ;;  %v3526_v11 = vadd.f32 %v10186_v53, %v3504_v40  ;;  %7141 = vmatmul.mubr.msk.bf16.vlgmr.msra.gmra.mrb[60].mxu1 %vm138_vm0, %v10204_v33 }
 0x791   :  { %v3489_v47 = vsel %vm3484_vm8, %v3481_v31, %v3483_v32  ;;  %v3509_v49 = vmax.f32 %v10145_v37, %v3483_v32  ;;  %v3537_v34 = vmax.f32 %v3527_v9, 0.0  ;;  %4262 = vmatprep.mubr.bf16.mxu1 %v8611_v1  ;;  %v8243_v32 = vld [vmem:[#allocation5 + $0x2ac] ss:$16 sps:$4 sm:$0xff]  }
 0x792   :  { %v3508_v51 = vmax.f32 %v10141_v2, %v3489_v47  ;;  %v3536_v36 = vmax.f32 %v3526_v11, 0.0  ;;  %v8241_v11 = vld [vmem:[#allocation5 + $0x2a8] ss:$16 sps:$4 sm:$0xff]   ;;  %v8252_v47 = vld [vmem:[#allocation5 + $0x30c] ss:$16 sps:$4 sm:$0xff]  }
 0x793   :  { %v3531_v60 = vadd.f32 %v10182_v46, %v3509_v49  ;;  %3589 = vrot.lane.b32.xlu0 %v3537_v34, %s8616_s6  ;;  %v8250_v49 = vld [vmem:[#allocation5 + $0x308] ss:$16 sps:$4 sm:$0xff]   ;;  %v8255_v34 = vld [vmem:[#allocation5 + $0x32c] ss:$16 sps:$4 sm:$0xff]  }
 0x794   :  { %3587 = vrot.lane.b32.xlu1 %v3536_v36, %s8616_s6  ;;  %v3530_v58 = vadd.f32 %v10186_v53, %v3508_v51  ;;  %v8253_v51 = vld [vmem:[#allocation5 + $0x328] ss:$16 sps:$4 sm:$0xff]   ;;  %v8258_v36 = vld [vmem:[#allocation5 + $0x34c] ss:$16 sps:$4 sm:$0xff]  }
 0x795   :  { %v3541_v37 = vmax.f32 %v3531_v60, 0.0  ;;  %v8256_v60 = vld [vmem:[#allocation5 + $0x348] ss:$16 sps:$4 sm:$0xff]  }
 0x796   :  { %v3540_v10 = vmax.f32 %v3530_v58, 0.0  ;;  %v8261_v58 = vld [vmem:[#allocation5 + $0x36c] ss:$16 sps:$4 sm:$0xff]  }
 0x797   :  { %3597 = vrot.lane.b32.xlu0 %v3541_v37, %s8616_s6  ;;  %v8259_v37 = vld [vmem:[#allocation5 + $0x368] ss:$16 sps:$4 sm:$0xff]  }
 0x798   :  { %3595 = vrot.lane.b32.xlu1 %v3540_v10, %s8616_s6  ;;  %7142 = vmatmul.mubr.msk.bf16.gmra.mrb[64].mxu1 %vm138_vm0, %v10216_v17  ;;  %v8264_v10 = vld [vmem:[#allocation5 + $0x38c] ss:$16 sps:$4 sm:$0xff]  }
 0x79b   :  { %3470 = vrot.lane.b32.xlu0 %v3447_v23, %s8615_s25 }
 0x79c   :  { %3468 = vrot.lane.b32.xlu1 %v10133_v50, %s8615_s25 }
 0x79f   :  { %3478 = vrot.lane.b32.xlu0 %v3453_v26, %s8615_s25 }
 0x7a0   :  { %3476 = vrot.lane.b32.xlu1 %v10148_v14, %s8615_s25 }
 0x7fb   :  { %v3582_v5 = vpop.permute.xlu0 %3581 }
 0x7fc   :  { %v3580_v4 = vpop.permute.xlu1 %3579 }
 0x7fd   :  { %v3600_v16 = vsel %vm3599_vm9, %v3580_v4, %v3582_v5  ;;  %3617 = vst.msk [vmem:[#allocation4 + $0x30] sm:$0xff] %vm3616_vm10, %v3580_v4  ;;  %v8267_v5 = vld [vmem:[#allocation5 + $0x3ac] ss:$16 sps:$4 sm:$0xff]   ;;  %v8265_v4 = vld [vmem:[#allocation5 + $0x3a8] ss:$16 sps:$4 sm:$0xff]  }
 0x7fe   :  { %3618 = vst.msk [vmem:[#allocation4 + $0x38] sm:$0xff] %vm3484_vm8, %v3600_v16  ;;  %v8270_v16 = vld [vmem:[#allocation5 + $0x3cc] ss:$16 sps:$4 sm:$0xff]  }
 0x804   :  { %v3715_v48 = vld [vmem:[#allocation4 + $0x30] sm:$0xff] }
 0x805   :  { %v3590_v12 = vpop.permute.xlu0 %3589  ;;  %v3716_v20 = vld [vmem:[#allocation4 + $0x38] sm:$0xff] }
 0x806   :  { %v3588_v23 = vpop.permute.xlu1 %3587 }
 0x807   :  { %v3602_v15 = vsel %vm3599_vm9, %v3588_v23, %v3590_v12  ;;  %3621 = vst.msk [vmem:[#allocation4 + $0x60] sm:$0xff] %vm3616_vm10, %v3588_v23  ;;  %v8268_v12 = vld [vmem:[#allocation5 + $0x3c8] ss:$16 sps:$4 sm:$0xff]   ;;  %v8273_v23 = vld [vmem:[#allocation5 + $0x3ec] ss:$16 sps:$4 sm:$0xff]  }
 0x808   :  { %3622 = vst.msk [vmem:[#allocation4 + $0x68] sm:$0xff] %vm3484_vm8, %v3602_v15  ;;  %v8271_v15 = vld [vmem:[#allocation5 + $0x3e8] ss:$16 sps:$4 sm:$0xff]  }
 0x809   :  { %v3598_v25 = vpop.permute.xlu0 %3597 }
 0x80a   :  { %v3596_v44 = vpop.permute.xlu1 %3595 }
 0x80b   :  { %v3604_v26 = vsel %vm3599_vm9, %v3596_v44, %v3598_v25  ;;  %3625 = vst.msk [vmem:[#allocation4 + $0x90] sm:$0xff] %vm3616_vm10, %v3596_v44  ;;  %v8276_v25 = vld [vmem:[#allocation5 + $0x40c] ss:$16 sps:$4 sm:$0xff]   ;;  %v8274_v44 = vld [vmem:[#allocation5 + $0x408] ss:$16 sps:$4 sm:$0xff]  }
 0x80c   :  { %3626 = vst.msk [vmem:[#allocation4 + $0x98] sm:$0xff] %vm3484_vm8, %v3604_v26  ;;  %v8279_v26 = vld [vmem:[#allocation5 + $0x42c] ss:$16 sps:$4 sm:$0xff]  }
 0x80d   :  { %v3471_v35 = vpop.permute.xlu0 %3470 }
 0x80e   :  { %v3503_v13 = vmax.f32 %v10133_v50, %v3471_v35  ;;  %v3469_v27 = vpop.permute.xlu1 %3468  ;;  %v3718_v41 = vld [vmem:[#allocation4 + $0x60] sm:$0xff] }
 0x80f   :  { %v3486_v54 = vsel %vm3484_vm8, %v3469_v27, %v3471_v35  ;;  %v3719_v24 = vld [vmem:[#allocation4 + $0x68] sm:$0xff]  ;;  %v10247_v30 = vpack.c.bf16 %v3718_v41, %v3715_v48  ;;  %v8277_v35 = vld [vmem:[#allocation5 + $0x428] ss:$16 sps:$4 sm:$0xff]   ;;  %v8285_v41 = vld [vmem:[#allocation5 + $0x46c] ss:$16 sps:$4 sm:$0xff]  }
 0x810   :  { %v3525_v18 = vadd.f32 %v10182_v46, %v3503_v13  ;;  %v3502_v43 = vmax.f32 %v3445_v39, %v3486_v54  ;;  %v3725_v21 = vpack.c.bf16 %v3719_v24, %v3716_v20  ;;  %v8282_v13 = vld [vmem:[#allocation5 + $0x44c] ss:$16 sps:$4 sm:$0xff]   ;;  %v8280_v27 = vld [vmem:[#allocation5 + $0x448] ss:$16 sps:$4 sm:$0xff]   ;;  %v8288_v20 = vld [vmem:[#allocation5 + $0x4] ss:$16 sps:$4 sm:$0xff]  }
 0x811   :  { %v3479_v63 = vpop.permute.xlu0 %3478  ;;  %v8283_v54 = vld [vmem:[#allocation5 + $0x468] ss:$16 sps:$4 sm:$0xff]   ;;  %v8286_v24 = vld [vmem:[#allocation5] ss:$16 sps:$4 sm:$0xff]  }
 0x812   :  { %v3507_v50 = vmax.f32 %v10148_v14, %v3479_v63  ;;  %v3477_v42 = vpop.permute.xlu1 %3476  ;;  %4201 = vmatprep.mubr.bf16.mxu0 %v3725_v21  ;;  %v3535_v56 = vmax.f32 %v3525_v18, 0.0  ;;  %v3524_v3 = vadd.f32 %v10186_v53, %v3502_v43  ;;  %v3721_v31 = vld [vmem:[#allocation4 + $0x90] sm:$0xff]  ;;  %v8291_v18 = vld [vmem:[#allocation5 + $0x24] ss:$16 sps:$4 sm:$0xff]   ;;  %v8289_v43 = vld [vmem:[#allocation5 + $0x20] ss:$16 sps:$4 sm:$0xff]  }
 0x813   :  { %v3488_v45 = vsel %vm3484_vm8, %v3477_v42, %v3479_v63  ;;  %4202 = vmatmul.mubr.bf16.vlgmr.msra.gmra.mrb[28].mxu0 %v10247_v30  ;;  %v3722_v62 = vld [vmem:[#allocation4 + $0x98] sm:$0xff] }
 0x814   :  { %v3529_v0 = vadd.f32 %v10182_v46, %v3507_v50  ;;  %v3506_v39 = vmax.f32 %v3451_v57, %v3488_v45  ;;  %4272 = vmatpush1.bf16.msra.mxu0 %v8232_v19  ;;  %3585 = vrot.lane.b32.xlu0 %v3535_v56, %s8616_s6  ;;  %v10258_v14 = vpack.c.bf16 %v3722_v62, %v3722_v62  ;;  %v3534_v40 = vmax.f32 %v3524_v3, 0.0  ;;  %v8294_v19 = vld [vmem:[#allocation5 + $0x44] ss:$16 sps:$4 sm:$0xff]   ;;  %v8295_v50 = vld [vmem:[#allocation5 + $0x60] ss:$16 sps:$4 sm:$0xff]  }
 0x815   :  { %4273 = vmatprep.subr.bf16.mxu0 %v8237_v6  ;;  %v10264_v57 = vpack.c.bf16 %v3721_v31, %v3721_v31  ;;  %v8297_v63 = vld [vmem:[#allocation5 + $0x64] ss:$16 sps:$4 sm:$0xff]   ;;  %v8298_v56 = vld [vmem:[#allocation5 + $0x80] ss:$16 sps:$4 sm:$0xff]  }
 0x816   :  { %4211 = vmatprep.mubr.bf16.mxu0 %v10258_v14  ;;  %3583 = vrot.lane.b32.xlu1 %v3534_v40, %s8616_s6  ;;  %v3539_v9 = vmax.f32 %v3529_v0, 0.0  ;;  %v3528_v46 = vadd.f32 %v10186_v53, %v3506_v39  ;;  %v8244_v53 = vld [vmem:[#allocation5 + $0x2c8] ss:$16 sps:$4 sm:$0xff]   ;;  %v8300_v42 = vld [vmem:[#allocation5 + $0x84] ss:$16 sps:$4 sm:$0xff]  }
 0x817   :  { %v8303_v45 = vld [vmem:[#allocation5 + $0xa4] ss:$16 sps:$4 sm:$0xff]  }
 0x818   :  { %4274 = vmatpush1.bf16.msra.mxu0 %v8235_v59  ;;  %3593 = vrot.lane.b32.xlu0 %v3539_v9, %s8616_s6  ;;  %v3538_v2 = vmax.f32 %v3528_v46, 0.0  ;;  %v8304_v59 = vld [vmem:[#allocation5 + $0xc0] ss:$16 sps:$4 sm:$0xff]   ;;  %v8309_v40 = vld [vmem:[#allocation5 + $0xe4] ss:$16 sps:$4 sm:$0xff]  }
 0x819   :  { %4275 = vmatprep.subr.bf16.mxu0 %v8240_v8  ;;  %v8307_v8 = vld [vmem:[#allocation5 + $0xe0] ss:$16 sps:$4 sm:$0xff]   ;;  %v8312_v9 = vld [vmem:[#allocation5 + $0x104] ss:$16 sps:$4 sm:$0xff]  }
 0x81a   :  { %3591 = vrot.lane.b32.xlu1 %v3538_v2, %s8616_s6  ;;  %v8310_v46 = vld [vmem:[#allocation5 + $0x100] ss:$16 sps:$4 sm:$0xff]   ;;  %v8315_v31 = vld [vmem:[#allocation5 + $0x124] ss:$16 sps:$4 sm:$0xff]  }
 0x81b   :  { %4212 = vmatmul.mubr.bf16.gmra.mrb[32].mxu0 %v10264_v57  ;;  %v8318_v2 = vld [vmem:[#allocation5 + $0x144] ss:$16 sps:$4 sm:$0xff]  }
 0x81c   :  { %4276 = vmatpush1.bf16.msra.mxu0 %v8238_v52  ;;  %4303 = vmatprep.mubr.bf16.mxu0 %v3725_v21  ;;  %v8292_v21 = vld [vmem:[#allocation5 + $0x40] ss:$16 sps:$4 sm:$0xff]  }
 0x81d   :  { %4277 = vmatprep.subr.bf16.mxu0 %v8243_v32  ;;  %v8313_v52 = vld [vmem:[#allocation5 + $0x120] ss:$16 sps:$4 sm:$0xff]  }
 0x820   :  { %4278 = vmatpush1.bf16.msra.mxu0 %v8241_v11  ;;  %v8316_v11 = vld [vmem:[#allocation5 + $0x140] ss:$16 sps:$4 sm:$0xff]  }
 0x821   :  { %4279 = vmatprep.subr.bf16.mxu0 %v8246_v28 }
 0x824   :  { %4280 = vmatpush1.bf16.msra.mxu0 %v8244_v53  ;;  %v8321_v53 = vld [vmem:[#allocation5 + $0x164] ss:$16 sps:$4 sm:$0xff]  }
 0x825   :  { %4281 = vmatprep.subr.bf16.mxu0 %v8249_v29 }
 0x828   :  { %4282 = vmatpush1.bf16.msra.mxu0 %v8247_v55 }
 0x829   :  { %4283 = vmatprep.subr.bf16.mxu0 %v8252_v47  ;;  %v8319_v47 = vld [vmem:[#allocation5 + $0x160] ss:$16 sps:$4 sm:$0xff]  }
 0x82c   :  { %4284 = vmatpush1.bf16.msra.mxu0 %v8250_v49 }
 0x82d   :  { %4285 = vmatprep.subr.bf16.mxu0 %v8255_v34  ;;  %v8324_v34 = vld [vmem:[#allocation5 + $0x184] ss:$16 sps:$4 sm:$0xff]  }
 0x830   :  { %4286 = vmatpush1.bf16.msra.mxu0 %v8253_v51  ;;  %v8322_v51 = vld [vmem:[#allocation5 + $0x180] ss:$16 sps:$4 sm:$0xff]  }
 0x831   :  { %4287 = vmatprep.subr.bf16.mxu0 %v8258_v36 }
 0x834   :  { %4288 = vmatpush1.bf16.msra.mxu0 %v8256_v60  ;;  %v8327_v60 = vld [vmem:[#allocation5 + $0x1a4] ss:$16 sps:$4 sm:$0xff]  }
 0x835   :  { %4289 = vmatprep.subr.bf16.mxu0 %v8261_v58  ;;  %v10295_v58 = vld [vmem:[#allocation3] sm:$0xff] }
 0x838   :  { %4290 = vmatpush1.bf16.msra.mxu0 %v8259_v37 }
 0x839   :  { %4291 = vmatprep.subr.bf16.mxu0 %v8264_v10  ;;  %v8325_v10 = vld [vmem:[#allocation5 + $0x1a0] ss:$16 sps:$4 sm:$0xff]  }
 0x83c   :  { %4292 = vmatpush1.bf16.msra.mxu0 %v8262_v7 }
 0x83d   :  { %4293 = vmatprep.subr.bf16.mxu0 %v8267_v5 }
 0x840   :  { %4294 = vmatpush1.bf16.msra.mxu0 %v8265_v4  ;;  %v8330_v4 = vld [vmem:[#allocation5 + $0x1c4] ss:$16 sps:$4 sm:$0xff]  }
 0x841   :  { %4295 = vmatprep.subr.bf16.mxu0 %v8270_v16 }
 0x844   :  { %4296 = vmatpush1.bf16.msra.mxu0 %v8268_v12 }
 0x845   :  { %4297 = vmatprep.subr.bf16.mxu0 %v8273_v23 }
 0x848   :  { %4298 = vmatpush1.bf16.msra.mxu0 %v8271_v15  ;;  %v8328_v15 = vld [vmem:[#allocation5 + $0x1c0] ss:$16 sps:$4 sm:$0xff]  }
 0x849   :  { %4299 = vmatprep.subr.bf16.mxu0 %v8276_v25  ;;  %v8333_v25 = vld [vmem:[#allocation5 + $0x1e4] ss:$16 sps:$4 sm:$0xff]  }
 0x84c   :  { %4300 = vmatpush1.bf16.msra.mxu0 %v8274_v44  ;;  %v8331_v44 = vld [vmem:[#allocation5 + $0x1e0] ss:$16 sps:$4 sm:$0xff]  }
 0x84d   :  { %4301 = vmatprep.subr.bf16.mxu0 %v8279_v26  ;;  %v8336_v26 = vld [vmem:[#allocation5 + $0x204] ss:$16 sps:$4 sm:$0xff]  }
 0x850   :  { %4302 = vmatpush1.bf16.msra.mxu0 %v8277_v35  ;;  %v8334_v35 = vld [vmem:[#allocation5 + $0x200] ss:$16 sps:$4 sm:$0xff]  }
 0x851   :  { %4322 = vmatprep.subr.bf16.mxu0 %v8282_v13 }
 0x853   :  { %4304 = vmatmul.mubr.bf16.vlgmr.msra.gmra.mrb[36].mxu0 %v10247_v30 }
 0x854   :  { %4313 = vmatprep.mubr.bf16.mxu0 %v10258_v14  ;;  %4323 = vmatpush1.bf16.msra.mxu0 %v8280_v27  ;;  %v8301_v14 = vld [vmem:[#allocation5 + $0xa0] ss:$16 sps:$4 sm:$0xff]   ;;  %v8339_v27 = vld [vmem:[#allocation5 + $0x224] ss:$16 sps:$4 sm:$0xff]  }
 0x855   :  { %4324 = vmatprep.subr.bf16.mxu0 %v8285_v41 }
 0x858   :  { %4325 = vmatpush1.bf16.msra.mxu0 %v8283_v54  ;;  %v8337_v54 = vld [vmem:[#allocation5 + $0x220] ss:$16 sps:$4 sm:$0xff]  }
 0x859   :  { %4739 = vmatprep.subr.bf16.mxu0 %v8288_v20  ;;  %v8342_v20 = vld [vmem:[#allocation5 + $0xc] ss:$16 sps:$4 sm:$0xff]  }
 0x85b   :  { %4314 = vmatmul.mubr.bf16.gmra.mrb[40].mxu0 %v10264_v57 }
 0x85c   :  { %4354 = vmatprep.mubr.bf16.mxu0 %v8611_v1 }
 0x863   :  { %7143 = vmatmul.mubr.msk.bf16.vlgmr.msra.gmra.mrb[36].mxu0 %vm138_vm0, %v10204_v33  ;;  %v10275_v48 = vpop.f32.mrb[60].mxu1 }
 0x864   :  { %4740 = vmatpush1.bf16.msra.mxu0 %v8286_v24  ;;  %4364 = vmatprep.mubr.bf16.mxu0 %v8611_v1  ;;  %v10277_v30 = vpop.f32.mrb[61].mxu1 }
 0x865   :  { %4741 = vmatprep.subr.bf16.mxu0 %v8291_v18  ;;  %v10279_v6 = vpop.f32.mrb[62].mxu1  ;;  %v3630_v18 = vld [vmem:[#allocation4 + $0x28] sm:$0xff] }
 0x866   :  { %v10283_v33 = vpop.f32.mrb[63].mxu1 }
 0x868   :  { %4742 = vmatpush1.bf16.msra.mxu0 %v8289_v43  ;;  %v10313_v43 = vld [vmem:[#allocation4 + $0x58] sm:$0xff] }
 0x869   :  { %4743 = vmatprep.subr.bf16.mxu0 %v8294_v19  ;;  %v10316_v19 = vpack.c.bf16 %v10313_v43, %v3630_v18 }
 0x86b   :  { %7144 = vmatmul.mubr.msk.bf16.gmra.mrb[40].mxu0 %vm138_vm0, %v10216_v17  ;;  %v10285_v3 = vpop.f32.mrb[64].mxu1  ;;  %v8306_v17 = vld [vmem:[#allocation5 + $0xc4] ss:$16 sps:$4 sm:$0xff]  }
 0x86c   :  { %4744 = vmatpush1.bf16.msra.mxu0 %v8292_v21  ;;  %v10287_v62 = vpop.f32.mrb[65].mxu1  ;;  %v8340_v21 = vld [vmem:[#allocation5 + $0x8] ss:$16 sps:$4 sm:$0xff]  }
 0x86d   :  { %4745 = vmatprep.subr.bf16.mxu0 %v8297_v63  ;;  %v4268_v0 = vpop.f32.mrb[66].mxu1  ;;  %v8345_v63 = vld [vmem:[#allocation5 + $0x2c] ss:$16 sps:$4 sm:$0xff]  }
 0x86e   :  { %v4269_v39 = vpop.f32.mrb[67].mxu1  ;;  %v8346_v0 = vld [vmem:[#allocation5 + $0x48] ss:$16 sps:$4 sm:$0xff]  }
 0x86f   :  { %v8351_v39 = vld [vmem:[#allocation5 + $0x6c] ss:$16 sps:$4 sm:$0xff]  }
 0x870   :  { %4746 = vmatpush1.bf16.msra.mxu0 %v8295_v50  ;;  %v8343_v50 = vld [vmem:[#allocation5 + $0x28] ss:$16 sps:$4 sm:$0xff]  }
 0x871   :  { %4747 = vmatprep.subr.bf16.mxu0 %v8300_v42  ;;  %v10321_v42 = vld [vmem:[#allocation4 + $0x88] sm:$0xff] }
 0x874   :  { %4748 = vmatpush1.bf16.msra.mxu0 %v8298_v56  ;;  %v8348_v56 = vld [vmem:[#allocation5 + $0x4c] ss:$16 sps:$4 sm:$0xff]  }
 0x875   :  { %4749 = vmatprep.subr.bf16.mxu0 %v8303_v45  ;;  %v10325_v45 = vpack.c.bf16 %v10321_v42, %v10321_v42 }
 0x878   :  { %4750 = vmatpush1.bf16.msra.mxu0 %v8301_v14  ;;  %v8349_v14 = vld [vmem:[#allocation5 + $0x68] ss:$16 sps:$4 sm:$0xff]  }
 0x879   :  { %4751 = vmatprep.subr.bf16.mxu0 %v8306_v17  ;;  %v8354_v17 = vld [vmem:[#allocation5 + $0x8c] ss:$16 sps:$4 sm:$0xff]  }
 0x87c   :  { %4752 = vmatpush1.bf16.msra.mxu0 %v8304_v59  ;;  %v8352_v59 = vld [vmem:[#allocation5 + $0x88] ss:$16 sps:$4 sm:$0xff]  }
 0x87d   :  { %4753 = vmatprep.subr.bf16.mxu0 %v8309_v40  ;;  %v8357_v40 = vld [vmem:[#allocation5 + $0xac] ss:$16 sps:$4 sm:$0xff]  }
 0x880   :  { %4754 = vmatpush1.bf16.msra.mxu0 %v8307_v8  ;;  %v8355_v8 = vld [vmem:[#allocation5 + $0xa8] ss:$16 sps:$4 sm:$0xff]  }
 0x881   :  { %4755 = vmatprep.subr.bf16.mxu0 %v8312_v9  ;;  %v8360_v9 = vld [vmem:[#allocation5 + $0xcc] ss:$16 sps:$4 sm:$0xff]  }
 0x884   :  { %4756 = vmatpush1.bf16.msra.mxu0 %v8310_v46  ;;  %v8358_v46 = vld [vmem:[#allocation5 + $0xc8] ss:$16 sps:$4 sm:$0xff]  }
 0x885   :  { %4757 = vmatprep.subr.bf16.mxu0 %v8315_v31  ;;  %v8363_v31 = vld [vmem:[#allocation5 + $0xec] ss:$16 sps:$4 sm:$0xff]  }
 0x886   :  { %v3586_v57 = vpop.permute.xlu0 %3585 }
 0x888   :  { %4758 = vmatpush1.bf16.msra.mxu0 %v8313_v52  ;;  %v3584_v32 = vpop.permute.xlu1 %3583  ;;  %v8361_v52 = vld [vmem:[#allocation5 + $0xe8] ss:$16 sps:$4 sm:$0xff]  }
 0x889   :  { %v3601_v28 = vsel %vm3599_vm9, %v3584_v32, %v3586_v57  ;;  %3619 = vst.msk [vmem:[#allocation4 + $0x48] sm:$0xff] %vm3616_vm10, %v3584_v32  ;;  %4759 = vmatprep.subr.bf16.mxu0 %v8318_v2  ;;  %v8366_v2 = vld [vmem:[#allocation5 + $0x10c] ss:$16 sps:$4 sm:$0xff]   ;;  %v8364_v57 = vld [vmem:[#allocation5 + $0x108] ss:$16 sps:$4 sm:$0xff]  }
 0x88a   :  { %3620 = vst.msk [vmem:[#allocation4 + $0x50] sm:$0xff] %vm3484_vm8, %v3601_v28  ;;  %v3594_v29 = vpop.permute.xlu0 %3593  ;;  %v8369_v32 = vld [vmem:[#allocation5 + $0x12c] ss:$16 sps:$4 sm:$0xff]  }
 0x88b   :  { %v8372_v28 = vld [vmem:[#allocation5 + $0x14c] ss:$16 sps:$4 sm:$0xff]  }
 0x88c   :  { %4760 = vmatpush1.bf16.msra.mxu0 %v8316_v11  ;;  %v3592_v55 = vpop.permute.xlu1 %3591  ;;  %v8367_v11 = vld [vmem:[#allocation5 + $0x128] ss:$16 sps:$4 sm:$0xff]  }
 0x88d   :  { %v3603_v49 = vsel %vm3599_vm9, %v3592_v55, %v3594_v29  ;;  %3623 = vst.msk [vmem:[#allocation4 + $0x78] sm:$0xff] %vm3616_vm10, %v3592_v55  ;;  %4761 = vmatprep.subr.bf16.mxu0 %v8321_v53  ;;  %v8370_v53 = vld [vmem:[#allocation5 + $0x148] ss:$16 sps:$4 sm:$0xff]   ;;  %v8375_v29 = vld [vmem:[#allocation5 + $0x16c] ss:$16 sps:$4 sm:$0xff]  }
 0x88e   :  { %3624 = vst.msk [vmem:[#allocation4 + $0x80] sm:$0xff] %vm3484_vm8, %v3603_v49  ;;  %v8373_v55 = vld [vmem:[#allocation5 + $0x168] ss:$16 sps:$4 sm:$0xff]  }
 0x88f   :  { %v8376_v49 = vld [vmem:[#allocation5 + $0x188] ss:$16 sps:$4 sm:$0xff]  }
 0x890   :  { %4762 = vmatpush1.bf16.msra.mxu0 %v8319_v47  ;;  %v3631_v7 = vld [vmem:[#allocation4 + $0x48] sm:$0xff]  ;;  %v8378_v47 = vld [vmem:[#allocation5 + $0x18c] ss:$16 sps:$4 sm:$0xff]  }
 0x891   :  { %4763 = vmatprep.subr.bf16.mxu0 %v8324_v34  ;;  %v3632_v36 = vld [vmem:[#allocation4 + $0x50] sm:$0xff]  ;;  %v10303_v13 = vpack.c.bf16 %v3631_v7, %v10295_v58 }
 0x892   :  { %v3638_v37 = vpack.c.bf16 %v3632_v36, %v10295_v58  ;;  %v8381_v34 = vld [vmem:[#allocation5 + $0x1ac] ss:$16 sps:$4 sm:$0xff]  }
 0x894   :  { %4764 = vmatpush1.bf16.msra.mxu0 %v8322_v51  ;;  %4771 = vmatprep.mubr.bf16.mxu0 %v3638_v37  ;;  %v3634_v5 = vld [vmem:[#allocation4 + $0x78] sm:$0xff]  ;;  %v8379_v51 = vld [vmem:[#allocation5 + $0x1a8] ss:$16 sps:$4 sm:$0xff]  }
 0x895   :  { %4765 = vmatprep.subr.bf16.mxu0 %v8327_v60  ;;  %v3635_v16 = vld [vmem:[#allocation4 + $0x80] sm:$0xff]  ;;  %v10298_v12 = vpack.c.bf16 %v3634_v5, %v3631_v7  ;;  %v10309_v24 = vpack.c.bf16 %v3634_v5, %v3634_v5 }
 0x896   :  { %v10300_v23 = vpack.c.bf16 %v3635_v16, %v3632_v36  ;;  %v10305_v41 = vpack.c.bf16 %v3635_v16, %v3635_v16  ;;  %v8384_v36 = vld [vmem:[#allocation5 + $0x1cc] ss:$16 sps:$4 sm:$0xff]  }
 0x898   :  { %4766 = vmatpush1.bf16.msra.mxu0 %v8325_v10 }
 0x899   :  { %4767 = vmatprep.subr.bf16.mxu0 %v8330_v4  ;;  %v8382_v4 = vld [vmem:[#allocation5 + $0x1c8] ss:$16 sps:$4 sm:$0xff]  }
 0x89c   :  { %4768 = vmatpush1.bf16.msra.mxu0 %v8328_v15 }
 0x89d   :  { %4769 = vmatprep.subr.bf16.mxu0 %v8333_v25  ;;  %v8387_v25 = vld [vmem:[#allocation5 + $0x1ec] ss:$16 sps:$4 sm:$0xff]  }
 0x8a0   :  { %4770 = vmatpush1.bf16.msra.mxu0 %v8331_v44 }
 0x8a1   :  { %4790 = vmatprep.subr.bf16.mxu0 %v8336_v26  ;;  %v8385_v26 = vld [vmem:[#allocation5 + $0x1e8] ss:$16 sps:$4 sm:$0xff]  }
 0x8a3   :  { %4772 = vmatmul.mubr.bf16.vlgmr.msra.gmra.mrb[44].mxu0 %v10303_v13 }
 0x8a4   :  { %4781 = vmatprep.mubr.bf16.mxu0 %v10305_v41  ;;  %4791 = vmatpush1.bf16.msra.mxu0 %v8334_v35 }
 0x8a5   :  { %4792 = vmatprep.subr.bf16.mxu0 %v8339_v27 }
 0x8a8   :  { %4793 = vmatpush1.bf16.msra.mxu0 %v8337_v54 }
 0x8a9   :  { %4841 = vmatprep.subr.bf16.mxu0 %v8342_v20  ;;  %v8388_v20 = vld [vmem:[#allocation5 + $0x208] ss:$16 sps:$4 sm:$0xff]  }
 0x8ab   :  { %4782 = vmatmul.mubr.bf16.gmra.mrb[48].mxu0 %v10309_v24 }
 0x8ac   :  { %4822 = vmatprep.mubr.bf16.mxu0 %v8611_v1 }
 0x8b3   :  { %7217 = vmatmul.mubr.msk.bf16.vlgmr.msra.gmra.mrb[44].mxu0 %vm138_vm0, %v10316_v19 }
 0x8b4   :  { %4842 = vmatpush1.bf16.msra.mxu0 %v8340_v21  ;;  %4832 = vmatprep.mubr.bf16.mxu0 %v8611_v1  ;;  %v8393_v21 = vld [vmem:[#allocation5 + $0x22c] ss:$16 sps:$4 sm:$0xff]  }
 0x8b5   :  { %4843 = vmatprep.subr.bf16.mxu0 %v8345_v63  ;;  %v8396_v63 = vld [vmem:[#allocation5 + $0x484] ss:$16 sps:$4 sm:$0xff]  }
 0x8b8   :  { %4844 = vmatpush1.bf16.msra.mxu0 %v8343_v50  ;;  %v8397_v50 = vld [vmem:[#allocation5 + $0x4a0] ss:$16 sps:$4 sm:$0xff]  }
 0x8b9   :  { %4845 = vmatprep.subr.bf16.mxu0 %v8348_v56  ;;  %v8405_v56 = vld [vmem:[#allocation5 + $0x4e4] ss:$16 sps:$4 sm:$0xff]  }
 0x8bb   :  { %7218 = vmatmul.mubr.msk.bf16.gmra.mrb[48].mxu0 %vm138_vm0, %v10325_v45 }
 0x8bc   :  { %4846 = vmatpush1.bf16.msra.mxu0 %v8346_v0  ;;  %4873 = vmatprep.mubr.bf16.mxu0 %v3638_v37  ;;  %v8408_v0 = vld [vmem:[#allocation5 + $0x504] ss:$16 sps:$4 sm:$0xff]  }
 0x8bd   :  { %4847 = vmatprep.subr.bf16.mxu0 %v8351_v39  ;;  %v8411_v39 = vld [vmem:[#allocation5 + $0x524] ss:$16 sps:$4 sm:$0xff]  }
 0x8c0   :  { %4848 = vmatpush1.bf16.msra.mxu0 %v8349_v14  ;;  %v8409_v14 = vld [vmem:[#allocation5 + $0x520] ss:$16 sps:$4 sm:$0xff]  }
 0x8c1   :  { %4849 = vmatprep.subr.bf16.mxu0 %v8354_v17  ;;  %v8414_v17 = vld [vmem:[#allocation5 + $0x544] ss:$16 sps:$4 sm:$0xff]  }
 0x8c4   :  { %4850 = vmatpush1.bf16.msra.mxu0 %v8352_v59  ;;  %v8412_v59 = vld [vmem:[#allocation5 + $0x540] ss:$16 sps:$4 sm:$0xff]  }
 0x8c5   :  { %4851 = vmatprep.subr.bf16.mxu0 %v8357_v40  ;;  %v8417_v40 = vld [vmem:[#allocation5 + $0x564] ss:$16 sps:$4 sm:$0xff]  }
 0x8c8   :  { %4852 = vmatpush1.bf16.msra.mxu0 %v8355_v8  ;;  %v8420_v8 = vld [vmem:[#allocation5 + $0x584] ss:$16 sps:$4 sm:$0xff]  }
 0x8c9   :  { %4853 = vmatprep.subr.bf16.mxu0 %v8360_v9  ;;  %v8418_v9 = vld [vmem:[#allocation5 + $0x580] ss:$16 sps:$4 sm:$0xff]  }
 0x8cc   :  { %4854 = vmatpush1.bf16.msra.mxu0 %v8358_v46  ;;  %v8423_v46 = vld [vmem:[#allocation5 + $0x5a4] ss:$16 sps:$4 sm:$0xff]  }
 0x8cd   :  { %4855 = vmatprep.subr.bf16.mxu0 %v8363_v31  ;;  %v8421_v31 = vld [vmem:[#allocation5 + $0x5a0] ss:$16 sps:$4 sm:$0xff]  }
 0x8d0   :  { %4856 = vmatpush1.bf16.msra.mxu0 %v8361_v52  ;;  %v8426_v52 = vld [vmem:[#allocation5 + $0x5c4] ss:$16 sps:$4 sm:$0xff]  }
 0x8d1   :  { %4857 = vmatprep.subr.bf16.mxu0 %v8366_v2  ;;  %v8424_v2 = vld [vmem:[#allocation5 + $0x5c0] ss:$16 sps:$4 sm:$0xff]  }
 0x8d4   :  { %4858 = vmatpush1.bf16.msra.mxu0 %v8364_v57  ;;  %v8429_v57 = vld [vmem:[#allocation5 + $0x5e4] ss:$16 sps:$4 sm:$0xff]  }
 0x8d5   :  { %4859 = vmatprep.subr.bf16.mxu0 %v8369_v32  ;;  %v8427_v32 = vld [vmem:[#allocation5 + $0x5e0] ss:$16 sps:$4 sm:$0xff]  }
 0x8d8   :  { %4860 = vmatpush1.bf16.msra.mxu0 %v8367_v11  ;;  %v8432_v11 = vld [vmem:[#allocation5 + $0x604] ss:$16 sps:$4 sm:$0xff]  }
 0x8d9   :  { %4861 = vmatprep.subr.bf16.mxu0 %v8372_v28  ;;  %v8430_v28 = vld [vmem:[#allocation5 + $0x600] ss:$16 sps:$4 sm:$0xff]  }
 0x8dc   :  { %4862 = vmatpush1.bf16.msra.mxu0 %v8370_v53  ;;  %v8435_v53 = vld [vmem:[#allocation5 + $0x624] ss:$16 sps:$4 sm:$0xff]  }
 0x8dd   :  { %4863 = vmatprep.subr.bf16.mxu0 %v8375_v29  ;;  %v8433_v29 = vld [vmem:[#allocation5 + $0x620] ss:$16 sps:$4 sm:$0xff]  }
 0x8e0   :  { %4864 = vmatpush1.bf16.msra.mxu0 %v8373_v55  ;;  %v8438_v55 = vld [vmem:[#allocation5 + $0x644] ss:$16 sps:$4 sm:$0xff]  }
 0x8e1   :  { %4865 = vmatprep.subr.bf16.mxu0 %v8378_v47  ;;  %v8436_v47 = vld [vmem:[#allocation5 + $0x640] ss:$16 sps:$4 sm:$0xff]  }
 0x8e4   :  { %4866 = vmatpush1.bf16.msra.mxu0 %v8376_v49  ;;  %v8441_v49 = vld [vmem:[#allocation5 + $0x664] ss:$16 sps:$4 sm:$0xff]  }
 0x8e5   :  { %4867 = vmatprep.subr.bf16.mxu0 %v8381_v34  ;;  %v8439_v34 = vld [vmem:[#allocation5 + $0x660] ss:$16 sps:$4 sm:$0xff]  }
 0x8e6   :  { %v4203_v60 = vpop.f32.mrb[28].mxu0 }
 0x8e7   :  { %v10330_v37 = vadd.f32 %v10275_v48, %v4203_v60  ;;  %v4205_v10 = vpop.f32.mrb[29].mxu0  ;;  %v8390_v48 = vld [vmem:[#allocation5 + $0x20c] ss:$16 sps:$4 sm:$0xff]   ;;  %v10359_v60 = vpack.c.bf16 %v10295_v58, %v10295_v58 }
 0x8e8   :  { %4868 = vmatpush1.bf16.msra.mxu0 %v8379_v51  ;;  %v10333_v7 = vadd.f32 %v10277_v30, %v4205_v10  ;;  %v4207_v5 = vpop.f32.mrb[30].mxu0  ;;  %v8444_v51 = vld [vmem:[#allocation5 + $0x684] ss:$16 sps:$4 sm:$0xff]  }
 0x8e9   :  { %v10336_v16 = vadd.f32 %v10279_v6, %v4207_v5  ;;  %4869 = vmatprep.subr.bf16.mxu0 %v8384_v36  ;;  %v4209_v15 = vpop.f32.mrb[31].mxu0  ;;  %v8442_v36 = vld [vmem:[#allocation5 + $0x680] ss:$16 sps:$4 sm:$0xff]   ;;  %v8447_v10 = vld [vmem:[#allocation5 + $0x6a4] ss:$16 sps:$4 sm:$0xff]  }
 0x8ea   :  { %v10339_v44 = vadd.f32 %v10283_v33, %v4209_v15  ;;  %v8391_v33 = vld [vmem:[#allocation5 + $0x228] ss:$16 sps:$4 sm:$0xff]   ;;  %v8445_v5 = vld [vmem:[#allocation5 + $0x6a0] ss:$16 sps:$4 sm:$0xff]   ;;  %v10367_v15 = vpack.c.bf16 %v10321_v42, %v10313_v43  ;;  %v8462_v42 = vld [vmem:[#allocation5 + $0x50c] ss:$16 sps:$4 sm:$0xff]  }
 0x8eb   :  { %v8457_v43 = vld [vmem:[#allocation5 + $0x4e8] ss:$16 sps:$4 sm:$0xff]  }
 0x8ec   :  { %4870 = vmatpush1.bf16.msra.mxu0 %v8382_v4  ;;  %v8450_v4 = vld [vmem:[#allocation5 + $0x48c] ss:$16 sps:$4 sm:$0xff]  }
 0x8ed   :  { %4871 = vmatprep.subr.bf16.mxu0 %v8387_v25  ;;  %v8448_v25 = vld [vmem:[#allocation5 + $0x488] ss:$16 sps:$4 sm:$0xff]  }
 0x8ee   :  { %v4213_v35 = vpop.f32.mrb[32].mxu0 }
 0x8ef   :  { %v10342_v27 = vadd.f32 %v10285_v3, %v4213_v35  ;;  %v4215_v30 = vpop.f32.mrb[33].mxu0  ;;  %v8394_v3 = vld [vmem:[#allocation5 + $0x480] ss:$16 sps:$4 sm:$0xff]  }
 0x8f0   :  { %4872 = vmatpush1.bf16.msra.mxu0 %v8385_v26  ;;  %v10345_v54 = vadd.f32 %v10287_v62, %v4215_v30  ;;  %v4217_v6 = vpop.f32.mrb[34].mxu0  ;;  %v8399_v62 = vld [vmem:[#allocation5 + $0x4a4] ss:$16 sps:$4 sm:$0xff]   ;;  %v8453_v26 = vld [vmem:[#allocation5 + $0x4ac] ss:$16 sps:$4 sm:$0xff]  }
 0x8f1   :  { %4892 = vmatprep.subr.bf16.mxu0 %v8390_v48  ;;  %v4218_v18 = vpop.f32.mrb[35].mxu0  ;;  %v8451_v48 = vld [vmem:[#allocation5 + $0x4a8] ss:$16 sps:$4 sm:$0xff]   ;;  %v4952_v35 = vld [vmem:[#allocation4 + $0xb8] sm:$0xff]  ;;  %v8456_v30 = vld [vmem:[#allocation5 + $0x4cc] ss:$16 sps:$4 sm:$0xff]  }
 0x8f2   :  { %v10372_v6 = vpack.c.bf16 %v4952_v35, %v4952_v35  ;;  %v8459_v18 = vld [vmem:[#allocation5 + $0x4ec] ss:$16 sps:$4 sm:$0xff]  }
 0x8f3   :  { %4874 = vmatmul.mubr.bf16.vlgmr.msra.gmra.mrb[36].mxu0 %v10303_v13  ;;  %v8402_v13 = vld [vmem:[#allocation5 + $0x4c4] ss:$16 sps:$4 sm:$0xff]  }
 0x8f4   :  { %4883 = vmatprep.mubr.bf16.mxu0 %v10305_v41  ;;  %4893 = vmatpush1.bf16.msra.mxu0 %v8388_v20  ;;  %v8400_v41 = vld [vmem:[#allocation5 + $0x4c0] ss:$16 sps:$4 sm:$0xff]   ;;  %v8454_v20 = vld [vmem:[#allocation5 + $0x4c8] ss:$16 sps:$4 sm:$0xff]  }
 0x8f5   :  { %4894 = vmatprep.subr.bf16.mxu0 %v8393_v21  ;;  %v8460_v21 = vld [vmem:[#allocation5 + $0x508] ss:$16 sps:$4 sm:$0xff]  }
 0x8f8   :  { %4895 = vmatpush1.bf16.msra.mxu0 %v8391_v33  ;;  %v8465_v33 = vld [vmem:[#allocation5 + $0x52c] ss:$16 sps:$4 sm:$0xff]  }
 0x8f9   :  { %5398 = vmatprep.subr.bf16.mxu0 %v8396_v63  ;;  %v8463_v63 = vld [vmem:[#allocation5 + $0x528] ss:$16 sps:$4 sm:$0xff]  }
 0x8fb   :  { %4884 = vmatmul.mubr.bf16.gmra.mrb[40].mxu0 %v10309_v24  ;;  %v8403_v24 = vld [vmem:[#allocation5 + $0x4e0] ss:$16 sps:$4 sm:$0xff]  }
 0x8fc   :  { %4924 = vmatprep.mubr.bf16.mxu0 %v8611_v1 }
 0x903   :  { %7219 = vmatmul.mubr.msk.bf16.vlgmr.msra.gmra.mrb[36].mxu0 %vm138_vm0, %v10316_v19  ;;  %v8406_v19 = vld [vmem:[#allocation5 + $0x500] ss:$16 sps:$4 sm:$0xff]  }
 0x904   :  { %5399 = vmatpush1.bf16.msra.mxu0 %v8394_v3  ;;  %4934 = vmatprep.mubr.bf16.mxu0 %v8611_v1  ;;  %v8468_v3 = vld [vmem:[#allocation5 + $0x54c] ss:$16 sps:$4 sm:$0xff]  }
 0x905   :  { %5400 = vmatprep.subr.bf16.mxu0 %v8399_v62  ;;  %v8466_v62 = vld [vmem:[#allocation5 + $0x548] ss:$16 sps:$4 sm:$0xff]  }
 0x908   :  { %5401 = vmatpush1.bf16.msra.mxu0 %v8397_v50  ;;  %v8471_v50 = vld [vmem:[#allocation5 + $0x56c] ss:$16 sps:$4 sm:$0xff]  }
 0x909   :  { %5402 = vmatprep.subr.bf16.mxu0 %v8402_v13  ;;  %v8469_v13 = vld [vmem:[#allocation5 + $0x568] ss:$16 sps:$4 sm:$0xff]  }
 0x90b   :  { %7220 = vmatmul.mubr.msk.bf16.gmra.mrb[40].mxu0 %vm138_vm0, %v10325_v45  ;;  %v8415_v45 = vld [vmem:[#allocation5 + $0x560] ss:$16 sps:$4 sm:$0xff]  }
 0x90c   :  { %5403 = vmatpush1.bf16.msra.mxu0 %v8400_v41  ;;  %5430 = vmatprep.mubr.bf16.mxu0 %v10300_v23  ;;  %v8474_v41 = vld [vmem:[#allocation5 + $0x58c] ss:$16 sps:$4 sm:$0xff]  }
 0x90d   :  { %5404 = vmatprep.subr.bf16.mxu0 %v8405_v56  ;;  %v8477_v56 = vld [vmem:[#allocation5 + $0x5ac] ss:$16 sps:$4 sm:$0xff]  }
 0x910   :  { %5405 = vmatpush1.bf16.msra.mxu0 %v8403_v24  ;;  %v8475_v24 = vld [vmem:[#allocation5 + $0x5a8] ss:$16 sps:$4 sm:$0xff]  }
 0x911   :  { %5406 = vmatprep.subr.bf16.mxu0 %v8408_v0  ;;  %v8480_v0 = vld [vmem:[#allocation5 + $0x5cc] ss:$16 sps:$4 sm:$0xff]  }
 0x914   :  { %5407 = vmatpush1.bf16.msra.mxu0 %v8406_v19  ;;  %v8478_v19 = vld [vmem:[#allocation5 + $0x5c8] ss:$16 sps:$4 sm:$0xff]  }
 0x915   :  { %5408 = vmatprep.subr.bf16.mxu0 %v8411_v39  ;;  %v8483_v39 = vld [vmem:[#allocation5 + $0x5ec] ss:$16 sps:$4 sm:$0xff]  }
 0x918   :  { %5409 = vmatpush1.bf16.msra.mxu0 %v8409_v14  ;;  %v8481_v14 = vld [vmem:[#allocation5 + $0x5e8] ss:$16 sps:$4 sm:$0xff]  }
 0x919   :  { %5410 = vmatprep.subr.bf16.mxu0 %v8414_v17  ;;  %v8486_v17 = vld [vmem:[#allocation5 + $0x60c] ss:$16 sps:$4 sm:$0xff]  }
 0x91c   :  { %5411 = vmatpush1.bf16.msra.mxu0 %v8412_v59  ;;  %v8484_v59 = vld [vmem:[#allocation5 + $0x608] ss:$16 sps:$4 sm:$0xff]  }
 0x91d   :  { %5412 = vmatprep.subr.bf16.mxu0 %v8417_v40  ;;  %v8489_v40 = vld [vmem:[#allocation5 + $0x62c] ss:$16 sps:$4 sm:$0xff]  }
 0x920   :  { %5413 = vmatpush1.bf16.msra.mxu0 %v8415_v45  ;;  %v8487_v45 = vld [vmem:[#allocation5 + $0x628] ss:$16 sps:$4 sm:$0xff]  }
 0x921   :  { %5414 = vmatprep.subr.bf16.mxu0 %v8420_v8  ;;  %v8492_v8 = vld [vmem:[#allocation5 + $0x64c] ss:$16 sps:$4 sm:$0xff]  }
 0x924   :  { %5415 = vmatpush1.bf16.msra.mxu0 %v8418_v9  ;;  %v8490_v9 = vld [vmem:[#allocation5 + $0x648] ss:$16 sps:$4 sm:$0xff]  }
 0x925   :  { %5416 = vmatprep.subr.bf16.mxu0 %v8423_v46  ;;  %v8495_v46 = vld [vmem:[#allocation5 + $0x66c] ss:$16 sps:$4 sm:$0xff]  }
 0x928   :  { %5417 = vmatpush1.bf16.msra.mxu0 %v8421_v31  ;;  %v8493_v31 = vld [vmem:[#allocation5 + $0x668] ss:$16 sps:$4 sm:$0xff]  }
 0x929   :  { %5418 = vmatprep.subr.bf16.mxu0 %v8426_v52  ;;  %v8498_v52 = vld [vmem:[#allocation5 + $0x68c] ss:$16 sps:$4 sm:$0xff]  }
 0x92c   :  { %5419 = vmatpush1.bf16.msra.mxu0 %v8424_v2  ;;  %v8496_v2 = vld [vmem:[#allocation5 + $0x688] ss:$16 sps:$4 sm:$0xff]  }
 0x92d   :  { %5420 = vmatprep.subr.bf16.mxu0 %v8429_v57  ;;  %v8501_v57 = vld [vmem:[#allocation5 + $0x6ac] ss:$16 sps:$4 sm:$0xff]  }
 0x930   :  { %5421 = vmatpush1.bf16.msra.mxu0 %v8427_v32  ;;  %v8499_v32 = vld [vmem:[#allocation5 + $0x6a8] ss:$16 sps:$4 sm:$0xff]  }
 0x931   :  { %5422 = vmatprep.subr.bf16.mxu0 %v8432_v11  ;;  %v8503_v11 = vld [vmem:[%s10673_s9 + $0x80] sm:$0xff]  }
 0x934   :  { %5423 = vmatpush1.bf16.msra.mxu0 %v8430_v28  ;;  %v8504_v28 = vld [vmem:[%s10673_s9 + $0xc8] sm:$0xff]  }
 0x935   :  { %5424 = vmatprep.subr.bf16.mxu0 %v8435_v53  ;;  %v8506_v53 = vld [vmem:[%s10673_s9 + $0xd0] sm:$0xff]  }
 0x938   :  { %5425 = vmatpush1.bf16.msra.mxu0 %v8433_v29  ;;  %v8507_v29 = vld [vmem:[%s10673_s9 + $0x90] sm:$0xff]  }
 0x939   :  { %5426 = vmatprep.subr.bf16.mxu0 %v8438_v55  ;;  %v8508_v55 = vld [vmem:[%s10673_s9 + $0xd8] sm:$0xff]  }
 0x93c   :  { %5427 = vmatpush1.bf16.msra.mxu0 %v8436_v47  ;;  %v8509_v47 = vld [vmem:[%s10673_s9 + $0x98] sm:$0xff]  }
 0x93d   :  { %5428 = vmatprep.subr.bf16.mxu0 %v8441_v49  ;;  %v8510_v49 = vld [vmem:[%s10673_s9 + $0xe0] sm:$0xff]  }
 0x940   :  { %5429 = vmatpush1.bf16.msra.mxu0 %v8439_v34  ;;  %v8511_v34 = vld [vmem:[%s10673_s9 + $0xa0] sm:$0xff]  }
 0x941   :  { %5449 = vmatprep.subr.bf16.mxu0 %v8444_v51  ;;  %v8512_v51 = vld [vmem:[%s10673_s9 + $0xe8] sm:$0xff]  }
 0x943   :  { %5431 = vmatmul.mubr.bf16.vlgmr.msra.gmra.mrb[44].mxu0 %v10298_v12 }
 0x944   :  { %5450 = vmatpush1.bf16.msra.mxu0 %v8442_v36  ;;  %5440 = vmatprep.mubr.bf16.mxu0 %v10359_v60  ;;  %v8513_v36 = vld [vmem:[%s10673_s9 + $0xa8] sm:$0xff]  }
 0x945   :  { %5451 = vmatprep.subr.bf16.mxu0 %v8447_v10  ;;  %v8515_v10 = vld [vmem:[%s10673_s9 + $0xb0] sm:$0xff]  }
 0x948   :  { %5452 = vmatpush1.bf16.msra.mxu0 %v8445_v5  ;;  %v8516_v5 = vld [vmem:[%s10673_s9 + $0xf8] sm:$0xff]  }
 0x949   :  { %5500 = vmatprep.subr.bf16.mxu0 %v8450_v4  ;;  %v8517_v4 = vld [vmem:[%s10673_s9 + $0xb8] sm:$0xff]  }
 0x94b   :  { %5441 = vmatmul.mubr.bf16.gmra.mrb[48].mxu0 %v10359_v60 }
 0x94c   :  { %5481 = vmatprep.mubr.bf16.mxu0 %v8611_v1 }
 0x953   :  { %7293 = vmatmul.mubr.msk.bf16.vlgmr.msra.gmra.mrb[44].mxu0 %vm138_vm0, %v10367_v15 }
 0x954   :  { %5501 = vmatpush1.bf16.msra.mxu0 %v8448_v25  ;;  %5491 = vmatprep.mubr.bf16.mxu0 %v8611_v1 }
 0x955   :  { %5502 = vmatprep.subr.bf16.mxu0 %v8453_v26 }
 0x958   :  { %5503 = vmatpush1.bf16.msra.mxu0 %v8451_v48 }
 0x959   :  { %5504 = vmatprep.subr.bf16.mxu0 %v8456_v30 }
 0x95b   :  { %7294 = vmatmul.mubr.msk.bf16.gmra.mrb[48].mxu0 %vm138_vm0, %v10372_v6 }
 0x95c   :  { %5505 = vmatpush1.bf16.msra.mxu0 %v8454_v20  ;;  %5532 = vmatprep.mubr.bf16.mxu0 %v10300_v23  ;;  %v8472_v23 = vld [vmem:[#allocation5 + $0x588] ss:$16 sps:$4 sm:$0xff]  }
 0x95d   :  { %5506 = vmatprep.subr.bf16.mxu0 %v8459_v18 }
 0x960   :  { %5507 = vmatpush1.bf16.msra.mxu0 %v8457_v43 }
 0x961   :  { %5508 = vmatprep.subr.bf16.mxu0 %v8462_v42 }
 0x964   :  { %5509 = vmatpush1.bf16.msra.mxu0 %v8460_v21 }
 0x965   :  { %5510 = vmatprep.subr.bf16.mxu0 %v8465_v33 }
 0x968   :  { %5511 = vmatpush1.bf16.msra.mxu0 %v8463_v63 }
 0x969   :  { %5512 = vmatprep.subr.bf16.mxu0 %v8468_v3 }
 0x96c   :  { %5513 = vmatpush1.bf16.msra.mxu0 %v8466_v62 }
 0x96d   :  { %5514 = vmatprep.subr.bf16.mxu0 %v8471_v50 }
 0x970   :  { %5515 = vmatpush1.bf16.msra.mxu0 %v8469_v13 }
 0x971   :  { %5516 = vmatprep.subr.bf16.mxu0 %v8474_v41 }
 0x974   :  { %5517 = vmatpush1.bf16.msra.mxu0 %v8472_v23 }
 0x975   :  { %5518 = vmatprep.subr.bf16.mxu0 %v8477_v56 }
 0x978   :  { %5519 = vmatpush1.bf16.msra.mxu0 %v8475_v24 }
 0x979   :  { %5520 = vmatprep.subr.bf16.mxu0 %v8480_v0 }
 0x97c   :  { %5521 = vmatpush1.bf16.msra.mxu0 %v8478_v19 }
 0x97d   :  { %5522 = vmatprep.subr.bf16.mxu0 %v8483_v39 }
 0x980   :  { %5523 = vmatpush1.bf16.msra.mxu0 %v8481_v14 }
 0x981   :  { %5524 = vmatprep.subr.bf16.mxu0 %v8486_v17 }
 0x984   :  { %5525 = vmatpush1.bf16.msra.mxu0 %v8484_v59 }
 0x985   :  { %5526 = vmatprep.subr.bf16.mxu0 %v8489_v40 }
 0x988   :  { %5527 = vmatpush1.bf16.msra.mxu0 %v8487_v45 }
 0x989   :  { %5528 = vmatprep.subr.bf16.mxu0 %v8492_v8 }
 0x98c   :  { %5529 = vmatpush1.bf16.msra.mxu0 %v8490_v9 }
 0x98d   :  { %5530 = vmatprep.subr.bf16.mxu0 %v8495_v46 }
 0x990   :  { %5531 = vmatpush1.bf16.msra.mxu0 %v8493_v31 }
 0x991   :  { %5551 = vmatprep.subr.bf16.mxu0 %v8498_v52 }
 0x993   :  { %5533 = vmatmul.mubr.bf16.vlgmr.msra.gmra.mrb[36].mxu0 %v10298_v12  ;;  %v8502_v12 = vld [vmem:[%s10673_s9 + $0xc0] sm:$0xff]  }
 0x994   :  { %5552 = vmatpush1.bf16.msra.mxu0 %v8496_v2  ;;  %5542 = vmatprep.mubr.bf16.mxu0 %v10359_v60 }
 0x995   :  { %5553 = vmatprep.subr.bf16.mxu0 %v8501_v57  ;;  %7476 = vmatprep.subr.bf16.mxu1 %v8502_v12 }
 0x996   :  { %7477 = vmatpush3.bf16.msra.mxu1 %v8503_v11 }
 0x997   :  { %7478 = vmatprep.subr.bf16.mxu1 %v8504_v28 }
 0x998   :  { %5554 = vmatpush1.bf16.msra.mxu0 %v8499_v32 }
 0x99b   :  { %5543 = vmatmul.mubr.bf16.gmra.mrb[40].mxu0 %v10359_v60  ;;  %v8514_v60 = vld [vmem:[%s10673_s9 + $0xf0] sm:$0xff]  }
 0x99c   :  { %5583 = vmatprep.mubr.bf16.mxu0 %v8611_v1 }
 0x9a3   :  { %7295 = vmatmul.mubr.msk.bf16.vlgmr.msra.gmra.mrb[36].mxu0 %vm138_vm0, %v10367_v15  ;;  %v8518_v15 = vld [vmem:[%s10673_s9 + $0x40] sm:$0xff]  }
 0x9a4   :  { %5593 = vmatprep.mubr.bf16.mxu0 %v8611_v1  ;;  %v8505_v1 = vld [vmem:[%s10673_s9 + $0x88] sm:$0xff]  }
 0x9a5   :  { %7479 = vmatpush3.bf16.msra.mxu1 %v8505_v1 }
 0x9a6   :  { %7480 = vmatprep.subr.bf16.mxu1 %v8506_v53  ;;  %v8519_v53 = vld [vmem:[%s10673_s9] sm:$0xff]  }
 0x9a9   :  { %7481 = vmatpush3.bf16.msra.mxu1 %v8507_v29 }
 0x9aa   :  { %7482 = vmatprep.subr.bf16.mxu1 %v8508_v55 }
 0x9ab   :  { %7296 = vmatmul.mubr.msk.bf16.gmra.mrb[40].mxu0 %vm138_vm0, %v10372_v6  ;;  %vm6569_vm0 = vcmask 80896  }
 0x9ad   :  { %7483 = vmatpush3.bf16.msra.mxu1 %v8509_v47  ;;  %v8520_v47 = vld [vmem:[%s10673_s9 + $0x48] sm:$0xff]  }
 0x9ae   :  { %7484 = vmatprep.subr.bf16.mxu1 %v8510_v49 }
 0x9b1   :  { %7485 = vmatpush3.bf16.msra.mxu1 %v8511_v34  ;;  %v8521_v34 = vld [vmem:[%s10673_s9 + $0x8] sm:$0xff]  }
 0x9b2   :  { %7486 = vmatprep.subr.bf16.mxu1 %v8512_v51  ;;  %v8522_v51 = vld [vmem:[%s10673_s9 + $0x50] sm:$0xff]  }
 0x9b5   :  { %7487 = vmatpush3.bf16.msra.mxu1 %v8513_v36  ;;  %v8523_v36 = vld [vmem:[%s10673_s9 + $0x10] sm:$0xff]  }
 0x9b6   :  { %7488 = vmatprep.subr.bf16.mxu1 %v8514_v60  ;;  %v8524_v60 = vld [vmem:[%s10673_s9 + $0x58] sm:$0xff]  }
 0x9b9   :  { %7489 = vmatpush3.bf16.msra.mxu1 %v8515_v10  ;;  %v8525_v10 = vld [vmem:[%s10673_s9 + $0x18] sm:$0xff]  }
 0x9ba   :  { %7490 = vmatprep.subr.bf16.mxu1 %v8516_v5  ;;  %v8526_v5 = vld [vmem:[%s10673_s9 + $0x60] sm:$0xff]  }
 0x9bd   :  { %7491 = vmatpush3.bf16.msra.mxu1 %v8517_v4  ;;  %v8527_v4 = vld [vmem:[%s10673_s9 + $0x20] sm:$0xff]  }
 0x9be   :  { %7498 = vmatprep.subr.bf16.mxu1 %v8518_v15  ;;  %v8528_v15 = vld [vmem:[%s10673_s9 + $0x68] sm:$0xff]  }
 0xa26   :  { %v5483_v25 = vpop.f32.mrb[44].mxu0 }
 0xa27   :  { %v10438_v26 = vadd.f32 %v5483_v25, %v10330_v37  ;;  %v5485_v48 = vpop.f32.mrb[45].mxu0  ;;  %v8529_v25 = vld [vmem:[%s10673_s9 + $0x28] sm:$0xff]  }
 0xa28   :  { %v7647_v35 = vadd.f32 %v5485_v48, %v10333_v7  ;;  %v5487_v30 = vpop.f32.mrb[46].mxu0  ;;  %v5630_v7 = vld [vmem:[%s10672_s8] sm:$0x3]  ;;  %v8531_v48 = vld [vmem:[%s10673_s9 + $0x30] sm:$0xff]  }
 0xa29   :  { %v7649_v6 = vadd.f32 %v5487_v30, %v10336_v16  ;;  %v5489_v20 = vpop.f32.mrb[47].mxu0  ;;  %v5639_v56 = vrot.slane %v5630_v7, %v3518_v38  ;;  %v5635_v19 = vrot.slane %v5630_v7, %v3514_v22  ;;  %v8532_v30 = vld [vmem:[%s10673_s9 + $0x78] sm:$0xff]  }
 0xa2a   :  { %v7651_v18 = vadd.f32 %v5489_v20, %v10339_v44  ;;  %v8533_v20 = vld [vmem:[%s10673_s9 + $0x38] sm:$0xff]  }
 0xa2b   :  { %v5614_v43 = vmax.f32 %v10438_v26, %v7649_v6  ;;  %v8541_v7 = vld [vmem:[%s10673_s9 + $0x118] sm:$0xff]  }
 0xa2c   :  { %v5615_v42 = vmax.f32 %v7647_v35, %v7651_v18 }
 0xa2e   :  { %v5493_v21 = vpop.f32.mrb[48].mxu0 }
 0xa2f   :  { %v7653_v33 = vadd.f32 %v5493_v21, %v10342_v27  ;;  %v5495_v63 = vpop.f32.mrb[49].mxu0  ;;  %v8535_v21 = vld [vmem:[%s10673_s9 + $0x100] sm:$0xff]  }
 0xa30   :  { %v7655_v3 = vadd.f32 %v5495_v63, %v10345_v54  ;;  %v5497_v37 = vpop.f32.mrb[50].mxu0  ;;  %v8536_v63 = vld [vmem:[%s10673_s9 + $0x148] sm:$0xff]  }
 0xa31   :  { %v5618_v62 = vmax.f32 %v7649_v6, %v7653_v33  ;;  %v5498_v50 = vpop.f32.mrb[51].mxu0  ;;  %v8537_v37 = vld [vmem:[%s10673_s9 + $0x108] sm:$0xff]  }
 0xa32   :  { %v5619_v13 = vmax.f32 %v7651_v18, %v7655_v3  ;;  %v8539_v50 = vld [vmem:[%s10673_s9 + $0x110] sm:$0xff]  }
 0xa76   :  { %v5585_v16 = vpop.f32.mrb[36].mxu0 }
 0xa77   :  { %v5622_v44 = vmax.f32 %v10438_v26, %v5585_v16  ;;  %v5587_v41 = vpop.f32.mrb[37].mxu0  ;;  %v8530_v26 = vld [vmem:[%s10673_s9 + $0x70] sm:$0xff]  }
 0xa78   :  { %v5623_v23 = vmax.f32 %v7647_v35, %v5587_v41  ;;  %v5589_v27 = vpop.f32.mrb[38].mxu0 }
 0xa79   :  { %v5616_v24 = vmax.f32 %v5585_v16, %v5589_v27  ;;  %v5591_v0 = vpop.f32.mrb[39].mxu0  ;;  %v5642_v35 = vadd.f32 %v5635_v19, %v5622_v44  ;;  %v8542_v16 = vld [vmem:[%s10673_s9 + $0x160] sm:$0xff]  }
 0xa7a   :  { %v5617_v54 = vmax.f32 %v5587_v41, %v5591_v0  ;;  %v5643_v14 = vadd.f32 %v5639_v56, %v5623_v23  ;;  %v8543_v44 = vld [vmem:[%s10673_s9 + $0x120] sm:$0xff]   ;;  %v8544_v41 = vld [vmem:[%s10673_s9 + $0x168] sm:$0xff]  }
 0xa7b   :  { %v5624_v39 = vmax.f32 %v5614_v43, %v5616_v24  ;;  %v5650_v18 = vmax.f32 %v5642_v35, 0.0  ;;  %v8534_v43 = vld [vmem:[%s10673_s9 + $0x140] sm:$0xff]   ;;  %v8545_v23 = vld [vmem:[%s10673_s9 + $0x128] sm:$0xff]   ;;  %v8548_v24 = vld [vmem:[%s10673_s9 + $0x178] sm:$0xff]  }
 0xa7c   :  { %v5625_v17 = vmax.f32 %v5615_v42, %v5617_v54  ;;  %v5651_v52 = vmax.f32 %v5643_v14, 0.0  ;;  %v8551_v14 = vld [vmem:[%s10673_s9 + $0x180] sm:$0xff]  }
 0xa7d   :  { %v5644_v59 = vadd.f32 %v5635_v19, %v5624_v39 }
 0xa7e   :  { %v5595_v40 = vpop.f32.mrb[40].mxu0  ;;  %v5645_v45 = vadd.f32 %v5639_v56, %v5625_v17  ;;  %v5659_v49 = vpack.c.bf16 %v5651_v52, %v5651_v52  ;;  %v8558_v52 = vld [vmem:[%s10673_s9 + $0x1e0] sm:$0xff]  }
 0xa7f   :  { %v5652_v8 = vmax.f32 %v5644_v59, 0.0  ;;  %v5620_v9 = vmax.f32 %v5589_v27, %v5595_v40  ;;  %v5628_v46 = vmax.f32 %v7653_v33, %v5595_v40  ;;  %v5597_v31 = vpop.f32.mrb[41].mxu0  ;;  %v5658_v33 = vpack.c.bf16 %v5650_v18, %v5650_v18  ;;  %v8547_v27 = vld [vmem:[%s10673_s9 + $0x130] sm:$0xff]   ;;  %v8552_v59 = vld [vmem:[%s10673_s9 + $0x1c8] sm:$0xff]  }
 0xa80   :  { %v5621_v2 = vmax.f32 %v5591_v0, %v5597_v31  ;;  %v5629_v38 = vmax.f32 %v7655_v3, %v5597_v31  ;;  %v5599_v57 = vpop.f32.mrb[42].mxu0  ;;  %v5653_v32 = vmax.f32 %v5645_v45, 0.0  ;;  %v8549_v0 = vld [vmem:[%s10673_s9 + $0x138] sm:$0xff]   ;;  %v8553_v45 = vld [vmem:[%s10673_s9 + $0x188] sm:$0xff]  }
 0xa81   :  { %v5626_v12 = vmax.f32 %v5618_v62, %v5620_v9  ;;  %v10454_v11 = vadd.f32 %v5635_v19, %v5628_v46  ;;  %v5600_v61 = vpop.f32.mrb[43].mxu0  ;;  %v5692_v29 = vpack.c.bf16 %v5652_v8, %v5652_v8  ;;  %v8538_v62 = vld [vmem:[%s10673_s9 + $0x150] sm:$0xff]   ;;  %v8556_v46 = vld [vmem:[%s10673_s9 + $0x1d8] sm:$0xff]   ;;  %v8561_v57 = vld [vmem:[%s10673_s9 + $0x1a8] sm:$0xff]  }
 0xa82   :  { %v5627_v22 = vmax.f32 %v5619_v13, %v5621_v2  ;;  %v10456_v28 = vadd.f32 %v5639_v56, %v5629_v38  ;;  %v5693_v1 = vpack.c.bf16 %v5653_v32, %v5653_v32  ;;  %v8540_v13 = vld [vmem:[%s10673_s9 + $0x158] sm:$0xff]   ;;  %v8554_v8 = vld [vmem:[%s10673_s9 + $0x1d0] sm:$0xff]   ;;  %v8559_v2 = vld [vmem:[%s10673_s9 + $0x1a0] sm:$0xff]  }
 0xa83   :  { %v10461_v55 = vadd.f32 %v5635_v19, %v5626_v12  ;;  %v8550_v19 = vld [vmem:[%s10673_s9 + $0x1c0] sm:$0xff]   ;;  %v8555_v9 = vld [vmem:[%s10673_s9 + $0x190] sm:$0xff]   ;;  %v8557_v31 = vld [vmem:[%s10673_s9 + $0x198] sm:$0xff]  }
 0xa84   :  { %5855 = vmatprep.mubr.bf16.mxu1 %v5693_v1  ;;  %v5647_v6 = vadd.f32 %v5639_v56, %v5627_v22  ;;  %v8546_v56 = vld [vmem:[%s10673_s9 + $0x170] sm:$0xff]   ;;  %v5657_v39 = vmax.f32 %v10456_v28, 0.0  ;;  %v8560_v38 = vld [vmem:[%s10673_s9 + $0x1e8] sm:$0xff]   ;;  %v8564_v61 = vld [vmem:[%s10673_s9 + $0x1f8] sm:$0xff]   ;;  %v5656_v28 = vmax.f32 %v10454_v11, 0.0 }
 0xa85   :  { %5856 = vmatmul.mubr.bf16.vlgmr.msra.gmra.mrb[68].mxu1 %v5692_v29  ;;  %v5654_v54 = vmax.f32 %v10461_v55, 0.0  ;;  %v8562_v32 = vld [vmem:[%s10673_s9 + $0x1f0] sm:$0xff]   ;;  %v8565_v22 = vld [vmem:[%s10673_s9 + $0x1b8] sm:$0xff]   ;;  %v8567_v29 = vld [vmem:[%s10675_s11 + $0x8] sm:$0xff]  }
 0xa86   :  { %7499 = vmatpush3.bf16.msra.mxu1 %v8519_v53  ;;  %5991 = vmatprep.mubr.bf16.mxu1 %v5659_v49  ;;  %v5655_v42 = vmax.f32 %v5647_v6, 0.0  ;;  %v6172_v40 = vpack.c.bf16 %v5657_v39, %v5657_v39  ;;  %v8563_v12 = vld [vmem:[%s10673_s9 + $0x1b0] sm:$0xff]   ;;  %v6171_v1 = vpack.c.bf16 %v5656_v28, %v5656_v28  ;;  %v8566_v53 = vld [vmem:[%s10675_s11] sm:$0xff]   ;;  %v8569_v55 = vld [vmem:[%s10675_s11 + $0x18] sm:$0xff]  }
 0xa87   :  { %7500 = vmatprep.subr.bf16.mxu1 %v8520_v47  ;;  %v5999_v17 = vpack.c.bf16 %v5654_v54, %v5654_v54  ;;  %v8568_v11 = vld [vmem:[%s10675_s11 + $0x10] sm:$0xff]   ;;  %v8570_v47 = vld [vmem:[%s10675_s11 + $0x20] sm:$0xff]   ;;  %v8582_v49 = vld [vmem:[#allocation3] sm:$0xff] }
 0xa88   :  { %v6000_v3 = vpack.c.bf16 %v5655_v42, %v5655_v42  ;;  %v8579_v54 = vld [vmem:[%s10677_s13 + $0x28] ss:$0 sps:$4 sm:$0x33]   ;;  %v7458_v39 = vld [vmem:[%s10676_s12] ss:$0 sm:$0xff] }
 0xa8a   :  { %7501 = vmatpush3.bf16.msra.mxu1 %v8521_v34  ;;  %v8571_v34 = vld [vmem:[%s10675_s11 + $0x28] sm:$0xff]  }
 0xa8b   :  { %7502 = vmatprep.subr.bf16.mxu1 %v8522_v51  ;;  %v8572_v51 = vld [vmem:[%s10675_s11 + $0x30] sm:$0xff]  }
 0xa8e   :  { %7503 = vmatpush3.bf16.msra.mxu1 %v8523_v36 }
 0xa8f   :  { %7504 = vmatprep.subr.bf16.mxu1 %v8524_v60 }
 0xa92   :  { %7505 = vmatpush3.bf16.msra.mxu1 %v8525_v10 }
 0xa93   :  { %7506 = vmatprep.subr.bf16.mxu1 %v8526_v5 }
 0xa96   :  { %7507 = vmatpush3.bf16.msra.mxu1 %v8527_v4 }
 0xa97   :  { %7508 = vmatprep.subr.bf16.mxu1 %v8528_v15 }
 0xa9a   :  { %7509 = vmatpush3.bf16.msra.mxu1 %v8529_v25 }
 0xa9b   :  { %7510 = vmatprep.subr.bf16.mxu1 %v8530_v26 }
 0xa9e   :  { %7511 = vmatpush3.bf16.msra.mxu1 %v8531_v48 }
 0xa9f   :  { %7512 = vmatprep.subr.bf16.mxu1 %v8532_v30 }
 0xaa2   :  { %7513 = vmatpush3.bf16.msra.mxu1 %v8533_v20 }
 0xaa3   :  { %7520 = vmatprep.subr.bf16.mxu1 %v8534_v43 }
 0xaa5   :  { %5992 = vmatmul.mubr.bf16.vlgmr.msra.gmra.mrb[72].mxu1 %v5658_v33 }
 0xaa6   :  { %7521 = vmatpush3.bf16.msra.mxu1 %v8535_v21  ;;  %6162 = vmatprep.mubr.bf16.mxu1 %v6000_v3 }
 0xaa7   :  { %7522 = vmatprep.subr.bf16.mxu1 %v8536_v63 }
 0xaaa   :  { %7523 = vmatpush3.bf16.msra.mxu1 %v8537_v37 }
 0xaab   :  { %7524 = vmatprep.subr.bf16.mxu1 %v8538_v62 }
 0xaae   :  { %7525 = vmatpush3.bf16.msra.mxu1 %v8539_v50  ;;  %v7457_v50 = vld [vmem:[%s10674_s10] ss:$0 sm:$0xff] }
 0xaaf   :  { %7526 = vmatprep.subr.bf16.mxu1 %v8540_v13 }
 0xab2   :  { %7527 = vmatpush3.bf16.msra.mxu1 %v8541_v7 }
 0xab3   :  { %7528 = vmatprep.subr.bf16.mxu1 %v8542_v16 }
 0xab6   :  { %7529 = vmatpush3.bf16.msra.mxu1 %v8543_v44 }
 0xab7   :  { %7530 = vmatprep.subr.bf16.mxu1 %v8544_v41  ;;  %v8574_v41 = vld [vmem:[%s10677_s13] sm:$0xff]  }
 0xaba   :  { %7531 = vmatpush3.bf16.msra.mxu1 %v8545_v23 }
 0xabb   :  { %7532 = vmatprep.subr.bf16.mxu1 %v8546_v56  ;;  %v8575_v56 = vld [vmem:[%s10677_s13 + $0x8] sm:$0xff]  }
 0xabe   :  { %7533 = vmatpush3.bf16.msra.mxu1 %v8547_v27  ;;  %v8576_v27 = vld [vmem:[%s10677_s13 + $0x10] sm:$0xff]  }
 0xabf   :  { %7534 = vmatprep.subr.bf16.mxu1 %v8548_v24  ;;  %v8577_v24 = vld [vmem:[%s10677_s13 + $0x18] sm:$0xff]  }
 0xac2   :  { %7535 = vmatpush3.bf16.msra.mxu1 %v8549_v0  ;;  %v8578_v0 = vld [vmem:[%s10677_s13 + $0x20] sm:$0xff]  }
 0xac3   :  { %7542 = vmatprep.subr.bf16.mxu1 %v8550_v19  ;;  %v6527_v19 = vsel %vm6525_vm14, %v8579_v54, 0 }
 0xac5   :  { %6163 = vmatmul.mubr.bf16.vlgmr.msra.gmra.mrb[76].mxu1 %v5999_v17 }
 0xac6   :  { %7543 = vmatpush3.bf16.msra.mxu1 %v8551_v14  ;;  %6334 = vmatprep.mubr.bf16.mxu1 %v6172_v40 }
 0xac7   :  { %7544 = vmatprep.subr.bf16.mxu1 %v8552_v59 }
 0xaca   :  { %7545 = vmatpush3.bf16.msra.mxu1 %v8553_v45 }
 0xacb   :  { %7546 = vmatprep.subr.bf16.mxu1 %v8554_v8 }
 0xace   :  { %7547 = vmatpush3.bf16.msra.mxu1 %v8555_v9 }
 0xacf   :  { %7548 = vmatprep.subr.bf16.mxu1 %v8556_v46  ;;  %v7468_v46 = vld [vmem:[%s10678_s14] ss:$0 sm:$0xff] }
 0xad2   :  { %7549 = vmatpush3.bf16.msra.mxu1 %v8557_v31 }
 0xad3   :  { %7550 = vmatprep.subr.bf16.mxu1 %v8558_v52 }
 0xad6   :  { %7551 = vmatpush3.bf16.msra.mxu1 %v8559_v2 }
 0xad7   :  { %7552 = vmatprep.subr.bf16.mxu1 %v8560_v38 }
 0xada   :  { %7553 = vmatpush3.bf16.msra.mxu1 %v8561_v57 }
 0xadb   :  { %7554 = vmatprep.subr.bf16.mxu1 %v8562_v32 }
 0xade   :  { %7555 = vmatpush3.bf16.msra.mxu1 %v8563_v12 }
 0xadf   :  { %7556 = vmatprep.subr.bf16.mxu1 %v8564_v61 }
 0xae2   :  { %7557 = vmatpush3.bf16.msra.mxu1 %v8565_v22 }
 0xae3   :  { %7580 = vmatprep.subr.bf16.mxu1 %v10295_v58 }
 0xae5   :  { %6335 = vmatmul.mubr.bf16.vlgmr.msra.gmra.mrb[80].mxu1 %v6171_v1 }
 0xae6   :  { %7581 = vmatpush3.bf16.msra.mxu1 %v8566_v53  ;;  %7596 = vmatprep.mubr.msk.bf16.mxu1 %vm8617_vm12, %v8582_v49 }
 0xae7   :  { %7582 = vmatprep.subr.bf16.mxu1 %v10295_v58 }
 0xaea   :  { %7583 = vmatpush3.bf16.msra.mxu1 %v8567_v29 }
 0xaeb   :  { %7584 = vmatprep.subr.bf16.mxu1 %v10295_v58 }
 0xaee   :  { %7585 = vmatpush3.bf16.msra.mxu1 %v8568_v11 }
 0xaef   :  { %7586 = vmatprep.subr.bf16.mxu1 %v10295_v58  ;;  %v8573_v58 = vld [vmem:[%s10675_s11 + $0x38] ss:$0 sps:$4 sm:$0xff]  }
 0xaf0   :  { %v6426_v36 = vsel %vm6424_vm11, %v8573_v58, 0 }
 0xaf2   :  { %7587 = vmatpush3.bf16.msra.mxu1 %v8569_v55 }
 0xaf3   :  { %7588 = vmatprep.subr.bf16.mxu1 %v8582_v49 }
 0xaf6   :  { %7589 = vmatpush3.bf16.msra.mxu1 %v8570_v47 }
 0xaf7   :  { %7590 = vmatprep.subr.bf16.mxu1 %v8582_v49 }
 0xafa   :  { %7591 = vmatpush3.bf16.msra.mxu1 %v8571_v34 }
 0xafb   :  { %7592 = vmatprep.subr.bf16.mxu1 %v8582_v49 }
 0xafe   :  { %7593 = vmatpush3.bf16.msra.mxu1 %v8572_v51 }
 0xaff   :  { %7594 = vmatprep.subr.bf16.mxu1 %v8582_v49 }
 0xb02   :  { %7595 = vmatpush3.bf16.msra.mxu1 %v6426_v36 }
 0xb03   :  { %7600 = vmatprep.subr.bf16.mxu1 %v8582_v49 }
 0xb58   :  { %v7492_v60 = vpop.f32.mrb[68].mxu1 }
 0xb59   :  { %v7493_v10 = vpop.f32.mrb[69].mxu1 }
 0xb5a   :  { %v7494_v5 = vadd.f32 %v7493_v10, %v7492_v60  ;;  %v7495_v4 = vpop.f32.mrb[70].mxu1 }
 0xb5b   :  { %v7496_v15 = vpop.f32.mrb[71].mxu1 }
 0xb78   :  { %v7514_v25 = vpop.f32.mrb[72].mxu1 }
 0xb79   :  { %v7515_v26 = vpop.f32.mrb[73].mxu1 }
 0xb7a   :  { %v7516_v48 = vadd.f32 %v7515_v26, %v7514_v25  ;;  %v7517_v35 = vpop.f32.mrb[74].mxu1 }
 0xb7b   :  { %v7518_v30 = vpop.f32.mrb[75].mxu1 }
 0xb7c   :  { %v5994_v6 = vadd.f32 %v7516_v48, %v7494_v5 }
 0xb98   :  { %v7536_v20 = vpop.f32.mrb[76].mxu1 }
 0xb99   :  { %v7537_v18 = vpop.f32.mrb[77].mxu1 }
 0xb9a   :  { %v7538_v43 = vadd.f32 %v7537_v18, %v7536_v20  ;;  %v7539_v42 = vpop.f32.mrb[78].mxu1 }
 0xb9b   :  { %v7540_v21 = vpop.f32.mrb[79].mxu1 }
 0xb9c   :  { %v6170_v33 = vadd.f32 %v7538_v43, %v5994_v6 }
 0xbb8   :  { %v7558_v63 = vpop.f32.mrb[80].mxu1 }
 0xbb9   :  { %v7559_v3 = vpop.f32.mrb[81].mxu1 }
 0xbba   :  { %v7560_v37 = vadd.f32 %v7559_v3, %v7558_v63  ;;  %v7561_v62 = vpop.f32.mrb[82].mxu1 }
 0xbbb   :  { %v7562_v13 = vpop.f32.mrb[83].mxu1 }
 0xbbc   :  { %v6342_v7 = vadd.f32 %v7560_v37, %v6170_v33 }
 0xbbe   :  { %v6350_v16 = vadd.f32 %v7457_v50, %v6342_v7 }
 0xbc0   :  { %v6351_v44 = vmax.f32 %v6350_v16, 0.0 }
 0xbc2   :  { %v6352_v23 = vpack.c.bf16 %v6351_v44, %v6351_v44 }
 0xbc4   :  { %7597 = vmatmul.mubr.msk.bf16.vlgmr.msra.gmra.mrb[84].mxu1 %vm6420_vm13, %v6352_v23 }
 0xbc5   :  { %7601 = vmatpush3.bf16.msra.mxu1 %v8574_v41  ;;  %7612 = vmatprep.mubr.msk.bf16.mxu1 %vm8617_vm12, %v8582_v49 }
 0xbc6   :  { %7602 = vmatprep.subr.bf16.mxu1 %v8582_v49 }
 0xbc9   :  { %7603 = vmatpush3.bf16.msra.mxu1 %v8575_v56 }
 0xbca   :  { %7604 = vmatprep.subr.bf16.mxu1 %v8582_v49 }
 0xbcd   :  { %7605 = vmatpush3.bf16.msra.mxu1 %v8576_v27 }
 0xbce   :  { %7606 = vmatprep.subr.bf16.mxu1 %v8582_v49 }
 0xbd1   :  { %7607 = vmatpush3.bf16.msra.mxu1 %v8577_v24 }
 0xbd2   :  { %7608 = vmatprep.subr.bf16.mxu1 %v8582_v49 }
 0xbd5   :  { %7609 = vmatpush3.bf16.msra.mxu1 %v8578_v0 }
 0xbd6   :  { %7610 = vmatprep.subr.bf16.mxu1 %v8582_v49 }
 0xbd9   :  { %7611 = vmatpush3.bf16.msra.mxu1 %v6527_v19 }
 0xc97   :  { %v6462_v14 = vpop.f32.mrb[84].mxu1 }
 0xc98   :  { %v6463_v17 = vadd.f32 %v7458_v39, %v6462_v14  ;;  %v7598_v59 = vpop.f32.mrb[85].mxu1 }
 0xc99   :  { %v6465_v40 = vpop.f32.mrb[86].mxu1 }
 0xc9a   :  { %v6468_v45 = vmax.f32 %v6463_v17, 0.0  ;;  %v7599_v8 = vpop.f32.mrb[87].mxu1 }
 0xc9c   :  { %v6469_v9 = vpack.c.bf16 %v6468_v45, %v6468_v45 }
 0xc9e   :  { %7613 = vmatmul.mubr.msk.bf16.vlgmr.msra.gmra.mrb[88].mxu1 %vm6521_vm15, %v6469_v9 }
 0xd71   :  { %v6563_v31 = vpop.f32.mrb[88].mxu1 }
 0xd72   :  { %v6564_v52 = vadd.f32 %v7468_v46, %v6563_v31  ;;  %v7614_v2 = vpop.f32.mrb[89].mxu1 }
 0xd73   :  { %v6566_v38 = vpop.f32.mrb[90].mxu1 }
 0xd74   :  { %6570 = vst.msk [vmem:[%s10679_s15] sm:$0xff] %vm6569_vm0, %v6564_v52  ;;  %v7615_v57 = vpop.f32.mrb[91].mxu1 }
 0xd75   :  { %6575 = vsyncpa [#allocation6], 1 }

</bundles_post_ra>
